<compile_context>
chip_gen: v7x
topology: tpu7x:2x2x1
jax: 0.10.0
libtpu: 0.0.40
codegen_flags: <defaults>
</compile_context>

<pallas_src>
import functools

import jax
import jax.numpy as jnp
from jax import lax
from jax.experimental import pallas as pl
from jax.experimental.pallas import tpu as pltpu

_HP = jax.lax.Precision.HIGHEST          # used only by the pure-JAX reference

# Kernel gate slots [i, f, o, g]  <-  PyTorch's packed chunks [i, f, g, o].
_PT_TO_KERNEL_GATE = (0, 1, 3, 2)


# --------------------------------------------------------------------------------------
# Fused 2-layer LSTM recurrence (runs inside the kernel, everything in vregs).
# --------------------------------------------------------------------------------------
def _fused_pair_scan(B, T, H1, HT, w_rec, xg_fn, collect_h2):
    """Runs two stacked LSTM layers as ONE software-pipelined recurrence.

    State layout: h = [h1_t | h2_{t-1}] (B, HT); one (B, HT) @ (HT, 4*HT) MXU push per
    step produces layer-1's recurrent gates, layer-2's input projection and layer-2's
    recurrent gates at once (w_rec = [[W1_hh | W2_ih], [0 | W2_hh]]).  Gate columns are
    [I | F | O | G] with both layers adjacent inside each gate block, so one wide sigmoid
    covers both layers' i/f/o and one tanh covers both g's / both c's.

    Iteration t advances layer 1 to step t and layer 2 to step t-1; iteration t == T is a
    drain step that finishes layer 2.  Returns (h2_final, outs) with outs[k] = layer-2
    hidden state at time k (only when collect_h2).
    """
    # T is small here (EEG window): a full static unroll keeps h/c in vregs and exposes the
    # whole serial chain to the scheduler.  See TODO(synk) above for T >~ 64.
    c = jnp.zeros((B, HT), jnp.float32)
    h = jnp.zeros((B, HT), jnp.float32)
    keep_l1 = (lax.broadcasted_iota(jnp.int32, (1, HT), 1) < H1).astype(jnp.float32)
    outs = []
    for t in range(T + 1):
        gates = xg_fn(t) + jnp.dot(h, w_rec, preferred_element_type=jnp.float32)
        sig = jax.nn.sigmoid(gates[:, :3 * HT])        # i|f|o of BOTH layers: one EUP push
        g = jnp.tanh(gates[:, 3 * HT:])                # g of both layers
        c = sig[:, HT:2 * HT] * c + sig[:, :HT] * g
        h = sig[:, 2 * HT:] * jnp.tanh(c)              # tanh(c1|c2) in one push
        if t == 0:
            # Layer 2's warm-up step (driven by h1_{-1}=0, bias-only gates) is spurious:
            # reset its lanes so its real step 0 starts from h2 = c2 = 0.
            c = c * keep_l1
            h = h * keep_l1
        elif collect_h2:
            outs.append(h[:, H1:])                     # layer-2 hidden at time t-1
    return h[:, H1:], outs


# --------------------------------------------------------------------------------------
# The fused forward kernel: one batch tile per grid step, everything else in one body.
# --------------------------------------------------------------------------------------
def _lstm_ae_kernel(x_ref,
                    w_in_e_ref, w_rec_e_ref, b_e_ref,      # fused encoder LSTM pair
                    wfe_ref, bfe_ref, wfd_ref, bfd_ref,    # encoder_fc / decoder_fc
                    w_in_d_ref, w_rec_d_ref, b_d_ref,      # fused decoder LSTM pair
                    o_ref, *, seq_len):
    T = seq_len
    Bt = x_ref.shape[0]
    D = x_ref.shape[1] // T

    x = x_ref[...]                                         # (Bt, T*D) lane-dense load
    w_in_e = w_in_e_ref[...]; w_rec_e = w_rec_e_ref[...]; b_e = b_e_ref[...]
    wfe = wfe_ref[...]; bfe = bfe_ref[...]
    wfd = wfd_ref[...]; bfd = bfd_ref[...]
    w_in_d = w_in_d_ref[...]; w_rec_d = w_rec_d_ref[...]; b_d = b_d_ref[...]

    HT_e = w_rec_e.shape[0]
    H1_e = HT_e - wfe.shape[0]        # encoder pair: layer-2 hidden size == N_i == rows(wfe)
    HT_d = w_rec_d.shape[0]
    H1_d = HT_d - D                   # decoder pair: layer-2 hidden size == input_size

    # ----------------------------- encoder (lstm1 + lstm2, pipelined) -----------------------------
    def xg_enc(t):
        if t == T:                                       # drain step: bias only
            return b_e
        x_t = x[:, t * D:(t + 1) * D]                    # (Bt, D) static lane slice
        return jnp.dot(x_t, w_in_e, preferred_element_type=jnp.float32) + b_e

    h2_enc, _ = _fused_pair_scan(Bt, T, H1_e, HT_e, w_rec_e, xg_enc, collect_h2=False)

    # ----------------------------- bottleneck FCs -----------------------------
    latent = jnp.dot(h2_enc, wfe, preferred_element_type=jnp.float32) + bfe     # (Bt, N_LS)
    d = jnp.dot(latent, wfd, preferred_element_type=jnp.float32) + bfd          # (Bt, N_i)

    # ----------------------------- decoder (lstm1 + lstm2, pipelined) -----------------------------
    # decoder_lstm1's input is `d` broadcast over the window: project once, reuse every step.
    xg_dec = jnp.dot(d, w_in_d, preferred_element_type=jnp.float32) + b_d       # (Bt, 4*HT_d)

    _, outs = _fused_pair_scan(Bt, T, H1_d, HT_d, w_rec_d, lambda t: xg_dec, collect_h2=True)

    # Single lane-dense store of the whole reconstruction for this batch tile.
    o_ref[...] = jnp.concatenate(outs, axis=1)           # (Bt, T*D)


def lstm_autoencoder_forward(x, kparams, *, num_tiles=2):
    B, T, D = x.shape
    # >=2 parallel tiles keeps both v7x TensorCores busy; fall back to 1 tile when the
    # per-tile sublane count would not be a clean (8, ...) block.
    if num_tiles < 1 or B % num_tiles != 0 or (num_tiles > 1 and (B // num_tiles) % 8 != 0):
        num_tiles = 1
    b_tile = B // num_tiles

    weights = (kparams["w_in_e"], kparams["w_rec_e"], kparams["b_e"],
               kparams["wfe"], kparams["bfe"], kparams["wfd"], kparams["bfd"],
               kparams["w_in_d"], kparams["w_rec_d"], kparams["b_d"])

    x2 = x.reshape(B, T * D)                              # lane-dense activation layout

    out = pl.pallas_call(
        functools.partial(_lstm_ae_kernel, seq_len=T),
        out_shape=jax.ShapeDtypeStruct((B, T * D), jnp.float32),
        grid=(num_tiles,),
        in_specs=[pl.BlockSpec((b_tile, T * D), lambda i: (i, 0))]
                 + [pl.BlockSpec(w.shape, lambda i: (0, 0)) for w in weights],
        out_specs=pl.BlockSpec((b_tile, T * D), lambda i: (i, 0)),
        compiler_params=pltpu.CompilerParams(
            dimension_semantics=("parallel",)),           # v7x: one batch tile per TensorCore
    )(x2, *weights)
    return out.reshape(B, T, D)


# --------------------------------------------------------------------------------------
# Parameters: synthetic init in PyTorch layouts + conversion to the fused kernel layout.
# Loading a real checkpoint must apply the identical fusion (gate permutation, transposes,
# b_ih + b_hh summation, zero blocks) via convert_params().
# --------------------------------------------------------------------------------------
def init_torch_params(key, input_size, N_o, N_i, N_LS):
    keys = iter(jax.random.split(key, 32))

    def normal(shape, scale=0.1):
        return scale * jax.random.normal(next(keys), shape, jnp.float32)

    def lstm(cin, h):
        return {"w_ih": normal((4 * h, cin)), "w_hh": normal((4 * h, h)),
                "b_ih": normal((4 * h,)), "b_hh": normal((4 * h,))}

    def linear(cin, cout):
        return {"w": normal((cout, cin)), "b": normal((cout,))}

    return {
        "enc_lstm1": lstm(input_size, N_o),
        "enc_lstm2": lstm(N_o, N_i),
        "enc_fc": linear(N_i, N_LS),
        "dec_fc": linear(N_LS, N_i),
        "dec_lstm1": lstm(N_i, N_o),
        "dec_lstm2": lstm(N_o, input_size),
    }


def _gate_rows(w, h, pt_idx):
    return w[pt_idx * h:(pt_idx + 1) * h]


def _fuse_lstm_pair(l1, l2):
    """Build the fused-pair kernel weights from two PyTorch-layout LSTM layers.

    Column layout (width 4*(H1+H2)): [I | F | O | G], each gate block holding layer-1's H1
    lanes followed by layer-2's H2 lanes.  Returns:
      w_in  (in1, 4*HT): layer-1 input projection, zero in layer-2 lanes
      w_rec (HT,  4*HT): rows [0,H1) = [W1_hh | W2_ih], rows [H1,HT) = [0 | W2_hh]
      b     (1,   4*HT): (b_ih + b_hh) of both layers
    """
    H1 = l1["w_hh"].shape[1]
    H2 = l2["w_hh"].shape[1]
    D1 = l1["w_ih"].shape[1]
    HT = H1 + H2
    w_in = jnp.zeros((D1, 4 * HT), jnp.float32)
    w_rec = jnp.zeros((HT, 4 * HT), jnp.float32)
    b = jnp.zeros((1, 4 * HT), jnp.float32)
    for slot, pt in enumerate(_PT_TO_KERNEL_GATE):
        c1 = slice(slot * HT, slot * HT + H1)            # layer-1 lanes of this gate
        c2 = slice(slot * HT + H1, (slot + 1) * HT)      # layer-2 lanes of this gate
        w_in = w_in.at[:, c1].set(_gate_rows(l1["w_ih"], H1, pt).T)
        w_rec = w_rec.at[:H1, c1].set(_gate_rows(l1["w_hh"], H1, pt).T)
        w_rec = w_rec.at[:H1, c2].set(_gate_rows(l2["w_ih"], H2, pt).T)
        w_rec = w_rec.at[H1:, c2].set(_gate_rows(l2["w_hh"], H2, pt).T)
        b = b.at[:, c1].set((_gate_rows(l1["b_ih"], H1, pt)
                             + _gate_rows(l1["b_hh"], H1, pt))[None, :])
        b = b.at[:, c2].set((_gate_rows(l2["b_ih"], H2, pt)
                             + _gate_rows(l2["b_hh"], H2, pt))[None, :])
    return w_in, w_rec, b


def convert_params(tp):
    w_in_e, w_rec_e, b_e = _fuse_lstm_pair(tp["enc_lstm1"], tp["enc_lstm2"])
    w_in_d, w_rec_d, b_d = _fuse_lstm_pair(tp["dec_lstm1"], tp["dec_lstm2"])
    return dict(
        w_in_e=w_in_e, w_rec_e=w_rec_e, b_e=b_e,
        wfe=tp["enc_fc"]["w"].T, bfe=tp["enc_fc"]["b"][None, :],
        wfd=tp["dec_fc"]["w"].T, bfd=tp["dec_fc"]["b"][None, :],
        w_in_d=w_in_d, w_rec_d=w_rec_d, b_d=b_d,
    )


# --------------------------------------------------------------------------------------
# Pure-JAX reference straight from the PyTorch-layout weights (independent of the fusion).
# --------------------------------------------------------------------------------------
def _lstm_ref(x, p):
    B, _, _ = x.shape
    H = p["w_hh"].shape[1]
    w_ih_t, w_hh_t = p["w_ih"].T, p["w_hh"].T
    b = p["b_ih"] + p["b_hh"]

    def step(carry, x_t):
        h, c = carry
        gates = (jnp.dot(x_t, w_ih_t, precision=_HP)
                 + jnp.dot(h, w_hh_t, precision=_HP) + b)
        i = jax.nn.sigmoid(gates[:, :H])
        f = jax.nn.sigmoid(gates[:, H:2 * H])
        g = jnp.tanh(gates[:, 2 * H:3 * H])
        o = jax.nn.sigmoid(gates[:, 3 * H:])
        c = f * c + i * g
        h = o * jnp.tanh(c)
        return (h, c), h

    init = (jnp.zeros((B, H), jnp.float32), jnp.zeros((B, H), jnp.float32))
    (h, _), hs = lax.scan(step, init, jnp.swapaxes(x, 0, 1))
    return jnp.swapaxes(hs, 0, 1), h


def reference_forward(x, tp):
    B, T, _ = x.shape
    h, _ = _lstm_ref(x, tp["enc_lstm1"])
    _, h_last = _lstm_ref(h, tp["enc_lstm2"])
    latent = jnp.dot(h_last, tp["enc_fc"]["w"].T, precision=_HP) + tp["enc_fc"]["b"]
    d = jnp.dot(latent, tp["dec_fc"]["w"].T, precision=_HP) + tp["dec_fc"]["b"]
    d_seq = jnp.broadcast_to(d[:, None, :], (B, T, d.shape[-1]))
    h, _ = _lstm_ref(d_seq, tp["dec_lstm1"])
    h, _ = _lstm_ref(h, tp["dec_lstm2"])
    return h


if __name__ == "__main__":
    key = jax.random.PRNGKey(0)
    k_param, k_x = jax.random.split(key)

    # Small shapes consistent with the module's forward (batch rows feed the MXU directly).
    B, window, input_size = 16, 16, 4
    N_o, N_i, N_LS = 32, 16, 32

    torch_params = init_torch_params(k_param, input_size, N_o, N_i, N_LS)
    kernel_params = convert_params(torch_params)
    x = jax.random.normal(k_x, (B, window, input_size), jnp.float32)

    out = jax.jit(lstm_autoencoder_forward)(x, kernel_params)
    jax.block_until_ready(out)

    assert out.shape == (B, window, input_size), out.shape
    assert bool(jnp.all(jnp.isfinite(out)))

    # Tightened from (atol=1e-2, rtol=5e-2).  Kept at 2e-3 rather than 1e-5 only because the
    # kernel's fused f32 MXU dots and XLA's reference dots are not guaranteed to use the same
    # f32-via-bf16 pass count under default precision; any gate-permutation / layout bug shows
    # up at O(1e-1), orders of magnitude above this bound (observed error is ~1e-6 when the
    # MXU uses exact f32 passes).
    ref = reference_forward(x, torch_params)
    err = float(jnp.max(jnp.abs(out - ref)))
    assert err < 2e-3, err

    print("KERNEL_OK")
</pallas_src>

<mosaic_0001>
module attributes {stable_mosaic.version = 11 : i64} {
  func.func @_lstm_ae_kernel(%arg0: i32, %arg1: memref<8x64xf32, #tpu.memory_space<vmem>>, %arg2: memref<4x192xf32, #tpu.memory_space<vmem>>, %arg3: memref<48x192xf32, #tpu.memory_space<vmem>>, %arg4: memref<1x192xf32, #tpu.memory_space<vmem>>, %arg5: memref<16x32xf32, #tpu.memory_space<vmem>>, %arg6: memref<1x32xf32, #tpu.memory_space<vmem>>, %arg7: memref<32x16xf32, #tpu.memory_space<vmem>>, %arg8: memref<1x16xf32, #tpu.memory_space<vmem>>, %arg9: memref<16x144xf32, #tpu.memory_space<vmem>>, %arg10: memref<36x144xf32, #tpu.memory_space<vmem>>, %arg11: memref<1x144xf32, #tpu.memory_space<vmem>>, %arg12: memref<8x64xf32, #tpu.memory_space<vmem>>) attributes {dimension_semantics = [#tpu.dimension_semantics<parallel>], iteration_bounds = array<i64: 2>, scalar_prefetch = 0 : i64, scratch_operands = 0 : i64, tpu.core_type = #tpu.core_type<tc>, window_params = [{transform_indices = @transform_0, window_bounds = array<i64: 8, 64>}, {pipeline_mode = #tpu.pipeline_mode<synchronous>, transform_indices = @transform_1, window_bounds = array<i64: 4, 192>}, {pipeline_mode = #tpu.pipeline_mode<synchronous>, transform_indices = @transform_2, window_bounds = array<i64: 48, 192>}, {pipeline_mode = #tpu.pipeline_mode<synchronous>, transform_indices = @transform_3, window_bounds = array<i64: 1, 192>}, {pipeline_mode = #tpu.pipeline_mode<synchronous>, transform_indices = @transform_4, window_bounds = array<i64: 16, 32>}, {pipeline_mode = #tpu.pipeline_mode<synchronous>, transform_indices = @transform_5, window_bounds = array<i64: 1, 32>}, {pipeline_mode = #tpu.pipeline_mode<synchronous>, transform_indices = @transform_6, window_bounds = array<i64: 32, 16>}, {pipeline_mode = #tpu.pipeline_mode<synchronous>, transform_indices = @transform_7, window_bounds = array<i64: 1, 16>}, {pipeline_mode = #tpu.pipeline_mode<synchronous>, transform_indices = @transform_8, window_bounds = array<i64: 16, 144>}, {pipeline_mode = #tpu.pipeline_mode<synchronous>, transform_indices = @transform_9, window_bounds = array<i64: 36, 144>}, {pipeline_mode = #tpu.pipeline_mode<synchronous>, transform_indices = @transform_10, window_bounds = array<i64: 1, 144>}, {transform_indices = @transform_11, window_bounds = array<i64: 8, 64>}]} {
    %c0 = arith.constant 0 : index
    %c0_0 = arith.constant 0 : index
    %0 = vector.load %arg1[%c0, %c0_0] : memref<8x64xf32, #tpu.memory_space<vmem>>, vector<8x64xf32>
    %c0_1 = arith.constant 0 : index
    %c0_2 = arith.constant 0 : index
    %1 = vector.load %arg2[%c0_1, %c0_2] : memref<4x192xf32, #tpu.memory_space<vmem>>, vector<4x192xf32>
    %c0_3 = arith.constant 0 : index
    %c0_4 = arith.constant 0 : index
    %2 = vector.load %arg3[%c0_3, %c0_4] : memref<48x192xf32, #tpu.memory_space<vmem>>, vector<48x192xf32>
    %c0_5 = arith.constant 0 : index
    %c0_6 = arith.constant 0 : index
    %3 = vector.load %arg4[%c0_5, %c0_6] : memref<1x192xf32, #tpu.memory_space<vmem>>, vector<1x192xf32>
    %c0_7 = arith.constant 0 : index
    %c0_8 = arith.constant 0 : index
    %4 = vector.load %arg5[%c0_7, %c0_8] : memref<16x32xf32, #tpu.memory_space<vmem>>, vector<16x32xf32>
    %c0_9 = arith.constant 0 : index
    %c0_10 = arith.constant 0 : index
    %5 = vector.load %arg6[%c0_9, %c0_10] : memref<1x32xf32, #tpu.memory_space<vmem>>, vector<1x32xf32>
    %c0_11 = arith.constant 0 : index
    %c0_12 = arith.constant 0 : index
    %6 = vector.load %arg7[%c0_11, %c0_12] : memref<32x16xf32, #tpu.memory_space<vmem>>, vector<32x16xf32>
    %c0_13 = arith.constant 0 : index
    %c0_14 = arith.constant 0 : index
    %7 = vector.load %arg8[%c0_13, %c0_14] : memref<1x16xf32, #tpu.memory_space<vmem>>, vector<1x16xf32>
    %c0_15 = arith.constant 0 : index
    %c0_16 = arith.constant 0 : index
    %8 = vector.load %arg9[%c0_15, %c0_16] : memref<16x144xf32, #tpu.memory_space<vmem>>, vector<16x144xf32>
    %c0_17 = arith.constant 0 : index
    %c0_18 = arith.constant 0 : index
    %9 = vector.load %arg10[%c0_17, %c0_18] : memref<36x144xf32, #tpu.memory_space<vmem>>, vector<36x144xf32>
    %c0_19 = arith.constant 0 : index
    %c0_20 = arith.constant 0 : index
    %10 = vector.load %arg11[%c0_19, %c0_20] : memref<1x144xf32, #tpu.memory_space<vmem>>, vector<1x144xf32>
    %cst = arith.constant 0.000000e+00 : f32
    %11 = vector.broadcast %cst : f32 to vector<8x48xf32>
    %cst_21 = arith.constant 0.000000e+00 : f32
    %12 = vector.broadcast %cst_21 : f32 to vector<8x48xf32>
    %13 = tpu.iota {dimensions = array<i32: 1>} : vector<1x48xi32>
    %c32_i32 = arith.constant 32 : i32
    %14 = vector.broadcast %c32_i32 : i32 to vector<1x48xi32>
    %15 = arith.cmpi slt, %13, %14 : vector<1x48xi32>
    %16 = arith.extui %15 : vector<1x48xi1> to vector<1x48xi32>
    %17 = arith.sitofp %16 : vector<1x48xi32> to vector<1x48xf32>
    %18 = vector.extract_strided_slice %0 {offsets = [0, 0], sizes = [8, 4], strides = [1, 1]} : vector<8x64xf32> to vector<8x4xf32>
    %cst_22 = arith.constant dense<0.000000e+00> : vector<8x192xf32>
    %19 = tpu.matmul %18, %1, %cst_22 {dimension_numbers = #tpu.dot_dimension_numbers<[1], [0], [0], [1], [0, 0, 1, 1], [], []>} : vector<8x4xf32>, vector<4x192xf32>, vector<8x192xf32> -> vector<8x192xf32>
    %20 = vector.broadcast %3 : vector<1x192xf32> to vector<8x192xf32>
    %21 = arith.addf %19, %20 : vector<8x192xf32>
    %cst_23 = arith.constant dense<0.000000e+00> : vector<8x192xf32>
    %22 = tpu.matmul %12, %2, %cst_23 {dimension_numbers = #tpu.dot_dimension_numbers<[1], [0], [0], [1], [0, 0, 1, 1], [], []>} : vector<8x48xf32>, vector<48x192xf32>, vector<8x192xf32> -> vector<8x192xf32>
    %23 = arith.addf %21, %22 : vector<8x192xf32>
    %24 = vector.extract_strided_slice %23 {offsets = [0, 0], sizes = [8, 144], strides = [1, 1]} : vector<8x192xf32> to vector<8x144xf32>
    %25 = arith.negf %24 : vector<8x144xf32>
    %26 = math.exp %25 : vector<8x144xf32>
    %cst_24 = arith.constant 1.000000e+00 : f32
    %27 = vector.broadcast %cst_24 : f32 to vector<8x144xf32>
    %28 = arith.addf %27, %26 : vector<8x144xf32>
    %29 = arith.divf %27, %28 : vector<8x144xf32>
    %30 = vector.extract_strided_slice %23 {offsets = [0, 144], sizes = [8, 48], strides = [1, 1]} : vector<8x192xf32> to vector<8x48xf32>
    %31 = math.tanh %30 : vector<8x48xf32>
    %32 = vector.extract_strided_slice %29 {offsets = [0, 48], sizes = [8, 48], strides = [1, 1]} : vector<8x144xf32> to vector<8x48xf32>
    %33 = arith.mulf %32, %11 : vector<8x48xf32>
    %34 = vector.extract_strided_slice %29 {offsets = [0, 0], sizes = [8, 48], strides = [1, 1]} : vector<8x144xf32> to vector<8x48xf32>
    %35 = arith.mulf %34, %31 : vector<8x48xf32>
    %36 = arith.addf %33, %35 : vector<8x48xf32>
    %37 = vector.extract_strided_slice %29 {offsets = [0, 96], sizes = [8, 48], strides = [1, 1]} : vector<8x144xf32> to vector<8x48xf32>
    %38 = math.tanh %36 : vector<8x48xf32>
    %39 = arith.mulf %37, %38 : vector<8x48xf32>
    %40 = vector.broadcast %17 : vector<1x48xf32> to vector<8x48xf32>
    %41 = arith.mulf %36, %40 : vector<8x48xf32>
    %42 = vector.broadcast %17 : vector<1x48xf32> to vector<8x48xf32>
    %43 = arith.mulf %39, %42 : vector<8x48xf32>
    %44 = vector.extract_strided_slice %0 {offsets = [0, 4], sizes = [8, 4], strides = [1, 1]} : vector<8x64xf32> to vector<8x4xf32>
    %cst_25 = arith.constant dense<0.000000e+00> : vector<8x192xf32>
    %45 = tpu.matmul %44, %1, %cst_25 {dimension_numbers = #tpu.dot_dimension_numbers<[1], [0], [0], [1], [0, 0, 1, 1], [], []>} : vector<8x4xf32>, vector<4x192xf32>, vector<8x192xf32> -> vector<8x192xf32>
    %46 = vector.broadcast %3 : vector<1x192xf32> to vector<8x192xf32>
    %47 = arith.addf %45, %46 : vector<8x192xf32>
    %cst_26 = arith.constant dense<0.000000e+00> : vector<8x192xf32>
    %48 = tpu.matmul %43, %2, %cst_26 {dimension_numbers = #tpu.dot_dimension_numbers<[1], [0], [0], [1], [0, 0, 1, 1], [], []>} : vector<8x48xf32>, vector<48x192xf32>, vector<8x192xf32> -> vector<8x192xf32>
    %49 = arith.addf %47, %48 : vector<8x192xf32>
    %50 = vector.extract_strided_slice %49 {offsets = [0, 0], sizes = [8, 144], strides = [1, 1]} : vector<8x192xf32> to vector<8x144xf32>
    %51 = arith.negf %50 : vector<8x144xf32>
    %52 = math.exp %51 : vector<8x144xf32>
    %cst_27 = arith.constant 1.000000e+00 : f32
    %53 = vector.broadcast %cst_27 : f32 to vector<8x144xf32>
    %54 = arith.addf %53, %52 : vector<8x144xf32>
    %55 = arith.divf %53, %54 : vector<8x144xf32>
    %56 = vector.extract_strided_slice %49 {offsets = [0, 144], sizes = [8, 48], strides = [1, 1]} : vector<8x192xf32> to vector<8x48xf32>
    %57 = math.tanh %56 : vector<8x48xf32>
    %58 = vector.extract_strided_slice %55 {offsets = [0, 48], sizes = [8, 48], strides = [1, 1]} : vector<8x144xf32> to vector<8x48xf32>
    %59 = arith.mulf %58, %41 : vector<8x48xf32>
    %60 = vector.extract_strided_slice %55 {offsets = [0, 0], sizes = [8, 48], strides = [1, 1]} : vector<8x144xf32> to vector<8x48xf32>
    %61 = arith.mulf %60, %57 : vector<8x48xf32>
    %62 = arith.addf %59, %61 : vector<8x48xf32>
    %63 = vector.extract_strided_slice %55 {offsets = [0, 96], sizes = [8, 48], strides = [1, 1]} : vector<8x144xf32> to vector<8x48xf32>
    %64 = math.tanh %62 : vector<8x48xf32>
    %65 = arith.mulf %63, %64 : vector<8x48xf32>
    %66 = vector.extract_strided_slice %0 {offsets = [0, 8], sizes = [8, 4], strides = [1, 1]} : vector<8x64xf32> to vector<8x4xf32>
    %cst_28 = arith.constant dense<0.000000e+00> : vector<8x192xf32>
    %67 = tpu.matmul %66, %1, %cst_28 {dimension_numbers = #tpu.dot_dimension_numbers<[1], [0], [0], [1], [0, 0, 1, 1], [], []>} : vector<8x4xf32>, vector<4x192xf32>, vector<8x192xf32> -> vector<8x192xf32>
    %68 = vector.broadcast %3 : vector<1x192xf32> to vector<8x192xf32>
    %69 = arith.addf %67, %68 : vector<8x192xf32>
    %cst_29 = arith.constant dense<0.000000e+00> : vector<8x192xf32>
    %70 = tpu.matmul %65, %2, %cst_29 {dimension_numbers = #tpu.dot_dimension_numbers<[1], [0], [0], [1], [0, 0, 1, 1], [], []>} : vector<8x48xf32>, vector<48x192xf32>, vector<8x192xf32> -> vector<8x192xf32>
    %71 = arith.addf %69, %70 : vector<8x192xf32>
    %72 = vector.extract_strided_slice %71 {offsets = [0, 0], sizes = [8, 144], strides = [1, 1]} : vector<8x192xf32> to vector<8x144xf32>
    %73 = arith.negf %72 : vector<8x144xf32>
    %74 = math.exp %73 : vector<8x144xf32>
    %cst_30 = arith.constant 1.000000e+00 : f32
    %75 = vector.broadcast %cst_30 : f32 to vector<8x144xf32>
    %76 = arith.addf %75, %74 : vector<8x144xf32>
    %77 = arith.divf %75, %76 : vector<8x144xf32>
    %78 = vector.extract_strided_slice %71 {offsets = [0, 144], sizes = [8, 48], strides = [1, 1]} : vector<8x192xf32> to vector<8x48xf32>
    %79 = math.tanh %78 : vector<8x48xf32>
    %80 = vector.extract_strided_slice %77 {offsets = [0, 48], sizes = [8, 48], strides = [1, 1]} : vector<8x144xf32> to vector<8x48xf32>
    %81 = arith.mulf %80, %62 : vector<8x48xf32>
    %82 = vector.extract_strided_slice %77 {offsets = [0, 0], sizes = [8, 48], strides = [1, 1]} : vector<8x144xf32> to vector<8x48xf32>
    %83 = arith.mulf %82, %79 : vector<8x48xf32>
    %84 = arith.addf %81, %83 : vector<8x48xf32>
    %85 = vector.extract_strided_slice %77 {offsets = [0, 96], sizes = [8, 48], strides = [1, 1]} : vector<8x144xf32> to vector<8x48xf32>
    %86 = math.tanh %84 : vector<8x48xf32>
    %87 = arith.mulf %85, %86 : vector<8x48xf32>
    %88 = vector.extract_strided_slice %0 {offsets = [0, 12], sizes = [8, 4], strides = [1, 1]} : vector<8x64xf32> to vector<8x4xf32>
    %cst_31 = arith.constant dense<0.000000e+00> : vector<8x192xf32>
    %89 = tpu.matmul %88, %1, %cst_31 {dimension_numbers = #tpu.dot_dimension_numbers<[1], [0], [0], [1], [0, 0, 1, 1], [], []>} : vector<8x4xf32>, vector<4x192xf32>, vector<8x192xf32> -> vector<8x192xf32>
    %90 = vector.broadcast %3 : vector<1x192xf32> to vector<8x192xf32>
    %91 = arith.addf %89, %90 : vector<8x192xf32>
    %cst_32 = arith.constant dense<0.000000e+00> : vector<8x192xf32>
    %92 = tpu.matmul %87, %2, %cst_32 {dimension_numbers = #tpu.dot_dimension_numbers<[1], [0], [0], [1], [0, 0, 1, 1], [], []>} : vector<8x48xf32>, vector<48x192xf32>, vector<8x192xf32> -> vector<8x192xf32>
    %93 = arith.addf %91, %92 : vector<8x192xf32>
    %94 = vector.extract_strided_slice %93 {offsets = [0, 0], sizes = [8, 144], strides = [1, 1]} : vector<8x192xf32> to vector<8x144xf32>
    %95 = arith.negf %94 : vector<8x144xf32>
    %96 = math.exp %95 : vector<8x144xf32>
    %cst_33 = arith.constant 1.000000e+00 : f32
    %97 = vector.broadcast %cst_33 : f32 to vector<8x144xf32>
    %98 = arith.addf %97, %96 : vector<8x144xf32>
    %99 = arith.divf %97, %98 : vector<8x144xf32>
    %100 = vector.extract_strided_slice %93 {offsets = [0, 144], sizes = [8, 48], strides = [1, 1]} : vector<8x192xf32> to vector<8x48xf32>
    %101 = math.tanh %100 : vector<8x48xf32>
    %102 = vector.extract_strided_slice %99 {offsets = [0, 48], sizes = [8, 48], strides = [1, 1]} : vector<8x144xf32> to vector<8x48xf32>
    %103 = arith.mulf %102, %84 : vector<8x48xf32>
    %104 = vector.extract_strided_slice %99 {offsets = [0, 0], sizes = [8, 48], strides = [1, 1]} : vector<8x144xf32> to vector<8x48xf32>
    %105 = arith.mulf %104, %101 : vector<8x48xf32>
    %106 = arith.addf %103, %105 : vector<8x48xf32>
    %107 = vector.extract_strided_slice %99 {offsets = [0, 96], sizes = [8, 48], strides = [1, 1]} : vector<8x144xf32> to vector<8x48xf32>
    %108 = math.tanh %106 : vector<8x48xf32>
    %109 = arith.mulf %107, %108 : vector<8x48xf32>
    %110 = vector.extract_strided_slice %0 {offsets = [0, 16], sizes = [8, 4], strides = [1, 1]} : vector<8x64xf32> to vector<8x4xf32>
    %cst_34 = arith.constant dense<0.000000e+00> : vector<8x192xf32>
    %111 = tpu.matmul %110, %1, %cst_34 {dimension_numbers = #tpu.dot_dimension_numbers<[1], [0], [0], [1], [0, 0, 1, 1], [], []>} : vector<8x4xf32>, vector<4x192xf32>, vector<8x192xf32> -> vector<8x192xf32>
    %112 = vector.broadcast %3 : vector<1x192xf32> to vector<8x192xf32>
    %113 = arith.addf %111, %112 : vector<8x192xf32>
    %cst_35 = arith.constant dense<0.000000e+00> : vector<8x192xf32>
    %114 = tpu.matmul %109, %2, %cst_35 {dimension_numbers = #tpu.dot_dimension_numbers<[1], [0], [0], [1], [0, 0, 1, 1], [], []>} : vector<8x48xf32>, vector<48x192xf32>, vector<8x192xf32> -> vector<8x192xf32>
    %115 = arith.addf %113, %114 : vector<8x192xf32>
    %116 = vector.extract_strided_slice %115 {offsets = [0, 0], sizes = [8, 144], strides = [1, 1]} : vector<8x192xf32> to vector<8x144xf32>
    %117 = arith.negf %116 : vector<8x144xf32>
    %118 = math.exp %117 : vector<8x144xf32>
    %cst_36 = arith.constant 1.000000e+00 : f32
    %119 = vector.broadcast %cst_36 : f32 to vector<8x144xf32>
    %120 = arith.addf %119, %118 : vector<8x144xf32>
    %121 = arith.divf %119, %120 : vector<8x144xf32>
    %122 = vector.extract_strided_slice %115 {offsets = [0, 144], sizes = [8, 48], strides = [1, 1]} : vector<8x192xf32> to vector<8x48xf32>
    %123 = math.tanh %122 : vector<8x48xf32>
    %124 = vector.extract_strided_slice %121 {offsets = [0, 48], sizes = [8, 48], strides = [1, 1]} : vector<8x144xf32> to vector<8x48xf32>
    %125 = arith.mulf %124, %106 : vector<8x48xf32>
    %126 = vector.extract_strided_slice %121 {offsets = [0, 0], sizes = [8, 48], strides = [1, 1]} : vector<8x144xf32> to vector<8x48xf32>
    %127 = arith.mulf %126, %123 : vector<8x48xf32>
    %128 = arith.addf %125, %127 : vector<8x48xf32>
    %129 = vector.extract_strided_slice %121 {offsets = [0, 96], sizes = [8, 48], strides = [1, 1]} : vector<8x144xf32> to vector<8x48xf32>
    %130 = math.tanh %128 : vector<8x48xf32>
    %131 = arith.mulf %129, %130 : vector<8x48xf32>
    %132 = vector.extract_strided_slice %0 {offsets = [0, 20], sizes = [8, 4], strides = [1, 1]} : vector<8x64xf32> to vector<8x4xf32>
    %cst_37 = arith.constant dense<0.000000e+00> : vector<8x192xf32>
    %133 = tpu.matmul %132, %1, %cst_37 {dimension_numbers = #tpu.dot_dimension_numbers<[1], [0], [0], [1], [0, 0, 1, 1], [], []>} : vector<8x4xf32>, vector<4x192xf32>, vector<8x192xf32> -> vector<8x192xf32>
    %134 = vector.broadcast %3 : vector<1x192xf32> to vector<8x192xf32>
    %135 = arith.addf %133, %134 : vector<8x192xf32>
    %cst_38 = arith.constant dense<0.000000e+00> : vector<8x192xf32>
    %136 = tpu.matmul %131, %2, %cst_38 {dimension_numbers = #tpu.dot_dimension_numbers<[1], [0], [0], [1], [0, 0, 1, 1], [], []>} : vector<8x48xf32>, vector<48x192xf32>, vector<8x192xf32> -> vector<8x192xf32>
    %137 = arith.addf %135, %136 : vector<8x192xf32>
    %138 = vector.extract_strided_slice %137 {offsets = [0, 0], sizes = [8, 144], strides = [1, 1]} : vector<8x192xf32> to vector<8x144xf32>
    %139 = arith.negf %138 : vector<8x144xf32>
    %140 = math.exp %139 : vector<8x144xf32>
    %cst_39 = arith.constant 1.000000e+00 : f32
    %141 = vector.broadcast %cst_39 : f32 to vector<8x144xf32>
    %142 = arith.addf %141, %140 : vector<8x144xf32>
    %143 = arith.divf %141, %142 : vector<8x144xf32>
    %144 = vector.extract_strided_slice %137 {offsets = [0, 144], sizes = [8, 48], strides = [1, 1]} : vector<8x192xf32> to vector<8x48xf32>
    %145 = math.tanh %144 : vector<8x48xf32>
    %146 = vector.extract_strided_slice %143 {offsets = [0, 48], sizes = [8, 48], strides = [1, 1]} : vector<8x144xf32> to vector<8x48xf32>
    %147 = arith.mulf %146, %128 : vector<8x48xf32>
    %148 = vector.extract_strided_slice %143 {offsets = [0, 0], sizes = [8, 48], strides = [1, 1]} : vector<8x144xf32> to vector<8x48xf32>
    %149 = arith.mulf %148, %145 : vector<8x48xf32>
    %150 = arith.addf %147, %149 : vector<8x48xf32>
    %151 = vector.extract_strided_slice %143 {offsets = [0, 96], sizes = [8, 48], strides = [1, 1]} : vector<8x144xf32> to vector<8x48xf32>
    %152 = math.tanh %150 : vector<8x48xf32>
    %153 = arith.mulf %151, %152 : vector<8x48xf32>
    %154 = vector.extract_strided_slice %0 {offsets = [0, 24], sizes = [8, 4], strides = [1, 1]} : vector<8x64xf32> to vector<8x4xf32>
    %cst_40 = arith.constant dense<0.000000e+00> : vector<8x192xf32>
    %155 = tpu.matmul %154, %1, %cst_40 {dimension_numbers = #tpu.dot_dimension_numbers<[1], [0], [0], [1], [0, 0, 1, 1], [], []>} : vector<8x4xf32>, vector<4x192xf32>, vector<8x192xf32> -> vector<8x192xf32>
    %156 = vector.broadcast %3 : vector<1x192xf32> to vector<8x192xf32>
    %157 = arith.addf %155, %156 : vector<8x192xf32>
    %cst_41 = arith.constant dense<0.000000e+00> : vector<8x192xf32>
    %158 = tpu.matmul %153, %2, %cst_41 {dimension_numbers = #tpu.dot_dimension_numbers<[1], [0], [0], [1], [0, 0, 1, 1], [], []>} : vector<8x48xf32>, vector<48x192xf32>, vector<8x192xf32> -> vector<8x192xf32>
    %159 = arith.addf %157, %158 : vector<8x192xf32>
    %160 = vector.extract_strided_slice %159 {offsets = [0, 0], sizes = [8, 144], strides = [1, 1]} : vector<8x192xf32> to vector<8x144xf32>
    %161 = arith.negf %160 : vector<8x144xf32>
    %162 = math.exp %161 : vector<8x144xf32>
    %cst_42 = arith.constant 1.000000e+00 : f32
    %163 = vector.broadcast %cst_42 : f32 to vector<8x144xf32>
    %164 = arith.addf %163, %162 : vector<8x144xf32>
    %165 = arith.divf %163, %164 : vector<8x144xf32>
    %166 = vector.extract_strided_slice %159 {offsets = [0, 144], sizes = [8, 48], strides = [1, 1]} : vector<8x192xf32> to vector<8x48xf32>
    %167 = math.tanh %166 : vector<8x48xf32>
    %168 = vector.extract_strided_slice %165 {offsets = [0, 48], sizes = [8, 48], strides = [1, 1]} : vector<8x144xf32> to vector<8x48xf32>
    %169 = arith.mulf %168, %150 : vector<8x48xf32>
    %170 = vector.extract_strided_slice %165 {offsets = [0, 0], sizes = [8, 48], strides = [1, 1]} : vector<8x144xf32> to vector<8x48xf32>
    %171 = arith.mulf %170, %167 : vector<8x48xf32>
    %172 = arith.addf %169, %171 : vector<8x48xf32>
    %173 = vector.extract_strided_slice %165 {offsets = [0, 96], sizes = [8, 48], strides = [1, 1]} : vector<8x144xf32> to vector<8x48xf32>
    %174 = math.tanh %172 : vector<8x48xf32>
    %175 = arith.mulf %173, %174 : vector<8x48xf32>
    %176 = vector.extract_strided_slice %0 {offsets = [0, 28], sizes = [8, 4], strides = [1, 1]} : vector<8x64xf32> to vector<8x4xf32>
    %cst_43 = arith.constant dense<0.000000e+00> : vector<8x192xf32>
    %177 = tpu.matmul %176, %1, %cst_43 {dimension_numbers = #tpu.dot_dimension_numbers<[1], [0], [0], [1], [0, 0, 1, 1], [], []>} : vector<8x4xf32>, vector<4x192xf32>, vector<8x192xf32> -> vector<8x192xf32>
    %178 = vector.broadcast %3 : vector<1x192xf32> to vector<8x192xf32>
    %179 = arith.addf %177, %178 : vector<8x192xf32>
    %cst_44 = arith.constant dense<0.000000e+00> : vector<8x192xf32>
    %180 = tpu.matmul %175, %2, %cst_44 {dimension_numbers = #tpu.dot_dimension_numbers<[1], [0], [0], [1], [0, 0, 1, 1], [], []>} : vector<8x48xf32>, vector<48x192xf32>, vector<8x192xf32> -> vector<8x192xf32>
    %181 = arith.addf %179, %180 : vector<8x192xf32>
    %182 = vector.extract_strided_slice %181 {offsets = [0, 0], sizes = [8, 144], strides = [1, 1]} : vector<8x192xf32> to vector<8x144xf32>
    %183 = arith.negf %182 : vector<8x144xf32>
    %184 = math.exp %183 : vector<8x144xf32>
    %cst_45 = arith.constant 1.000000e+00 : f32
    %185 = vector.broadcast %cst_45 : f32 to vector<8x144xf32>
    %186 = arith.addf %185, %184 : vector<8x144xf32>
    %187 = arith.divf %185, %186 : vector<8x144xf32>
    %188 = vector.extract_strided_slice %181 {offsets = [0, 144], sizes = [8, 48], strides = [1, 1]} : vector<8x192xf32> to vector<8x48xf32>
    %189 = math.tanh %188 : vector<8x48xf32>
    %190 = vector.extract_strided_slice %187 {offsets = [0, 48], sizes = [8, 48], strides = [1, 1]} : vector<8x144xf32> to vector<8x48xf32>
    %191 = arith.mulf %190, %172 : vector<8x48xf32>
    %192 = vector.extract_strided_slice %187 {offsets = [0, 0], sizes = [8, 48], strides = [1, 1]} : vector<8x144xf32> to vector<8x48xf32>
    %193 = arith.mulf %192, %189 : vector<8x48xf32>
    %194 = arith.addf %191, %193 : vector<8x48xf32>
    %195 = vector.extract_strided_slice %187 {offsets = [0, 96], sizes = [8, 48], strides = [1, 1]} : vector<8x144xf32> to vector<8x48xf32>
    %196 = math.tanh %194 : vector<8x48xf32>
    %197 = arith.mulf %195, %196 : vector<8x48xf32>
    %198 = vector.extract_strided_slice %0 {offsets = [0, 32], sizes = [8, 4], strides = [1, 1]} : vector<8x64xf32> to vector<8x4xf32>
    %cst_46 = arith.constant dense<0.000000e+00> : vector<8x192xf32>
    %199 = tpu.matmul %198, %1, %cst_46 {dimension_numbers = #tpu.dot_dimension_numbers<[1], [0], [0], [1], [0, 0, 1, 1], [], []>} : vector<8x4xf32>, vector<4x192xf32>, vector<8x192xf32> -> vector<8x192xf32>
    %200 = vector.broadcast %3 : vector<1x192xf32> to vector<8x192xf32>
    %201 = arith.addf %199, %200 : vector<8x192xf32>
    %cst_47 = arith.constant dense<0.000000e+00> : vector<8x192xf32>
    %202 = tpu.matmul %197, %2, %cst_47 {dimension_numbers = #tpu.dot_dimension_numbers<[1], [0], [0], [1], [0, 0, 1, 1], [], []>} : vector<8x48xf32>, vector<48x192xf32>, vector<8x192xf32> -> vector<8x192xf32>
    %203 = arith.addf %201, %202 : vector<8x192xf32>
    %204 = vector.extract_strided_slice %203 {offsets = [0, 0], sizes = [8, 144], strides = [1, 1]} : vector<8x192xf32> to vector<8x144xf32>
    %205 = arith.negf %204 : vector<8x144xf32>
    %206 = math.exp %205 : vector<8x144xf32>
    %cst_48 = arith.constant 1.000000e+00 : f32
    %207 = vector.broadcast %cst_48 : f32 to vector<8x144xf32>
    %208 = arith.addf %207, %206 : vector<8x144xf32>
    %209 = arith.divf %207, %208 : vector<8x144xf32>
    %210 = vector.extract_strided_slice %203 {offsets = [0, 144], sizes = [8, 48], strides = [1, 1]} : vector<8x192xf32> to vector<8x48xf32>
    %211 = math.tanh %210 : vector<8x48xf32>
    %212 = vector.extract_strided_slice %209 {offsets = [0, 48], sizes = [8, 48], strides = [1, 1]} : vector<8x144xf32> to vector<8x48xf32>
    %213 = arith.mulf %212, %194 : vector<8x48xf32>
    %214 = vector.extract_strided_slice %209 {offsets = [0, 0], sizes = [8, 48], strides = [1, 1]} : vector<8x144xf32> to vector<8x48xf32>
    %215 = arith.mulf %214, %211 : vector<8x48xf32>
    %216 = arith.addf %213, %215 : vector<8x48xf32>
    %217 = vector.extract_strided_slice %209 {offsets = [0, 96], sizes = [8, 48], strides = [1, 1]} : vector<8x144xf32> to vector<8x48xf32>
    %218 = math.tanh %216 : vector<8x48xf32>
    %219 = arith.mulf %217, %218 : vector<8x48xf32>
    %220 = vector.extract_strided_slice %0 {offsets = [0, 36], sizes = [8, 4], strides = [1, 1]} : vector<8x64xf32> to vector<8x4xf32>
    %cst_49 = arith.constant dense<0.000000e+00> : vector<8x192xf32>
    %221 = tpu.matmul %220, %1, %cst_49 {dimension_numbers = #tpu.dot_dimension_numbers<[1], [0], [0], [1], [0, 0, 1, 1], [], []>} : vector<8x4xf32>, vector<4x192xf32>, vector<8x192xf32> -> vector<8x192xf32>
    %222 = vector.broadcast %3 : vector<1x192xf32> to vector<8x192xf32>
    %223 = arith.addf %221, %222 : vector<8x192xf32>
    %cst_50 = arith.constant dense<0.000000e+00> : vector<8x192xf32>
    %224 = tpu.matmul %219, %2, %cst_50 {dimension_numbers = #tpu.dot_dimension_numbers<[1], [0], [0], [1], [0, 0, 1, 1], [], []>} : vector<8x48xf32>, vector<48x192xf32>, vector<8x192xf32> -> vector<8x192xf32>
    %225 = arith.addf %223, %224 : vector<8x192xf32>
    %226 = vector.extract_strided_slice %225 {offsets = [0, 0], sizes = [8, 144], strides = [1, 1]} : vector<8x192xf32> to vector<8x144xf32>
    %227 = arith.negf %226 : vector<8x144xf32>
    %228 = math.exp %227 : vector<8x144xf32>
    %cst_51 = arith.constant 1.000000e+00 : f32
    %229 = vector.broadcast %cst_51 : f32 to vector<8x144xf32>
    %230 = arith.addf %229, %228 : vector<8x144xf32>
    %231 = arith.divf %229, %230 : vector<8x144xf32>
    %232 = vector.extract_strided_slice %225 {offsets = [0, 144], sizes = [8, 48], strides = [1, 1]} : vector<8x192xf32> to vector<8x48xf32>
    %233 = math.tanh %232 : vector<8x48xf32>
    %234 = vector.extract_strided_slice %231 {offsets = [0, 48], sizes = [8, 48], strides = [1, 1]} : vector<8x144xf32> to vector<8x48xf32>
    %235 = arith.mulf %234, %216 : vector<8x48xf32>
    %236 = vector.extract_strided_slice %231 {offsets = [0, 0], sizes = [8, 48], strides = [1, 1]} : vector<8x144xf32> to vector<8x48xf32>
    %237 = arith.mulf %236, %233 : vector<8x48xf32>
    %238 = arith.addf %235, %237 : vector<8x48xf32>
    %239 = vector.extract_strided_slice %231 {offsets = [0, 96], sizes = [8, 48], strides = [1, 1]} : vector<8x144xf32> to vector<8x48xf32>
    %240 = math.tanh %238 : vector<8x48xf32>
    %241 = arith.mulf %239, %240 : vector<8x48xf32>
    %242 = vector.extract_strided_slice %0 {offsets = [0, 40], sizes = [8, 4], strides = [1, 1]} : vector<8x64xf32> to vector<8x4xf32>
    %cst_52 = arith.constant dense<0.000000e+00> : vector<8x192xf32>
    %243 = tpu.matmul %242, %1, %cst_52 {dimension_numbers = #tpu.dot_dimension_numbers<[1], [0], [0], [1], [0, 0, 1, 1], [], []>} : vector<8x4xf32>, vector<4x192xf32>, vector<8x192xf32> -> vector<8x192xf32>
    %244 = vector.broadcast %3 : vector<1x192xf32> to vector<8x192xf32>
    %245 = arith.addf %243, %244 : vector<8x192xf32>
    %cst_53 = arith.constant dense<0.000000e+00> : vector<8x192xf32>
    %246 = tpu.matmul %241, %2, %cst_53 {dimension_numbers = #tpu.dot_dimension_numbers<[1], [0], [0], [1], [0, 0, 1, 1], [], []>} : vector<8x48xf32>, vector<48x192xf32>, vector<8x192xf32> -> vector<8x192xf32>
    %247 = arith.addf %245, %246 : vector<8x192xf32>
    %248 = vector.extract_strided_slice %247 {offsets = [0, 0], sizes = [8, 144], strides = [1, 1]} : vector<8x192xf32> to vector<8x144xf32>
    %249 = arith.negf %248 : vector<8x144xf32>
    %250 = math.exp %249 : vector<8x144xf32>
    %cst_54 = arith.constant 1.000000e+00 : f32
    %251 = vector.broadcast %cst_54 : f32 to vector<8x144xf32>
    %252 = arith.addf %251, %250 : vector<8x144xf32>
    %253 = arith.divf %251, %252 : vector<8x144xf32>
    %254 = vector.extract_strided_slice %247 {offsets = [0, 144], sizes = [8, 48], strides = [1, 1]} : vector<8x192xf32> to vector<8x48xf32>
    %255 = math.tanh %254 : vector<8x48xf32>
    %256 = vector.extract_strided_slice %253 {offsets = [0, 48], sizes = [8, 48], strides = [1, 1]} : vector<8x144xf32> to vector<8x48xf32>
    %257 = arith.mulf %256, %238 : vector<8x48xf32>
    %258 = vector.extract_strided_slice %253 {offsets = [0, 0], sizes = [8, 48], strides = [1, 1]} : vector<8x144xf32> to vector<8x48xf32>
    %259 = arith.mulf %258, %255 : vector<8x48xf32>
    %260 = arith.addf %257, %259 : vector<8x48xf32>
    %261 = vector.extract_strided_slice %253 {offsets = [0, 96], sizes = [8, 48], strides = [1, 1]} : vector<8x144xf32> to vector<8x48xf32>
    %262 = math.tanh %260 : vector<8x48xf32>
    %263 = arith.mulf %261, %262 : vector<8x48xf32>
    %264 = vector.extract_strided_slice %0 {offsets = [0, 44], sizes = [8, 4], strides = [1, 1]} : vector<8x64xf32> to vector<8x4xf32>
    %cst_55 = arith.constant dense<0.000000e+00> : vector<8x192xf32>
    %265 = tpu.matmul %264, %1, %cst_55 {dimension_numbers = #tpu.dot_dimension_numbers<[1], [0], [0], [1], [0, 0, 1, 1], [], []>} : vector<8x4xf32>, vector<4x192xf32>, vector<8x192xf32> -> vector<8x192xf32>
    %266 = vector.broadcast %3 : vector<1x192xf32> to vector<8x192xf32>
    %267 = arith.addf %265, %266 : vector<8x192xf32>
    %cst_56 = arith.constant dense<0.000000e+00> : vector<8x192xf32>
    %268 = tpu.matmul %263, %2, %cst_56 {dimension_numbers = #tpu.dot_dimension_numbers<[1], [0], [0], [1], [0, 0, 1, 1], [], []>} : vector<8x48xf32>, vector<48x192xf32>, vector<8x192xf32> -> vector<8x192xf32>
    %269 = arith.addf %267, %268 : vector<8x192xf32>
    %270 = vector.extract_strided_slice %269 {offsets = [0, 0], sizes = [8, 144], strides = [1, 1]} : vector<8x192xf32> to vector<8x144xf32>
    %271 = arith.negf %270 : vector<8x144xf32>
    %272 = math.exp %271 : vector<8x144xf32>
    %cst_57 = arith.constant 1.000000e+00 : f32
    %273 = vector.broadcast %cst_57 : f32 to vector<8x144xf32>
    %274 = arith.addf %273, %272 : vector<8x144xf32>
    %275 = arith.divf %273, %274 : vector<8x144xf32>
    %276 = vector.extract_strided_slice %269 {offsets = [0, 144], sizes = [8, 48], strides = [1, 1]} : vector<8x192xf32> to vector<8x48xf32>
    %277 = math.tanh %276 : vector<8x48xf32>
    %278 = vector.extract_strided_slice %275 {offsets = [0, 48], sizes = [8, 48], strides = [1, 1]} : vector<8x144xf32> to vector<8x48xf32>
    %279 = arith.mulf %278, %260 : vector<8x48xf32>
    %280 = vector.extract_strided_slice %275 {offsets = [0, 0], sizes = [8, 48], strides = [1, 1]} : vector<8x144xf32> to vector<8x48xf32>
    %281 = arith.mulf %280, %277 : vector<8x48xf32>
    %282 = arith.addf %279, %281 : vector<8x48xf32>
    %283 = vector.extract_strided_slice %275 {offsets = [0, 96], sizes = [8, 48], strides = [1, 1]} : vector<8x144xf32> to vector<8x48xf32>
    %284 = math.tanh %282 : vector<8x48xf32>
    %285 = arith.mulf %283, %284 : vector<8x48xf32>
    %286 = vector.extract_strided_slice %0 {offsets = [0, 48], sizes = [8, 4], strides = [1, 1]} : vector<8x64xf32> to vector<8x4xf32>
    %cst_58 = arith.constant dense<0.000000e+00> : vector<8x192xf32>
    %287 = tpu.matmul %286, %1, %cst_58 {dimension_numbers = #tpu.dot_dimension_numbers<[1], [0], [0], [1], [0, 0, 1, 1], [], []>} : vector<8x4xf32>, vector<4x192xf32>, vector<8x192xf32> -> vector<8x192xf32>
    %288 = vector.broadcast %3 : vector<1x192xf32> to vector<8x192xf32>
    %289 = arith.addf %287, %288 : vector<8x192xf32>
    %cst_59 = arith.constant dense<0.000000e+00> : vector<8x192xf32>
    %290 = tpu.matmul %285, %2, %cst_59 {dimension_numbers = #tpu.dot_dimension_numbers<[1], [0], [0], [1], [0, 0, 1, 1], [], []>} : vector<8x48xf32>, vector<48x192xf32>, vector<8x192xf32> -> vector<8x192xf32>
    %291 = arith.addf %289, %290 : vector<8x192xf32>
    %292 = vector.extract_strided_slice %291 {offsets = [0, 0], sizes = [8, 144], strides = [1, 1]} : vector<8x192xf32> to vector<8x144xf32>
    %293 = arith.negf %292 : vector<8x144xf32>
    %294 = math.exp %293 : vector<8x144xf32>
    %cst_60 = arith.constant 1.000000e+00 : f32
    %295 = vector.broadcast %cst_60 : f32 to vector<8x144xf32>
    %296 = arith.addf %295, %294 : vector<8x144xf32>
    %297 = arith.divf %295, %296 : vector<8x144xf32>
    %298 = vector.extract_strided_slice %291 {offsets = [0, 144], sizes = [8, 48], strides = [1, 1]} : vector<8x192xf32> to vector<8x48xf32>
    %299 = math.tanh %298 : vector<8x48xf32>
    %300 = vector.extract_strided_slice %297 {offsets = [0, 48], sizes = [8, 48], strides = [1, 1]} : vector<8x144xf32> to vector<8x48xf32>
    %301 = arith.mulf %300, %282 : vector<8x48xf32>
    %302 = vector.extract_strided_slice %297 {offsets = [0, 0], sizes = [8, 48], strides = [1, 1]} : vector<8x144xf32> to vector<8x48xf32>
    %303 = arith.mulf %302, %299 : vector<8x48xf32>
    %304 = arith.addf %301, %303 : vector<8x48xf32>
    %305 = vector.extract_strided_slice %297 {offsets = [0, 96], sizes = [8, 48], strides = [1, 1]} : vector<8x144xf32> to vector<8x48xf32>
    %306 = math.tanh %304 : vector<8x48xf32>
    %307 = arith.mulf %305, %306 : vector<8x48xf32>
    %308 = vector.extract_strided_slice %0 {offsets = [0, 52], sizes = [8, 4], strides = [1, 1]} : vector<8x64xf32> to vector<8x4xf32>
    %cst_61 = arith.constant dense<0.000000e+00> : vector<8x192xf32>
    %309 = tpu.matmul %308, %1, %cst_61 {dimension_numbers = #tpu.dot_dimension_numbers<[1], [0], [0], [1], [0, 0, 1, 1], [], []>} : vector<8x4xf32>, vector<4x192xf32>, vector<8x192xf32> -> vector<8x192xf32>
    %310 = vector.broadcast %3 : vector<1x192xf32> to vector<8x192xf32>
    %311 = arith.addf %309, %310 : vector<8x192xf32>
    %cst_62 = arith.constant dense<0.000000e+00> : vector<8x192xf32>
    %312 = tpu.matmul %307, %2, %cst_62 {dimension_numbers = #tpu.dot_dimension_numbers<[1], [0], [0], [1], [0, 0, 1, 1], [], []>} : vector<8x48xf32>, vector<48x192xf32>, vector<8x192xf32> -> vector<8x192xf32>
    %313 = arith.addf %311, %312 : vector<8x192xf32>
    %314 = vector.extract_strided_slice %313 {offsets = [0, 0], sizes = [8, 144], strides = [1, 1]} : vector<8x192xf32> to vector<8x144xf32>
    %315 = arith.negf %314 : vector<8x144xf32>
    %316 = math.exp %315 : vector<8x144xf32>
    %cst_63 = arith.constant 1.000000e+00 : f32
    %317 = vector.broadcast %cst_63 : f32 to vector<8x144xf32>
    %318 = arith.addf %317, %316 : vector<8x144xf32>
    %319 = arith.divf %317, %318 : vector<8x144xf32>
    %320 = vector.extract_strided_slice %313 {offsets = [0, 144], sizes = [8, 48], strides = [1, 1]} : vector<8x192xf32> to vector<8x48xf32>
    %321 = math.tanh %320 : vector<8x48xf32>
    %322 = vector.extract_strided_slice %319 {offsets = [0, 48], sizes = [8, 48], strides = [1, 1]} : vector<8x144xf32> to vector<8x48xf32>
    %323 = arith.mulf %322, %304 : vector<8x48xf32>
    %324 = vector.extract_strided_slice %319 {offsets = [0, 0], sizes = [8, 48], strides = [1, 1]} : vector<8x144xf32> to vector<8x48xf32>
    %325 = arith.mulf %324, %321 : vector<8x48xf32>
    %326 = arith.addf %323, %325 : vector<8x48xf32>
    %327 = vector.extract_strided_slice %319 {offsets = [0, 96], sizes = [8, 48], strides = [1, 1]} : vector<8x144xf32> to vector<8x48xf32>
    %328 = math.tanh %326 : vector<8x48xf32>
    %329 = arith.mulf %327, %328 : vector<8x48xf32>
    %330 = vector.extract_strided_slice %0 {offsets = [0, 56], sizes = [8, 4], strides = [1, 1]} : vector<8x64xf32> to vector<8x4xf32>
    %cst_64 = arith.constant dense<0.000000e+00> : vector<8x192xf32>
    %331 = tpu.matmul %330, %1, %cst_64 {dimension_numbers = #tpu.dot_dimension_numbers<[1], [0], [0], [1], [0, 0, 1, 1], [], []>} : vector<8x4xf32>, vector<4x192xf32>, vector<8x192xf32> -> vector<8x192xf32>
    %332 = vector.broadcast %3 : vector<1x192xf32> to vector<8x192xf32>
    %333 = arith.addf %331, %332 : vector<8x192xf32>
    %cst_65 = arith.constant dense<0.000000e+00> : vector<8x192xf32>
    %334 = tpu.matmul %329, %2, %cst_65 {dimension_numbers = #tpu.dot_dimension_numbers<[1], [0], [0], [1], [0, 0, 1, 1], [], []>} : vector<8x48xf32>, vector<48x192xf32>, vector<8x192xf32> -> vector<8x192xf32>
    %335 = arith.addf %333, %334 : vector<8x192xf32>
    %336 = vector.extract_strided_slice %335 {offsets = [0, 0], sizes = [8, 144], strides = [1, 1]} : vector<8x192xf32> to vector<8x144xf32>
    %337 = arith.negf %336 : vector<8x144xf32>
    %338 = math.exp %337 : vector<8x144xf32>
    %cst_66 = arith.constant 1.000000e+00 : f32
    %339 = vector.broadcast %cst_66 : f32 to vector<8x144xf32>
    %340 = arith.addf %339, %338 : vector<8x144xf32>
    %341 = arith.divf %339, %340 : vector<8x144xf32>
    %342 = vector.extract_strided_slice %335 {offsets = [0, 144], sizes = [8, 48], strides = [1, 1]} : vector<8x192xf32> to vector<8x48xf32>
    %343 = math.tanh %342 : vector<8x48xf32>
    %344 = vector.extract_strided_slice %341 {offsets = [0, 48], sizes = [8, 48], strides = [1, 1]} : vector<8x144xf32> to vector<8x48xf32>
    %345 = arith.mulf %344, %326 : vector<8x48xf32>
    %346 = vector.extract_strided_slice %341 {offsets = [0, 0], sizes = [8, 48], strides = [1, 1]} : vector<8x144xf32> to vector<8x48xf32>
    %347 = arith.mulf %346, %343 : vector<8x48xf32>
    %348 = arith.addf %345, %347 : vector<8x48xf32>
    %349 = vector.extract_strided_slice %341 {offsets = [0, 96], sizes = [8, 48], strides = [1, 1]} : vector<8x144xf32> to vector<8x48xf32>
    %350 = math.tanh %348 : vector<8x48xf32>
    %351 = arith.mulf %349, %350 : vector<8x48xf32>
    %352 = vector.extract_strided_slice %0 {offsets = [0, 60], sizes = [8, 4], strides = [1, 1]} : vector<8x64xf32> to vector<8x4xf32>
    %cst_67 = arith.constant dense<0.000000e+00> : vector<8x192xf32>
    %353 = tpu.matmul %352, %1, %cst_67 {dimension_numbers = #tpu.dot_dimension_numbers<[1], [0], [0], [1], [0, 0, 1, 1], [], []>} : vector<8x4xf32>, vector<4x192xf32>, vector<8x192xf32> -> vector<8x192xf32>
    %354 = vector.broadcast %3 : vector<1x192xf32> to vector<8x192xf32>
    %355 = arith.addf %353, %354 : vector<8x192xf32>
    %cst_68 = arith.constant dense<0.000000e+00> : vector<8x192xf32>
    %356 = tpu.matmul %351, %2, %cst_68 {dimension_numbers = #tpu.dot_dimension_numbers<[1], [0], [0], [1], [0, 0, 1, 1], [], []>} : vector<8x48xf32>, vector<48x192xf32>, vector<8x192xf32> -> vector<8x192xf32>
    %357 = arith.addf %355, %356 : vector<8x192xf32>
    %358 = vector.extract_strided_slice %357 {offsets = [0, 0], sizes = [8, 144], strides = [1, 1]} : vector<8x192xf32> to vector<8x144xf32>
    %359 = arith.negf %358 : vector<8x144xf32>
    %360 = math.exp %359 : vector<8x144xf32>
    %cst_69 = arith.constant 1.000000e+00 : f32
    %361 = vector.broadcast %cst_69 : f32 to vector<8x144xf32>
    %362 = arith.addf %361, %360 : vector<8x144xf32>
    %363 = arith.divf %361, %362 : vector<8x144xf32>
    %364 = vector.extract_strided_slice %357 {offsets = [0, 144], sizes = [8, 48], strides = [1, 1]} : vector<8x192xf32> to vector<8x48xf32>
    %365 = math.tanh %364 : vector<8x48xf32>
    %366 = vector.extract_strided_slice %363 {offsets = [0, 48], sizes = [8, 48], strides = [1, 1]} : vector<8x144xf32> to vector<8x48xf32>
    %367 = arith.mulf %366, %348 : vector<8x48xf32>
    %368 = vector.extract_strided_slice %363 {offsets = [0, 0], sizes = [8, 48], strides = [1, 1]} : vector<8x144xf32> to vector<8x48xf32>
    %369 = arith.mulf %368, %365 : vector<8x48xf32>
    %370 = arith.addf %367, %369 : vector<8x48xf32>
    %371 = vector.extract_strided_slice %363 {offsets = [0, 96], sizes = [8, 48], strides = [1, 1]} : vector<8x144xf32> to vector<8x48xf32>
    %372 = math.tanh %370 : vector<8x48xf32>
    %373 = arith.mulf %371, %372 : vector<8x48xf32>
    %cst_70 = arith.constant dense<0.000000e+00> : vector<8x192xf32>
    %374 = tpu.matmul %373, %2, %cst_70 {dimension_numbers = #tpu.dot_dimension_numbers<[1], [0], [0], [1], [0, 0, 1, 1], [], []>} : vector<8x48xf32>, vector<48x192xf32>, vector<8x192xf32> -> vector<8x192xf32>
    %375 = vector.broadcast %3 : vector<1x192xf32> to vector<8x192xf32>
    %376 = arith.addf %375, %374 : vector<8x192xf32>
    %377 = vector.extract_strided_slice %376 {offsets = [0, 0], sizes = [8, 144], strides = [1, 1]} : vector<8x192xf32> to vector<8x144xf32>
    %378 = arith.negf %377 : vector<8x144xf32>
    %379 = math.exp %378 : vector<8x144xf32>
    %cst_71 = arith.constant 1.000000e+00 : f32
    %380 = vector.broadcast %cst_71 : f32 to vector<8x144xf32>
    %381 = arith.addf %380, %379 : vector<8x144xf32>
    %382 = arith.divf %380, %381 : vector<8x144xf32>
    %383 = vector.extract_strided_slice %376 {offsets = [0, 144], sizes = [8, 48], strides = [1, 1]} : vector<8x192xf32> to vector<8x48xf32>
    %384 = math.tanh %383 : vector<8x48xf32>
    %385 = vector.extract_strided_slice %382 {offsets = [0, 48], sizes = [8, 48], strides = [1, 1]} : vector<8x144xf32> to vector<8x48xf32>
    %386 = arith.mulf %385, %370 : vector<8x48xf32>
    %387 = vector.extract_strided_slice %382 {offsets = [0, 0], sizes = [8, 48], strides = [1, 1]} : vector<8x144xf32> to vector<8x48xf32>
    %388 = arith.mulf %387, %384 : vector<8x48xf32>
    %389 = arith.addf %386, %388 : vector<8x48xf32>
    %390 = vector.extract_strided_slice %382 {offsets = [0, 96], sizes = [8, 48], strides = [1, 1]} : vector<8x144xf32> to vector<8x48xf32>
    %391 = math.tanh %389 : vector<8x48xf32>
    %392 = arith.mulf %390, %391 : vector<8x48xf32>
    %393 = vector.extract_strided_slice %392 {offsets = [0, 32], sizes = [8, 16], strides = [1, 1]} : vector<8x48xf32> to vector<8x16xf32>
    %cst_72 = arith.constant dense<0.000000e+00> : vector<8x32xf32>
    %394 = tpu.matmul %393, %4, %cst_72 {dimension_numbers = #tpu.dot_dimension_numbers<[1], [0], [0], [1], [0, 0, 1, 1], [], []>} : vector<8x16xf32>, vector<16x32xf32>, vector<8x32xf32> -> vector<8x32xf32>
    %395 = vector.broadcast %5 : vector<1x32xf32> to vector<8x32xf32>
    %396 = arith.addf %394, %395 : vector<8x32xf32>
    %cst_73 = arith.constant dense<0.000000e+00> : vector<8x16xf32>
    %397 = tpu.matmul %396, %6, %cst_73 {dimension_numbers = #tpu.dot_dimension_numbers<[1], [0], [0], [1], [0, 0, 1, 1], [], []>} : vector<8x32xf32>, vector<32x16xf32>, vector<8x16xf32> -> vector<8x16xf32>
    %398 = vector.broadcast %7 : vector<1x16xf32> to vector<8x16xf32>
    %399 = arith.addf %397, %398 : vector<8x16xf32>
    %cst_74 = arith.constant dense<0.000000e+00> : vector<8x144xf32>
    %400 = tpu.matmul %399, %8, %cst_74 {dimension_numbers = #tpu.dot_dimension_numbers<[1], [0], [0], [1], [0, 0, 1, 1], [], []>} : vector<8x16xf32>, vector<16x144xf32>, vector<8x144xf32> -> vector<8x144xf32>
    %401 = vector.broadcast %10 : vector<1x144xf32> to vector<8x144xf32>
    %402 = arith.addf %400, %401 : vector<8x144xf32>
    %cst_75 = arith.constant 0.000000e+00 : f32
    %403 = vector.broadcast %cst_75 : f32 to vector<8x36xf32>
    %cst_76 = arith.constant 0.000000e+00 : f32
    %404 = vector.broadcast %cst_76 : f32 to vector<8x36xf32>
    %405 = tpu.iota {dimensions = array<i32: 1>} : vector<1x36xi32>
    %c32_i32_77 = arith.constant 32 : i32
    %406 = vector.broadcast %c32_i32_77 : i32 to vector<1x36xi32>
    %407 = arith.cmpi slt, %405, %406 : vector<1x36xi32>
    %408 = arith.extui %407 : vector<1x36xi1> to vector<1x36xi32>
    %409 = arith.sitofp %408 : vector<1x36xi32> to vector<1x36xf32>
    %cst_78 = arith.constant dense<0.000000e+00> : vector<8x144xf32>
    %410 = tpu.matmul %404, %9, %cst_78 {dimension_numbers = #tpu.dot_dimension_numbers<[1], [0], [0], [1], [0, 0, 1, 1], [], []>} : vector<8x36xf32>, vector<36x144xf32>, vector<8x144xf32> -> vector<8x144xf32>
    %411 = arith.addf %402, %410 : vector<8x144xf32>
    %412 = vector.extract_strided_slice %411 {offsets = [0, 0], sizes = [8, 108], strides = [1, 1]} : vector<8x144xf32> to vector<8x108xf32>
    %413 = arith.negf %412 : vector<8x108xf32>
    %414 = math.exp %413 : vector<8x108xf32>
    %cst_79 = arith.constant 1.000000e+00 : f32
    %415 = vector.broadcast %cst_79 : f32 to vector<8x108xf32>
    %416 = arith.addf %415, %414 : vector<8x108xf32>
    %417 = arith.divf %415, %416 : vector<8x108xf32>
    %418 = vector.extract_strided_slice %411 {offsets = [0, 108], sizes = [8, 36], strides = [1, 1]} : vector<8x144xf32> to vector<8x36xf32>
    %419 = math.tanh %418 : vector<8x36xf32>
    %420 = vector.extract_strided_slice %417 {offsets = [0, 36], sizes = [8, 36], strides = [1, 1]} : vector<8x108xf32> to vector<8x36xf32>
    %421 = arith.mulf %420, %403 : vector<8x36xf32>
    %422 = vector.extract_strided_slice %417 {offsets = [0, 0], sizes = [8, 36], strides = [1, 1]} : vector<8x108xf32> to vector<8x36xf32>
    %423 = arith.mulf %422, %419 : vector<8x36xf32>
    %424 = arith.addf %421, %423 : vector<8x36xf32>
    %425 = vector.extract_strided_slice %417 {offsets = [0, 72], sizes = [8, 36], strides = [1, 1]} : vector<8x108xf32> to vector<8x36xf32>
    %426 = math.tanh %424 : vector<8x36xf32>
    %427 = arith.mulf %425, %426 : vector<8x36xf32>
    %428 = vector.broadcast %409 : vector<1x36xf32> to vector<8x36xf32>
    %429 = arith.mulf %424, %428 : vector<8x36xf32>
    %430 = vector.broadcast %409 : vector<1x36xf32> to vector<8x36xf32>
    %431 = arith.mulf %427, %430 : vector<8x36xf32>
    %cst_80 = arith.constant dense<0.000000e+00> : vector<8x144xf32>
    %432 = tpu.matmul %431, %9, %cst_80 {dimension_numbers = #tpu.dot_dimension_numbers<[1], [0], [0], [1], [0, 0, 1, 1], [], []>} : vector<8x36xf32>, vector<36x144xf32>, vector<8x144xf32> -> vector<8x144xf32>
    %433 = arith.addf %402, %432 : vector<8x144xf32>
    %434 = vector.extract_strided_slice %433 {offsets = [0, 0], sizes = [8, 108], strides = [1, 1]} : vector<8x144xf32> to vector<8x108xf32>
    %435 = arith.negf %434 : vector<8x108xf32>
    %436 = math.exp %435 : vector<8x108xf32>
    %cst_81 = arith.constant 1.000000e+00 : f32
    %437 = vector.broadcast %cst_81 : f32 to vector<8x108xf32>
    %438 = arith.addf %437, %436 : vector<8x108xf32>
    %439 = arith.divf %437, %438 : vector<8x108xf32>
    %440 = vector.extract_strided_slice %433 {offsets = [0, 108], sizes = [8, 36], strides = [1, 1]} : vector<8x144xf32> to vector<8x36xf32>
    %441 = math.tanh %440 : vector<8x36xf32>
    %442 = vector.extract_strided_slice %439 {offsets = [0, 36], sizes = [8, 36], strides = [1, 1]} : vector<8x108xf32> to vector<8x36xf32>
    %443 = arith.mulf %442, %429 : vector<8x36xf32>
    %444 = vector.extract_strided_slice %439 {offsets = [0, 0], sizes = [8, 36], strides = [1, 1]} : vector<8x108xf32> to vector<8x36xf32>
    %445 = arith.mulf %444, %441 : vector<8x36xf32>
    %446 = arith.addf %443, %445 : vector<8x36xf32>
    %447 = vector.extract_strided_slice %439 {offsets = [0, 72], sizes = [8, 36], strides = [1, 1]} : vector<8x108xf32> to vector<8x36xf32>
    %448 = math.tanh %446 : vector<8x36xf32>
    %449 = arith.mulf %447, %448 : vector<8x36xf32>
    %450 = vector.extract_strided_slice %449 {offsets = [0, 32], sizes = [8, 4], strides = [1, 1]} : vector<8x36xf32> to vector<8x4xf32>
    %cst_82 = arith.constant dense<0.000000e+00> : vector<8x144xf32>
    %451 = tpu.matmul %449, %9, %cst_82 {dimension_numbers = #tpu.dot_dimension_numbers<[1], [0], [0], [1], [0, 0, 1, 1], [], []>} : vector<8x36xf32>, vector<36x144xf32>, vector<8x144xf32> -> vector<8x144xf32>
    %452 = arith.addf %402, %451 : vector<8x144xf32>
    %453 = vector.extract_strided_slice %452 {offsets = [0, 0], sizes = [8, 108], strides = [1, 1]} : vector<8x144xf32> to vector<8x108xf32>
    %454 = arith.negf %453 : vector<8x108xf32>
    %455 = math.exp %454 : vector<8x108xf32>
    %cst_83 = arith.constant 1.000000e+00 : f32
    %456 = vector.broadcast %cst_83 : f32 to vector<8x108xf32>
    %457 = arith.addf %456, %455 : vector<8x108xf32>
    %458 = arith.divf %456, %457 : vector<8x108xf32>
    %459 = vector.extract_strided_slice %452 {offsets = [0, 108], sizes = [8, 36], strides = [1, 1]} : vector<8x144xf32> to vector<8x36xf32>
    %460 = math.tanh %459 : vector<8x36xf32>
    %461 = vector.extract_strided_slice %458 {offsets = [0, 36], sizes = [8, 36], strides = [1, 1]} : vector<8x108xf32> to vector<8x36xf32>
    %462 = arith.mulf %461, %446 : vector<8x36xf32>
    %463 = vector.extract_strided_slice %458 {offsets = [0, 0], sizes = [8, 36], strides = [1, 1]} : vector<8x108xf32> to vector<8x36xf32>
    %464 = arith.mulf %463, %460 : vector<8x36xf32>
    %465 = arith.addf %462, %464 : vector<8x36xf32>
    %466 = vector.extract_strided_slice %458 {offsets = [0, 72], sizes = [8, 36], strides = [1, 1]} : vector<8x108xf32> to vector<8x36xf32>
    %467 = math.tanh %465 : vector<8x36xf32>
    %468 = arith.mulf %466, %467 : vector<8x36xf32>
    %469 = vector.extract_strided_slice %468 {offsets = [0, 32], sizes = [8, 4], strides = [1, 1]} : vector<8x36xf32> to vector<8x4xf32>
    %cst_84 = arith.constant dense<0.000000e+00> : vector<8x144xf32>
    %470 = tpu.matmul %468, %9, %cst_84 {dimension_numbers = #tpu.dot_dimension_numbers<[1], [0], [0], [1], [0, 0, 1, 1], [], []>} : vector<8x36xf32>, vector<36x144xf32>, vector<8x144xf32> -> vector<8x144xf32>
    %471 = arith.addf %402, %470 : vector<8x144xf32>
    %472 = vector.extract_strided_slice %471 {offsets = [0, 0], sizes = [8, 108], strides = [1, 1]} : vector<8x144xf32> to vector<8x108xf32>
    %473 = arith.negf %472 : vector<8x108xf32>
    %474 = math.exp %473 : vector<8x108xf32>
    %cst_85 = arith.constant 1.000000e+00 : f32
    %475 = vector.broadcast %cst_85 : f32 to vector<8x108xf32>
    %476 = arith.addf %475, %474 : vector<8x108xf32>
    %477 = arith.divf %475, %476 : vector<8x108xf32>
    %478 = vector.extract_strided_slice %471 {offsets = [0, 108], sizes = [8, 36], strides = [1, 1]} : vector<8x144xf32> to vector<8x36xf32>
    %479 = math.tanh %478 : vector<8x36xf32>
    %480 = vector.extract_strided_slice %477 {offsets = [0, 36], sizes = [8, 36], strides = [1, 1]} : vector<8x108xf32> to vector<8x36xf32>
    %481 = arith.mulf %480, %465 : vector<8x36xf32>
    %482 = vector.extract_strided_slice %477 {offsets = [0, 0], sizes = [8, 36], strides = [1, 1]} : vector<8x108xf32> to vector<8x36xf32>
    %483 = arith.mulf %482, %479 : vector<8x36xf32>
    %484 = arith.addf %481, %483 : vector<8x36xf32>
    %485 = vector.extract_strided_slice %477 {offsets = [0, 72], sizes = [8, 36], strides = [1, 1]} : vector<8x108xf32> to vector<8x36xf32>
    %486 = math.tanh %484 : vector<8x36xf32>
    %487 = arith.mulf %485, %486 : vector<8x36xf32>
    %488 = vector.extract_strided_slice %487 {offsets = [0, 32], sizes = [8, 4], strides = [1, 1]} : vector<8x36xf32> to vector<8x4xf32>
    %cst_86 = arith.constant dense<0.000000e+00> : vector<8x144xf32>
    %489 = tpu.matmul %487, %9, %cst_86 {dimension_numbers = #tpu.dot_dimension_numbers<[1], [0], [0], [1], [0, 0, 1, 1], [], []>} : vector<8x36xf32>, vector<36x144xf32>, vector<8x144xf32> -> vector<8x144xf32>
    %490 = arith.addf %402, %489 : vector<8x144xf32>
    %491 = vector.extract_strided_slice %490 {offsets = [0, 0], sizes = [8, 108], strides = [1, 1]} : vector<8x144xf32> to vector<8x108xf32>
    %492 = arith.negf %491 : vector<8x108xf32>
    %493 = math.exp %492 : vector<8x108xf32>
    %cst_87 = arith.constant 1.000000e+00 : f32
    %494 = vector.broadcast %cst_87 : f32 to vector<8x108xf32>
    %495 = arith.addf %494, %493 : vector<8x108xf32>
    %496 = arith.divf %494, %495 : vector<8x108xf32>
    %497 = vector.extract_strided_slice %490 {offsets = [0, 108], sizes = [8, 36], strides = [1, 1]} : vector<8x144xf32> to vector<8x36xf32>
    %498 = math.tanh %497 : vector<8x36xf32>
    %499 = vector.extract_strided_slice %496 {offsets = [0, 36], sizes = [8, 36], strides = [1, 1]} : vector<8x108xf32> to vector<8x36xf32>
    %500 = arith.mulf %499, %484 : vector<8x36xf32>
    %501 = vector.extract_strided_slice %496 {offsets = [0, 0], sizes = [8, 36], strides = [1, 1]} : vector<8x108xf32> to vector<8x36xf32>
    %502 = arith.mulf %501, %498 : vector<8x36xf32>
    %503 = arith.addf %500, %502 : vector<8x36xf32>
    %504 = vector.extract_strided_slice %496 {offsets = [0, 72], sizes = [8, 36], strides = [1, 1]} : vector<8x108xf32> to vector<8x36xf32>
    %505 = math.tanh %503 : vector<8x36xf32>
    %506 = arith.mulf %504, %505 : vector<8x36xf32>
    %507 = vector.extract_strided_slice %506 {offsets = [0, 32], sizes = [8, 4], strides = [1, 1]} : vector<8x36xf32> to vector<8x4xf32>
    %cst_88 = arith.constant dense<0.000000e+00> : vector<8x144xf32>
    %508 = tpu.matmul %506, %9, %cst_88 {dimension_numbers = #tpu.dot_dimension_numbers<[1], [0], [0], [1], [0, 0, 1, 1], [], []>} : vector<8x36xf32>, vector<36x144xf32>, vector<8x144xf32> -> vector<8x144xf32>
    %509 = arith.addf %402, %508 : vector<8x144xf32>
    %510 = vector.extract_strided_slice %509 {offsets = [0, 0], sizes = [8, 108], strides = [1, 1]} : vector<8x144xf32> to vector<8x108xf32>
    %511 = arith.negf %510 : vector<8x108xf32>
    %512 = math.exp %511 : vector<8x108xf32>
    %cst_89 = arith.constant 1.000000e+00 : f32
    %513 = vector.broadcast %cst_89 : f32 to vector<8x108xf32>
    %514 = arith.addf %513, %512 : vector<8x108xf32>
    %515 = arith.divf %513, %514 : vector<8x108xf32>
    %516 = vector.extract_strided_slice %509 {offsets = [0, 108], sizes = [8, 36], strides = [1, 1]} : vector<8x144xf32> to vector<8x36xf32>
    %517 = math.tanh %516 : vector<8x36xf32>
    %518 = vector.extract_strided_slice %515 {offsets = [0, 36], sizes = [8, 36], strides = [1, 1]} : vector<8x108xf32> to vector<8x36xf32>
    %519 = arith.mulf %518, %503 : vector<8x36xf32>
    %520 = vector.extract_strided_slice %515 {offsets = [0, 0], sizes = [8, 36], strides = [1, 1]} : vector<8x108xf32> to vector<8x36xf32>
    %521 = arith.mulf %520, %517 : vector<8x36xf32>
    %522 = arith.addf %519, %521 : vector<8x36xf32>
    %523 = vector.extract_strided_slice %515 {offsets = [0, 72], sizes = [8, 36], strides = [1, 1]} : vector<8x108xf32> to vector<8x36xf32>
    %524 = math.tanh %522 : vector<8x36xf32>
    %525 = arith.mulf %523, %524 : vector<8x36xf32>
    %526 = vector.extract_strided_slice %525 {offsets = [0, 32], sizes = [8, 4], strides = [1, 1]} : vector<8x36xf32> to vector<8x4xf32>
    %cst_90 = arith.constant dense<0.000000e+00> : vector<8x144xf32>
    %527 = tpu.matmul %525, %9, %cst_90 {dimension_numbers = #tpu.dot_dimension_numbers<[1], [0], [0], [1], [0, 0, 1, 1], [], []>} : vector<8x36xf32>, vector<36x144xf32>, vector<8x144xf32> -> vector<8x144xf32>
    %528 = arith.addf %402, %527 : vector<8x144xf32>
    %529 = vector.extract_strided_slice %528 {offsets = [0, 0], sizes = [8, 108], strides = [1, 1]} : vector<8x144xf32> to vector<8x108xf32>
    %530 = arith.negf %529 : vector<8x108xf32>
    %531 = math.exp %530 : vector<8x108xf32>
    %cst_91 = arith.constant 1.000000e+00 : f32
    %532 = vector.broadcast %cst_91 : f32 to vector<8x108xf32>
    %533 = arith.addf %532, %531 : vector<8x108xf32>
    %534 = arith.divf %532, %533 : vector<8x108xf32>
    %535 = vector.extract_strided_slice %528 {offsets = [0, 108], sizes = [8, 36], strides = [1, 1]} : vector<8x144xf32> to vector<8x36xf32>
    %536 = math.tanh %535 : vector<8x36xf32>
    %537 = vector.extract_strided_slice %534 {offsets = [0, 36], sizes = [8, 36], strides = [1, 1]} : vector<8x108xf32> to vector<8x36xf32>
    %538 = arith.mulf %537, %522 : vector<8x36xf32>
    %539 = vector.extract_strided_slice %534 {offsets = [0, 0], sizes = [8, 36], strides = [1, 1]} : vector<8x108xf32> to vector<8x36xf32>
    %540 = arith.mulf %539, %536 : vector<8x36xf32>
    %541 = arith.addf %538, %540 : vector<8x36xf32>
    %542 = vector.extract_strided_slice %534 {offsets = [0, 72], sizes = [8, 36], strides = [1, 1]} : vector<8x108xf32> to vector<8x36xf32>
    %543 = math.tanh %541 : vector<8x36xf32>
    %544 = arith.mulf %542, %543 : vector<8x36xf32>
    %545 = vector.extract_strided_slice %544 {offsets = [0, 32], sizes = [8, 4], strides = [1, 1]} : vector<8x36xf32> to vector<8x4xf32>
    %cst_92 = arith.constant dense<0.000000e+00> : vector<8x144xf32>
    %546 = tpu.matmul %544, %9, %cst_92 {dimension_numbers = #tpu.dot_dimension_numbers<[1], [0], [0], [1], [0, 0, 1, 1], [], []>} : vector<8x36xf32>, vector<36x144xf32>, vector<8x144xf32> -> vector<8x144xf32>
    %547 = arith.addf %402, %546 : vector<8x144xf32>
    %548 = vector.extract_strided_slice %547 {offsets = [0, 0], sizes = [8, 108], strides = [1, 1]} : vector<8x144xf32> to vector<8x108xf32>
    %549 = arith.negf %548 : vector<8x108xf32>
    %550 = math.exp %549 : vector<8x108xf32>
    %cst_93 = arith.constant 1.000000e+00 : f32
    %551 = vector.broadcast %cst_93 : f32 to vector<8x108xf32>
    %552 = arith.addf %551, %550 : vector<8x108xf32>
    %553 = arith.divf %551, %552 : vector<8x108xf32>
    %554 = vector.extract_strided_slice %547 {offsets = [0, 108], sizes = [8, 36], strides = [1, 1]} : vector<8x144xf32> to vector<8x36xf32>
    %555 = math.tanh %554 : vector<8x36xf32>
    %556 = vector.extract_strided_slice %553 {offsets = [0, 36], sizes = [8, 36], strides = [1, 1]} : vector<8x108xf32> to vector<8x36xf32>
    %557 = arith.mulf %556, %541 : vector<8x36xf32>
    %558 = vector.extract_strided_slice %553 {offsets = [0, 0], sizes = [8, 36], strides = [1, 1]} : vector<8x108xf32> to vector<8x36xf32>
    %559 = arith.mulf %558, %555 : vector<8x36xf32>
    %560 = arith.addf %557, %559 : vector<8x36xf32>
    %561 = vector.extract_strided_slice %553 {offsets = [0, 72], sizes = [8, 36], strides = [1, 1]} : vector<8x108xf32> to vector<8x36xf32>
    %562 = math.tanh %560 : vector<8x36xf32>
    %563 = arith.mulf %561, %562 : vector<8x36xf32>
    %564 = vector.extract_strided_slice %563 {offsets = [0, 32], sizes = [8, 4], strides = [1, 1]} : vector<8x36xf32> to vector<8x4xf32>
    %cst_94 = arith.constant dense<0.000000e+00> : vector<8x144xf32>
    %565 = tpu.matmul %563, %9, %cst_94 {dimension_numbers = #tpu.dot_dimension_numbers<[1], [0], [0], [1], [0, 0, 1, 1], [], []>} : vector<8x36xf32>, vector<36x144xf32>, vector<8x144xf32> -> vector<8x144xf32>
    %566 = arith.addf %402, %565 : vector<8x144xf32>
    %567 = vector.extract_strided_slice %566 {offsets = [0, 0], sizes = [8, 108], strides = [1, 1]} : vector<8x144xf32> to vector<8x108xf32>
    %568 = arith.negf %567 : vector<8x108xf32>
    %569 = math.exp %568 : vector<8x108xf32>
    %cst_95 = arith.constant 1.000000e+00 : f32
    %570 = vector.broadcast %cst_95 : f32 to vector<8x108xf32>
    %571 = arith.addf %570, %569 : vector<8x108xf32>
    %572 = arith.divf %570, %571 : vector<8x108xf32>
    %573 = vector.extract_strided_slice %566 {offsets = [0, 108], sizes = [8, 36], strides = [1, 1]} : vector<8x144xf32> to vector<8x36xf32>
    %574 = math.tanh %573 : vector<8x36xf32>
    %575 = vector.extract_strided_slice %572 {offsets = [0, 36], sizes = [8, 36], strides = [1, 1]} : vector<8x108xf32> to vector<8x36xf32>
    %576 = arith.mulf %575, %560 : vector<8x36xf32>
    %577 = vector.extract_strided_slice %572 {offsets = [0, 0], sizes = [8, 36], strides = [1, 1]} : vector<8x108xf32> to vector<8x36xf32>
    %578 = arith.mulf %577, %574 : vector<8x36xf32>
    %579 = arith.addf %576, %578 : vector<8x36xf32>
    %580 = vector.extract_strided_slice %572 {offsets = [0, 72], sizes = [8, 36], strides = [1, 1]} : vector<8x108xf32> to vector<8x36xf32>
    %581 = math.tanh %579 : vector<8x36xf32>
    %582 = arith.mulf %580, %581 : vector<8x36xf32>
    %583 = vector.extract_strided_slice %582 {offsets = [0, 32], sizes = [8, 4], strides = [1, 1]} : vector<8x36xf32> to vector<8x4xf32>
    %cst_96 = arith.constant dense<0.000000e+00> : vector<8x144xf32>
    %584 = tpu.matmul %582, %9, %cst_96 {dimension_numbers = #tpu.dot_dimension_numbers<[1], [0], [0], [1], [0, 0, 1, 1], [], []>} : vector<8x36xf32>, vector<36x144xf32>, vector<8x144xf32> -> vector<8x144xf32>
    %585 = arith.addf %402, %584 : vector<8x144xf32>
    %586 = vector.extract_strided_slice %585 {offsets = [0, 0], sizes = [8, 108], strides = [1, 1]} : vector<8x144xf32> to vector<8x108xf32>
    %587 = arith.negf %586 : vector<8x108xf32>
    %588 = math.exp %587 : vector<8x108xf32>
    %cst_97 = arith.constant 1.000000e+00 : f32
    %589 = vector.broadcast %cst_97 : f32 to vector<8x108xf32>
    %590 = arith.addf %589, %588 : vector<8x108xf32>
    %591 = arith.divf %589, %590 : vector<8x108xf32>
    %592 = vector.extract_strided_slice %585 {offsets = [0, 108], sizes = [8, 36], strides = [1, 1]} : vector<8x144xf32> to vector<8x36xf32>
    %593 = math.tanh %592 : vector<8x36xf32>
    %594 = vector.extract_strided_slice %591 {offsets = [0, 36], sizes = [8, 36], strides = [1, 1]} : vector<8x108xf32> to vector<8x36xf32>
    %595 = arith.mulf %594, %579 : vector<8x36xf32>
    %596 = vector.extract_strided_slice %591 {offsets = [0, 0], sizes = [8, 36], strides = [1, 1]} : vector<8x108xf32> to vector<8x36xf32>
    %597 = arith.mulf %596, %593 : vector<8x36xf32>
    %598 = arith.addf %595, %597 : vector<8x36xf32>
    %599 = vector.extract_strided_slice %591 {offsets = [0, 72], sizes = [8, 36], strides = [1, 1]} : vector<8x108xf32> to vector<8x36xf32>
    %600 = math.tanh %598 : vector<8x36xf32>
    %601 = arith.mulf %599, %600 : vector<8x36xf32>
    %602 = vector.extract_strided_slice %601 {offsets = [0, 32], sizes = [8, 4], strides = [1, 1]} : vector<8x36xf32> to vector<8x4xf32>
    %cst_98 = arith.constant dense<0.000000e+00> : vector<8x144xf32>
    %603 = tpu.matmul %601, %9, %cst_98 {dimension_numbers = #tpu.dot_dimension_numbers<[1], [0], [0], [1], [0, 0, 1, 1], [], []>} : vector<8x36xf32>, vector<36x144xf32>, vector<8x144xf32> -> vector<8x144xf32>
    %604 = arith.addf %402, %603 : vector<8x144xf32>
    %605 = vector.extract_strided_slice %604 {offsets = [0, 0], sizes = [8, 108], strides = [1, 1]} : vector<8x144xf32> to vector<8x108xf32>
    %606 = arith.negf %605 : vector<8x108xf32>
    %607 = math.exp %606 : vector<8x108xf32>
    %cst_99 = arith.constant 1.000000e+00 : f32
    %608 = vector.broadcast %cst_99 : f32 to vector<8x108xf32>
    %609 = arith.addf %608, %607 : vector<8x108xf32>
    %610 = arith.divf %608, %609 : vector<8x108xf32>
    %611 = vector.extract_strided_slice %604 {offsets = [0, 108], sizes = [8, 36], strides = [1, 1]} : vector<8x144xf32> to vector<8x36xf32>
    %612 = math.tanh %611 : vector<8x36xf32>
    %613 = vector.extract_strided_slice %610 {offsets = [0, 36], sizes = [8, 36], strides = [1, 1]} : vector<8x108xf32> to vector<8x36xf32>
    %614 = arith.mulf %613, %598 : vector<8x36xf32>
    %615 = vector.extract_strided_slice %610 {offsets = [0, 0], sizes = [8, 36], strides = [1, 1]} : vector<8x108xf32> to vector<8x36xf32>
    %616 = arith.mulf %615, %612 : vector<8x36xf32>
    %617 = arith.addf %614, %616 : vector<8x36xf32>
    %618 = vector.extract_strided_slice %610 {offsets = [0, 72], sizes = [8, 36], strides = [1, 1]} : vector<8x108xf32> to vector<8x36xf32>
    %619 = math.tanh %617 : vector<8x36xf32>
    %620 = arith.mulf %618, %619 : vector<8x36xf32>
    %621 = vector.extract_strided_slice %620 {offsets = [0, 32], sizes = [8, 4], strides = [1, 1]} : vector<8x36xf32> to vector<8x4xf32>
    %cst_100 = arith.constant dense<0.000000e+00> : vector<8x144xf32>
    %622 = tpu.matmul %620, %9, %cst_100 {dimension_numbers = #tpu.dot_dimension_numbers<[1], [0], [0], [1], [0, 0, 1, 1], [], []>} : vector<8x36xf32>, vector<36x144xf32>, vector<8x144xf32> -> vector<8x144xf32>
    %623 = arith.addf %402, %622 : vector<8x144xf32>
    %624 = vector.extract_strided_slice %623 {offsets = [0, 0], sizes = [8, 108], strides = [1, 1]} : vector<8x144xf32> to vector<8x108xf32>
    %625 = arith.negf %624 : vector<8x108xf32>
    %626 = math.exp %625 : vector<8x108xf32>
    %cst_101 = arith.constant 1.000000e+00 : f32
    %627 = vector.broadcast %cst_101 : f32 to vector<8x108xf32>
    %628 = arith.addf %627, %626 : vector<8x108xf32>
    %629 = arith.divf %627, %628 : vector<8x108xf32>
    %630 = vector.extract_strided_slice %623 {offsets = [0, 108], sizes = [8, 36], strides = [1, 1]} : vector<8x144xf32> to vector<8x36xf32>
    %631 = math.tanh %630 : vector<8x36xf32>
    %632 = vector.extract_strided_slice %629 {offsets = [0, 36], sizes = [8, 36], strides = [1, 1]} : vector<8x108xf32> to vector<8x36xf32>
    %633 = arith.mulf %632, %617 : vector<8x36xf32>
    %634 = vector.extract_strided_slice %629 {offsets = [0, 0], sizes = [8, 36], strides = [1, 1]} : vector<8x108xf32> to vector<8x36xf32>
    %635 = arith.mulf %634, %631 : vector<8x36xf32>
    %636 = arith.addf %633, %635 : vector<8x36xf32>
    %637 = vector.extract_strided_slice %629 {offsets = [0, 72], sizes = [8, 36], strides = [1, 1]} : vector<8x108xf32> to vector<8x36xf32>
    %638 = math.tanh %636 : vector<8x36xf32>
    %639 = arith.mulf %637, %638 : vector<8x36xf32>
    %640 = vector.extract_strided_slice %639 {offsets = [0, 32], sizes = [8, 4], strides = [1, 1]} : vector<8x36xf32> to vector<8x4xf32>
    %cst_102 = arith.constant dense<0.000000e+00> : vector<8x144xf32>
    %641 = tpu.matmul %639, %9, %cst_102 {dimension_numbers = #tpu.dot_dimension_numbers<[1], [0], [0], [1], [0, 0, 1, 1], [], []>} : vector<8x36xf32>, vector<36x144xf32>, vector<8x144xf32> -> vector<8x144xf32>
    %642 = arith.addf %402, %641 : vector<8x144xf32>
    %643 = vector.extract_strided_slice %642 {offsets = [0, 0], sizes = [8, 108], strides = [1, 1]} : vector<8x144xf32> to vector<8x108xf32>
    %644 = arith.negf %643 : vector<8x108xf32>
    %645 = math.exp %644 : vector<8x108xf32>
    %cst_103 = arith.constant 1.000000e+00 : f32
    %646 = vector.broadcast %cst_103 : f32 to vector<8x108xf32>
    %647 = arith.addf %646, %645 : vector<8x108xf32>
    %648 = arith.divf %646, %647 : vector<8x108xf32>
    %649 = vector.extract_strided_slice %642 {offsets = [0, 108], sizes = [8, 36], strides = [1, 1]} : vector<8x144xf32> to vector<8x36xf32>
    %650 = math.tanh %649 : vector<8x36xf32>
    %651 = vector.extract_strided_slice %648 {offsets = [0, 36], sizes = [8, 36], strides = [1, 1]} : vector<8x108xf32> to vector<8x36xf32>
    %652 = arith.mulf %651, %636 : vector<8x36xf32>
    %653 = vector.extract_strided_slice %648 {offsets = [0, 0], sizes = [8, 36], strides = [1, 1]} : vector<8x108xf32> to vector<8x36xf32>
    %654 = arith.mulf %653, %650 : vector<8x36xf32>
    %655 = arith.addf %652, %654 : vector<8x36xf32>
    %656 = vector.extract_strided_slice %648 {offsets = [0, 72], sizes = [8, 36], strides = [1, 1]} : vector<8x108xf32> to vector<8x36xf32>
    %657 = math.tanh %655 : vector<8x36xf32>
    %658 = arith.mulf %656, %657 : vector<8x36xf32>
    %659 = vector.extract_strided_slice %658 {offsets = [0, 32], sizes = [8, 4], strides = [1, 1]} : vector<8x36xf32> to vector<8x4xf32>
    %cst_104 = arith.constant dense<0.000000e+00> : vector<8x144xf32>
    %660 = tpu.matmul %658, %9, %cst_104 {dimension_numbers = #tpu.dot_dimension_numbers<[1], [0], [0], [1], [0, 0, 1, 1], [], []>} : vector<8x36xf32>, vector<36x144xf32>, vector<8x144xf32> -> vector<8x144xf32>
    %661 = arith.addf %402, %660 : vector<8x144xf32>
    %662 = vector.extract_strided_slice %661 {offsets = [0, 0], sizes = [8, 108], strides = [1, 1]} : vector<8x144xf32> to vector<8x108xf32>
    %663 = arith.negf %662 : vector<8x108xf32>
    %664 = math.exp %663 : vector<8x108xf32>
    %cst_105 = arith.constant 1.000000e+00 : f32
    %665 = vector.broadcast %cst_105 : f32 to vector<8x108xf32>
    %666 = arith.addf %665, %664 : vector<8x108xf32>
    %667 = arith.divf %665, %666 : vector<8x108xf32>
    %668 = vector.extract_strided_slice %661 {offsets = [0, 108], sizes = [8, 36], strides = [1, 1]} : vector<8x144xf32> to vector<8x36xf32>
    %669 = math.tanh %668 : vector<8x36xf32>
    %670 = vector.extract_strided_slice %667 {offsets = [0, 36], sizes = [8, 36], strides = [1, 1]} : vector<8x108xf32> to vector<8x36xf32>
    %671 = arith.mulf %670, %655 : vector<8x36xf32>
    %672 = vector.extract_strided_slice %667 {offsets = [0, 0], sizes = [8, 36], strides = [1, 1]} : vector<8x108xf32> to vector<8x36xf32>
    %673 = arith.mulf %672, %669 : vector<8x36xf32>
    %674 = arith.addf %671, %673 : vector<8x36xf32>
    %675 = vector.extract_strided_slice %667 {offsets = [0, 72], sizes = [8, 36], strides = [1, 1]} : vector<8x108xf32> to vector<8x36xf32>
    %676 = math.tanh %674 : vector<8x36xf32>
    %677 = arith.mulf %675, %676 : vector<8x36xf32>
    %678 = vector.extract_strided_slice %677 {offsets = [0, 32], sizes = [8, 4], strides = [1, 1]} : vector<8x36xf32> to vector<8x4xf32>
    %cst_106 = arith.constant dense<0.000000e+00> : vector<8x144xf32>
    %679 = tpu.matmul %677, %9, %cst_106 {dimension_numbers = #tpu.dot_dimension_numbers<[1], [0], [0], [1], [0, 0, 1, 1], [], []>} : vector<8x36xf32>, vector<36x144xf32>, vector<8x144xf32> -> vector<8x144xf32>
    %680 = arith.addf %402, %679 : vector<8x144xf32>
    %681 = vector.extract_strided_slice %680 {offsets = [0, 0], sizes = [8, 108], strides = [1, 1]} : vector<8x144xf32> to vector<8x108xf32>
    %682 = arith.negf %681 : vector<8x108xf32>
    %683 = math.exp %682 : vector<8x108xf32>
    %cst_107 = arith.constant 1.000000e+00 : f32
    %684 = vector.broadcast %cst_107 : f32 to vector<8x108xf32>
    %685 = arith.addf %684, %683 : vector<8x108xf32>
    %686 = arith.divf %684, %685 : vector<8x108xf32>
    %687 = vector.extract_strided_slice %680 {offsets = [0, 108], sizes = [8, 36], strides = [1, 1]} : vector<8x144xf32> to vector<8x36xf32>
    %688 = math.tanh %687 : vector<8x36xf32>
    %689 = vector.extract_strided_slice %686 {offsets = [0, 36], sizes = [8, 36], strides = [1, 1]} : vector<8x108xf32> to vector<8x36xf32>
    %690 = arith.mulf %689, %674 : vector<8x36xf32>
    %691 = vector.extract_strided_slice %686 {offsets = [0, 0], sizes = [8, 36], strides = [1, 1]} : vector<8x108xf32> to vector<8x36xf32>
    %692 = arith.mulf %691, %688 : vector<8x36xf32>
    %693 = arith.addf %690, %692 : vector<8x36xf32>
    %694 = vector.extract_strided_slice %686 {offsets = [0, 72], sizes = [8, 36], strides = [1, 1]} : vector<8x108xf32> to vector<8x36xf32>
    %695 = math.tanh %693 : vector<8x36xf32>
    %696 = arith.mulf %694, %695 : vector<8x36xf32>
    %697 = vector.extract_strided_slice %696 {offsets = [0, 32], sizes = [8, 4], strides = [1, 1]} : vector<8x36xf32> to vector<8x4xf32>
    %cst_108 = arith.constant dense<0.000000e+00> : vector<8x144xf32>
    %698 = tpu.matmul %696, %9, %cst_108 {dimension_numbers = #tpu.dot_dimension_numbers<[1], [0], [0], [1], [0, 0, 1, 1], [], []>} : vector<8x36xf32>, vector<36x144xf32>, vector<8x144xf32> -> vector<8x144xf32>
    %699 = arith.addf %402, %698 : vector<8x144xf32>
    %700 = vector.extract_strided_slice %699 {offsets = [0, 0], sizes = [8, 108], strides = [1, 1]} : vector<8x144xf32> to vector<8x108xf32>
    %701 = arith.negf %700 : vector<8x108xf32>
    %702 = math.exp %701 : vector<8x108xf32>
    %cst_109 = arith.constant 1.000000e+00 : f32
    %703 = vector.broadcast %cst_109 : f32 to vector<8x108xf32>
    %704 = arith.addf %703, %702 : vector<8x108xf32>
    %705 = arith.divf %703, %704 : vector<8x108xf32>
    %706 = vector.extract_strided_slice %699 {offsets = [0, 108], sizes = [8, 36], strides = [1, 1]} : vector<8x144xf32> to vector<8x36xf32>
    %707 = math.tanh %706 : vector<8x36xf32>
    %708 = vector.extract_strided_slice %705 {offsets = [0, 36], sizes = [8, 36], strides = [1, 1]} : vector<8x108xf32> to vector<8x36xf32>
    %709 = arith.mulf %708, %693 : vector<8x36xf32>
    %710 = vector.extract_strided_slice %705 {offsets = [0, 0], sizes = [8, 36], strides = [1, 1]} : vector<8x108xf32> to vector<8x36xf32>
    %711 = arith.mulf %710, %707 : vector<8x36xf32>
    %712 = arith.addf %709, %711 : vector<8x36xf32>
    %713 = vector.extract_strided_slice %705 {offsets = [0, 72], sizes = [8, 36], strides = [1, 1]} : vector<8x108xf32> to vector<8x36xf32>
    %714 = math.tanh %712 : vector<8x36xf32>
    %715 = arith.mulf %713, %714 : vector<8x36xf32>
    %716 = vector.extract_strided_slice %715 {offsets = [0, 32], sizes = [8, 4], strides = [1, 1]} : vector<8x36xf32> to vector<8x4xf32>
    %cst_110 = arith.constant dense<0.000000e+00> : vector<8x144xf32>
    %717 = tpu.matmul %715, %9, %cst_110 {dimension_numbers = #tpu.dot_dimension_numbers<[1], [0], [0], [1], [0, 0, 1, 1], [], []>} : vector<8x36xf32>, vector<36x144xf32>, vector<8x144xf32> -> vector<8x144xf32>
    %718 = arith.addf %402, %717 : vector<8x144xf32>
    %719 = vector.extract_strided_slice %718 {offsets = [0, 0], sizes = [8, 108], strides = [1, 1]} : vector<8x144xf32> to vector<8x108xf32>
    %720 = arith.negf %719 : vector<8x108xf32>
    %721 = math.exp %720 : vector<8x108xf32>
    %cst_111 = arith.constant 1.000000e+00 : f32
    %722 = vector.broadcast %cst_111 : f32 to vector<8x108xf32>
    %723 = arith.addf %722, %721 : vector<8x108xf32>
    %724 = arith.divf %722, %723 : vector<8x108xf32>
    %725 = vector.extract_strided_slice %718 {offsets = [0, 108], sizes = [8, 36], strides = [1, 1]} : vector<8x144xf32> to vector<8x36xf32>
    %726 = math.tanh %725 : vector<8x36xf32>
    %727 = vector.extract_strided_slice %724 {offsets = [0, 36], sizes = [8, 36], strides = [1, 1]} : vector<8x108xf32> to vector<8x36xf32>
    %728 = arith.mulf %727, %712 : vector<8x36xf32>
    %729 = vector.extract_strided_slice %724 {offsets = [0, 0], sizes = [8, 36], strides = [1, 1]} : vector<8x108xf32> to vector<8x36xf32>
    %730 = arith.mulf %729, %726 : vector<8x36xf32>
    %731 = arith.addf %728, %730 : vector<8x36xf32>
    %732 = vector.extract_strided_slice %724 {offsets = [0, 72], sizes = [8, 36], strides = [1, 1]} : vector<8x108xf32> to vector<8x36xf32>
    %733 = math.tanh %731 : vector<8x36xf32>
    %734 = arith.mulf %732, %733 : vector<8x36xf32>
    %735 = vector.extract_strided_slice %734 {offsets = [0, 32], sizes = [8, 4], strides = [1, 1]} : vector<8x36xf32> to vector<8x4xf32>
    %736 = tpu.concatenate %450, %469, %488, %507, %526, %545, %564, %583, %602, %621, %640, %659, %678, %697, %716, %735 in 1 : vector<8x4xf32>, vector<8x4xf32>, vector<8x4xf32>, vector<8x4xf32>, vector<8x4xf32>, vector<8x4xf32>, vector<8x4xf32>, vector<8x4xf32>, vector<8x4xf32>, vector<8x4xf32>, vector<8x4xf32>, vector<8x4xf32>, vector<8x4xf32>, vector<8x4xf32>, vector<8x4xf32>, vector<8x4xf32> -> vector<8x64xf32>
    %c0_112 = arith.constant 0 : index
    %c0_113 = arith.constant 0 : index
    %737 = vector.load %arg12[%c0_112, %c0_113] : memref<8x64xf32, #tpu.memory_space<vmem>>, vector<8x64xf32>
    tpu.vector_store %arg12[%c0_112, %c0_113], %736 {strides = array<i32>} : memref<8x64xf32, #tpu.memory_space<vmem>>, vector<8x64xf32>,
    return
  }
  func.func @transform_0(%arg0: i32) -> (i32, i32) {
    %c0_i32 = arith.constant 0 : i32
    %c0_i32_0 = arith.constant 0 : i32
    return %arg0, %c0_i32 : i32, i32
  }
  func.func @transform_1(%arg0: i32) -> (i32, i32) {
    %c0_i32 = arith.constant 0 : i32
    %c0_i32_0 = arith.constant 0 : i32
    %c0_i32_1 = arith.constant 0 : i32
    return %c0_i32, %c0_i32_0 : i32, i32
  }
  func.func @transform_2(%arg0: i32) -> (i32, i32) {
    %c0_i32 = arith.constant 0 : i32
    %c0_i32_0 = arith.constant 0 : i32
    %c0_i32_1 = arith.constant 0 : i32
    return %c0_i32, %c0_i32_0 : i32, i32
  }
  func.func @transform_3(%arg0: i32) -> (i32, i32) {
    %c0_i32 = arith.constant 0 : i32
    %c0_i32_0 = arith.constant 0 : i32
    %c0_i32_1 = arith.constant 0 : i32
    return %c0_i32, %c0_i32_0 : i32, i32
  }
  func.func @transform_4(%arg0: i32) -> (i32, i32) {
    %c0_i32 = arith.constant 0 : i32
    %c0_i32_0 = arith.constant 0 : i32
    %c0_i32_1 = arith.constant 0 : i32
    return %c0_i32, %c0_i32_0 : i32, i32
  }
  func.func @transform_5(%arg0: i32) -> (i32, i32) {
    %c0_i32 = arith.constant 0 : i32
    %c0_i32_0 = arith.constant 0 : i32
    %c0_i32_1 = arith.constant 0 : i32
    return %c0_i32, %c0_i32_0 : i32, i32
  }
  func.func @transform_6(%arg0: i32) -> (i32, i32) {
    %c0_i32 = arith.constant 0 : i32
    %c0_i32_0 = arith.constant 0 : i32
    %c0_i32_1 = arith.constant 0 : i32
    return %c0_i32, %c0_i32_0 : i32, i32
  }
  func.func @transform_7(%arg0: i32) -> (i32, i32) {
    %c0_i32 = arith.constant 0 : i32
    %c0_i32_0 = arith.constant 0 : i32
    %c0_i32_1 = arith.constant 0 : i32
    return %c0_i32, %c0_i32_0 : i32, i32
  }
  func.func @transform_8(%arg0: i32) -> (i32, i32) {
    %c0_i32 = arith.constant 0 : i32
    %c0_i32_0 = arith.constant 0 : i32
    %c0_i32_1 = arith.constant 0 : i32
    return %c0_i32, %c0_i32_0 : i32, i32
  }
  func.func @transform_9(%arg0: i32) -> (i32, i32) {
    %c0_i32 = arith.constant 0 : i32
    %c0_i32_0 = arith.constant 0 : i32
    %c0_i32_1 = arith.constant 0 : i32
    return %c0_i32, %c0_i32_0 : i32, i32
  }
  func.func @transform_10(%arg0: i32) -> (i32, i32) {
    %c0_i32 = arith.constant 0 : i32
    %c0_i32_0 = arith.constant 0 : i32
    %c0_i32_1 = arith.constant 0 : i32
    return %c0_i32, %c0_i32_0 : i32, i32
  }
  func.func @transform_11(%arg0: i32) -> (i32, i32) {
    %c0_i32 = arith.constant 0 : i32
    %c0_i32_0 = arith.constant 0 : i32
    return %arg0, %c0_i32 : i32, i32
  }
}

</mosaic_0001>

<bundles_post_ra>
// kernel: lstm_autoencoder_forward.1
= control target key start
LH: loop header
LB: loop body
LE: loop exit
PB: predicated region body
PF: predicated region fallthrough
CT: control target
= control target key end

     0   :  { %s6909_s17 = smov 0   ;;  %s7895_s0 = inlined_call_operand.vmem [shape: f32[16,64], index: 0, kind: input, shape index: {}]   ;;  %s7896_s1 = inlined_call_operand.vmem [shape: f32[4,192], index: 1, kind: input, shape index: {}]   ;;  %s7897_s2 = inlined_call_operand.vmem [shape: f32[48,192], index: 2, kind: input, shape index: {}]   ;;  %s7898_s3 = inlined_call_operand.vmem [shape: f32[1,192], index: 3, kind: input, shape index: {}]   ;;  %s7899_s4 = inlined_call_operand.vmem [shape: f32[16,32], index: 4, kind: input, shape index: {}]   ;;  %s7900_s5 = inlined_call_operand.vmem [shape: f32[1,32], index: 5, kind: input, shape index: {}]   ;;  %s7901_s6 = inlined_call_operand.vmem [shape: f32[32,16], index: 6, kind: input, shape index: {}]   ;;  %s7902_s7 = inlined_call_operand.vmem [shape: f32[1,16], index: 7, kind: input, shape index: {}]   ;;  %s7903_s8 = inlined_call_operand.vmem [shape: f32[16,144], index: 8, kind: input, shape index: {}]   ;;  %s7904_s9 = inlined_call_operand.vmem [shape: f32[36,144], index: 9, kind: input, shape index: {}]   ;;  %s7905_s10 = inlined_call_operand.vmem [shape: f32[1,144], index: 10, kind: input, shape index: {}]   ;;  %s7906_s11 = inlined_call_operand.vmem [shape: f32[16,64], index: 11, kind: output, shape index: {}]  }
   0x1 LB: > { %s5771_s18 = sadd.s32 4294967295, %s6817_s17   ;;  %p5775_p0 = scmp.ge.s32.totalorder %s6817_s17, 1  ;;  %s6817_s17 = sphi %s6909_s17, %s21_s17  }
   0x2   : > { %p336_p1 = scmp.lt.s32.totalorder %s6817_s17, 3 }
   0x4   : > { %p337_p2 = pnand %p5775_p0, %p336_p1 }
   0x5   : > { %v6920_v0 = vld [vmem:[%s7896_s1] sm:$0xff] (!%p337_p2)  ;;  %vm442_vm0 = vcmask (!%p337_p2), 1043456   ;;  %v385_v1 = vld [vmem:[%s7897_s2 + $0x8] sm:$0xff] (!%p337_p2)  ;;  %v387_v2 = vld [vmem:[%s7897_s2 + $0x18] sm:$0xff] (!%p337_p2)  ;;  %p374_p3 = scmp.lt.s32.totalorder (!%p337_p2), %s5771_s18, 1  ;;  %v6819_v4 = vmov (!%p337_p2), 0.0   ;;  %v420_v22 = vlaneseq (!%p337_p2) }
   0x6   : > { %340 = sbr.rel (%p337_p2) target bundleno = 24287 (0x5edf), region = 64  ;;  %v6930_v3 = vcombine.high (!%p337_p2), %v6920_v0, %v6920_v0  ;;  %511 = vmatprep.mubr.f32.mxu0 (!%p337_p2), %v6819_v4  ;;  %v6933_v5 = vpack.c.bf16 (!%p337_p2), %v387_v2, %v385_v1  ;;  %v384_v6 = vld [vmem:[%s7897_s2] sm:$0xff] (!%p337_p2)  ;;  %v386_v7 = vld [vmem:[%s7897_s2 + $0x10] sm:$0xff] (!%p337_p2)  ;;  %v389_v8 = vld [vmem:[%s7897_s2 + $0x28] sm:$0xff] (!%p337_p2)  ;;  %785 = vmatprep.mubr.f32.mxu1 (!%p337_p2), %v6819_v4  ;;  %vm438_vm1 = vcmask (!%p337_p2), 31744   ;;  %s6820_s16 = smov (!%p337_p2), 112  }
   0x7   : > { %v6947_v9 = vpack.c.bf16 (!%p337_p2), %v386_v7, %v384_v6  ;;  %v391_v10 = vld [vmem:[%s7897_s2 + $0x38] sm:$0xff] (!%p337_p2)  ;;  %v388_v12 = vld [vmem:[%s7897_s2 + $0x20] sm:$0xff] (!%p337_p2)  ;;  %v390_v13 = vld [vmem:[%s7897_s2 + $0x30] sm:$0xff] (!%p337_p2)  ;;  %v7018_v23 = vshrl.u32 (!%p337_p2), %v420_v22, 7  ;;  %s6821_s19 = smov (!%p337_p2), 48   ;;  %s6822_s20 = smov (!%p337_p2), 124  }
   0x8   : > { %5779 = vmatprep.subr.msk.mxu0 (!%p337_p2), %vm442_vm0, %v6930_v3  ;;  %v6954_v11 = vpack.c.bf16 (!%p337_p2), %v391_v10, %v389_v8  ;;  %5990 = vmatprep.subr.bf16.mxu1 (!%p337_p2), %v6933_v5  ;;  %v393_v14 = vld [vmem:[%s7897_s2 + $0x48] sm:$0xff] (!%p337_p2)  ;;  %v395_v15 = vld [vmem:[%s7897_s2 + $0x58] sm:$0xff] (!%p337_p2)  ;;  %v6987_v17 = vpack.c.bf16 (!%p337_p2), %v390_v13, %v388_v12  ;;  %v392_v19 = vld [vmem:[%s7897_s2 + $0x40] sm:$0xff] (!%p337_p2)  ;;  %v421_v43 = vand.u32 (!%p337_p2), 127, %v420_v22  ;;  %s6823_s21 = smov (!%p337_p2), 96   ;;  %s6824_s22 = smov (!%p337_p2), 32  }
   0x9   : > { %5780 = vmatpush1.msk.msra.mxu0 (!%p337_p2), %vm442_vm0, %v6920_v0  ;;  %5992 = vmatpush1.bf16.msra.mxu1 (!%p337_p2), %v6947_v9  ;;  %v6990_v18 = vpack.c.bf16 (!%p337_p2), %v395_v15, %v393_v14  ;;  %v394_v20 = vld [vmem:[%s7897_s2 + $0x50] sm:$0xff] (!%p337_p2)  ;;  %v432_v24 = vsub.s32 (!%p337_p2), 1, %v7018_v23  ;;  %v396_v25 = vld [vmem:[%s7898_s3] sm:$0x3] (!%p337_p2)  ;;  %v428_v31 = vsub.s32 (!%p337_p2), 0, %v7018_v23  ;;  %vm717_vm3 = vcmask (!%p337_p2), 261120  }
   0xa   : > { %5978 = vmatprep.subr.bf16.mxu0 (!%p337_p2), %v6933_v5  ;;  %5994 = vmatprep.subr.bf16.mxu1 (!%p337_p2), %v6954_v11  ;;  %v7002_v21 = vpack.c.bf16 (!%p337_p2), %v394_v20, %v392_v19  ;;  %vm422_vm2 = vcmp.lt.s32.totalorder (!%p337_p2), %v421_v43, 32  ;;  %vm518_vm4 = vcmask (!%p337_p2), 392192   ;;  %s6825_s24 = smov (!%p337_p2), 120   ;;  %s6826_s25 = smov (!%p337_p2), 116   ;;  %vm6838_vm5 = vmmov (!%p337_p2), 0  }
   0xb   : > { %v7026_v26 = vrot.slane (!%p337_p2), %v396_v25, %v432_v24  ;;  %v7033_v32 = vrot.slane (!%p337_p2), %v396_v25, %v428_v31  ;;  %v7043_v45 = vsel (!%p337_p2), %vm422_vm2, 1.0, %v6819_v4  ;;  %s6827_s26 = smov (!%p337_p2), 108   ;;  %s6828_s27 = smov (!%p337_p2), 104   ;;  %vm3575_vm6 = vcmask (!%p337_p2), 130048  }
   0xc   : > { %s6829_s28 = smov (!%p337_p2), 100   ;;  %s6830_s29 = smov (!%p337_p2), 92   ;;  %vm3910_vm7 = vcmask (!%p337_p2), 162816   ;;  %vm3813_vm8 = vcmask (!%p337_p2), 293888   ;;  %vm5693_vm9 = vcmask (!%p337_p2), 64512   ;;  %vm5695_vm10 = vcmask (!%p337_p2), 97280  }
   0xd   : > { %s7910_s18 = smov (!%p374_p3, %s5771_s18), 1  ;;  %5996 = vmatpush1.bf16.msra.mxu1 %v6987_v17  ;;  %s6831_s13 = smov 88   ;;  %vm5699_vm11 = vcmask 195584   ;;  %vm5701_vm12 = vcmask 228352   ;;  %vm5705_vm13 = vcmask 326656   ;;  %vm5707_vm14 = vcmask 359424  }
   0xe   : > { %s7907_s14 = sshll.u32 %s7910_s18, 3  ;;  %5998 = vmatprep.subr.bf16.mxu1 %v6990_v18  ;;  %s6833_s15 = smov 80   ;;  %vm5710_vm15 = vcmask 424960   ;;  %vm5716_vm2 = vcmask 523264  }
   0xf   : > { %s6973_s23 = scalar_lea.vmem %s7895_s0, %s7907_s14  ;;  %s6839_s30 = smov 20  }
  0x10   : > { %v6983_v16 = vld [vmem:[%s6973_s23] sm:$0xff]  ;;  %s6840_s12 = smov 36   ;;  %s6843_s14 = smov 40  }
  0x11   : > { %5781 = vmatmul.mubr.msk.f32.vlgmr.msra.gmra.mrb[0].mxu0 %vm438_vm1, %v6983_v16  ;;  %6000 = vmatpush1.bf16.msra.mxu1 %v7002_v21 }
  0x12   : > { %5980 = vmatpush1.bf16.msra.mxu0 %v6947_v9  ;;  %586 = vmatprep.mubr.f32.mxu0 %v6819_v4 }
  0x13   : > { %5982 = vmatprep.subr.bf16.mxu0 %v6954_v11  ;;  %5796 = vmatprep.subr.msk.mxu1 %vm442_vm0, %v6930_v3 }
  0x16   : > { %5984 = vmatpush1.bf16.msra.mxu0 %v6987_v17 }
  0x17   : > { %5986 = vmatprep.subr.bf16.mxu0 %v6990_v18 }
  0x1a   : > { %5988 = vmatpush1.bf16.msra.mxu0 %v7002_v21 }
  0x1b   : > { %5784 = vmatprep.subr.msk.mxu0 %vm442_vm0, %v6930_v3 }
  0x1d   : > { %587 = vmatmul.mubr.f32.vlgmr.msra.gmra.mrb[0].mxu0 %v6819_v4 }
  0x1e   : > { %5785 = vmatpush1.msk.msra.mxu0 %vm442_vm0, %v6920_v0  ;;  %704 = vmatprep.mubr.f32.mxu0 %v6819_v4 }
  0x1f   : > { %5790 = vmatprep.subr.msk.mxu0 %vm442_vm0, %v6930_v3 }
  0xf0   : > { %v588_v27 = vpop.f32.mrb[0].mxu0 }
  0xf1   : > { %v590_v28 = vpop.f32.mrb[1].mxu0  ;;  %v6330_v33 = vadd.f32 %v588_v27, %v7033_v32 }
  0xf2   : > { %v6331_v29 = vadd.f32 %v590_v28, %v7026_v26 }
  0xf3   : > { %v5782_v34 = vmul.f32 -1.442695, %v6330_v33 }
  0xf4   : > { %6433 = vtanh.f32 %v6331_v29  ;;  %v5783_v46 = vmul.f32 -1.442695, %v6331_v29 }
  0xf5   : > { %6435 = vpow2.f32 %v5782_v34 }
  0xfe   : > { %v6434_v30 = vpop.eup %6433 }
  0xff   : > { %610 = vrot.lane.b32.xlu0 %v6434_v30, %s6820_s16  ;;  %v6436_v35 = vpop.eup %6435 }
 0x100   : > { %v601_v36 = vadd.f32 1.0, %v6436_v35 }
 0x102   : > { %6437 = vrcp.f32 %v601_v36 }
 0x10c   : > { %v6438_v37 = vpop.eup %6437 }
 0x10d   : > { %v608_v40 = vmul.f32 0.0, %v6438_v37 }
 0x171   : > { %v611_v38 = vpop.permute.xlu0 %610 }
 0x172   : > { %v613_v39 = vmul.f32 %v6438_v37, %v611_v38 }
 0x174   : > { %615 = vrot.lane.b32.xlu0 %v613_v39, %s6821_s19 }
 0x178   : > { %636 = vrot.lane.b32.xlu0 %v6983_v16, %s6822_s20  ;;  %s6834_s20 = smov 76  }
 0x1e6   : > { %v616_v41 = vpop.permute.xlu0 %615 }
 0x1e7   : > { %v7037_v42 = vadd.f32 %v616_v41, %v608_v40 }
 0x1e9   : > { %6439 = vtanh.f32 %v7037_v42 }
 0x1ea   : > { %6441 = vpow2.f32 %v5783_v46  ;;  %v637_v49 = vpop.permute.xlu0 %636 }
 0x1eb   : > { %5786 = vmatmul.mubr.msk.f32.vlgmr.msra.gmra.mrb[2].mxu0 %vm438_vm1, %v637_v49 }
 0x1ec   : > { %5791 = vmatpush1.msk.msra.mxu0 %vm442_vm0, %v6920_v0  ;;  %893 = vmatprep.mubr.f32.mxu0 %v6819_v4 }
 0x1ed   : > { %6002 = vmatprep.subr.bf16.mxu0 %v6933_v5 }
 0x1f3   : > { %v6440_v44 = vpop.eup %6439 }
 0x1f4   : > { %621 = vrot.lane.b32.xlu1 %v6440_v44, %s6821_s19  ;;  %v6442_v47 = vpop.eup %6441 }
 0x1f5   : > { %v602_v48 = vadd.f32 1.0, %v6442_v47 }
 0x1f7   : > { %6443 = vrcp.f32 %v602_v48 }
 0x1f8   : > { %631 = vrot.lane.b32.xlu1 %v7043_v45, %s6823_s21 }
 0x201   : > { %v6444_v51 = vpop.eup %6443 }
 0x266   : > { %v622_v50 = vpop.permute.xlu1 %621 }
 0x267   : > { %v624_v52 = vmul.f32 %v6438_v37, %v622_v50  ;;  %v625_v53 = vmul.f32 %v6444_v51, %v622_v50 }
 0x26a   : > { %v632_v54 = vpop.permute.xlu1 %631 }
 0x26b   : > { %v634_v55 = vmul.f32 %v632_v54, %v624_v52  ;;  %v635_v56 = vmul.f32 %v632_v54, %v625_v53 }
 0x26d   : > { %713 = vrot.lane.b32.xlu1 %v634_v55, %s6824_s22  ;;  %715 = vrot.lane.b32.xlu0 %v635_v56, %s6824_s22 }
 0x271   : > { %627 = vrot.lane.b32.xlu0 %v7043_v45, %s6821_s19 }
 0x2be   : > { %v706_v60 = vpop.f32.mrb[2].mxu0 }
 0x2bf   : > { %v708_v61 = vpop.f32.mrb[3].mxu0  ;;  %v707_v62 = vadd.f32 %v706_v60, %v7033_v32 }
 0x2c0   : > { %v709_v63 = vadd.f32 %v708_v61, %v7026_v26 }
 0x2df   : > { %v714_v57 = vpop.permute.xlu1 %713  ;;  %v716_v58 = vpop.permute.xlu0 %715 }
 0x2e0   : > { %v718_v59 = vsel %vm717_vm3, %v714_v57, %v716_v58 }
 0x2e1   : > { %5787 = vmatmul.mubr.msk.f32.vlgmr.msra.gmra.mrb[0].mxu1 %vm518_vm4, %v718_v59 }
 0x2e2   : > { %5797 = vmatpush1.msk.msra.mxu1 %vm442_vm0, %v6920_v0  ;;  %1081 = vmatprep.mubr.f32.mxu1 %v6819_v4 }
 0x2e3   : > { %6014 = vmatprep.subr.bf16.mxu1 %v6933_v5  ;;  %v628_v20 = vpop.permute.xlu0 %627 }
 0x2e4   : > { %v630_v22 = vmul.f32 %v628_v20, %v7037_v42 }
 0x3b4   : > { %v787_v1 = vpop.f32.mrb[0].mxu1 }
 0x3b5   : > { %v792_v2 = vadd.f32 %v787_v1, %v707_v62  ;;  %v789_v6 = vpop.f32.mrb[1].mxu1 }
 0x3b6   : > { %v793_v7 = vadd.f32 %v789_v6, %v709_v63 }
 0x3b7   : > { %v5788_v10 = vmul.f32 -1.442695, %v792_v2 }
 0x3b8   : > { %6445 = vtanh.f32 %v793_v7  ;;  %v5789_v33 = vmul.f32 -1.442695, %v793_v7 }
 0x3b9   : > { %6447 = vpow2.f32 %v5788_v10 }
 0x3c2   : > { %v6446_v8 = vpop.eup %6445 }
 0x3c3   : > { %809 = vrot.lane.b32.xlu1 %v6446_v8, %s6820_s16  ;;  %v6448_v12 = vpop.eup %6447 }
 0x3c4   : > { %v800_v13 = vadd.f32 1.0, %v6448_v12 }
 0x3c6   : > { %6449 = vrcp.f32 %v800_v13 }
 0x3d0   : > { %v6450_v14 = vpop.eup %6449 }
 0x3d1   : > { %v807_v25 = vmul.f32 %v6450_v14, %v630_v22 }
 0x435   : > { %v810_v15 = vpop.permute.xlu1 %809 }
 0x436   : > { %v812_v19 = vmul.f32 %v6450_v14, %v810_v15 }
 0x438   : > { %814 = vrot.lane.b32.xlu1 %v812_v19, %s6821_s19 }
 0x43c   : > { %825 = vrot.lane.b32.xlu1 %v6983_v16, %s6825_s24  ;;  %s6836_s24 = smov 68  }
 0x4aa   : > { %v815_v27 = vpop.permute.xlu1 %814 }
 0x4ab   : > { %v817_v28 = vadd.f32 %v815_v27, %v807_v25 }
 0x4ad   : > { %6451 = vtanh.f32 %v817_v28 }
 0x4ae   : > { %v826_v29 = vpop.permute.xlu1 %825  ;;  %6453 = vpow2.f32 %v5789_v33 }
 0x4af   : > { %5792 = vmatmul.mubr.msk.f32.vlgmr.msra.gmra.mrb[4].mxu0 %vm438_vm1, %v826_v29 }
 0x4b0   : > { %6004 = vmatpush1.bf16.msra.mxu0 %v6947_v9  ;;  %973 = vmatprep.mubr.f32.mxu0 %v6819_v4 }
 0x4b1   : > { %6006 = vmatprep.subr.bf16.mxu0 %v6954_v11 }
 0x4b4   : > { %6008 = vmatpush1.bf16.msra.mxu0 %v6987_v17 }
 0x4b5   : > { %6010 = vmatprep.subr.bf16.mxu0 %v6990_v18 }
 0x4b7   : > { %v6452_v30 = vpop.eup %6451 }
 0x4b8   : > { %820 = vrot.lane.b32.xlu0 %v6452_v30, %s6821_s19  ;;  %6012 = vmatpush1.bf16.msra.mxu0 %v7002_v21  ;;  %v6454_v34 = vpop.eup %6453 }
 0x4b9   : > { %5802 = vmatprep.subr.msk.mxu0 %vm442_vm0, %v6930_v3  ;;  %v801_v35 = vadd.f32 1.0, %v6454_v34 }
 0x4bb   : > { %6455 = vrcp.f32 %v801_v35 }
 0x4c5   : > { %v6456_v36 = vpop.eup %6455 }
 0x52a   : > { %v821_v37 = vpop.permute.xlu0 %820 }
 0x52b   : > { %v823_v38 = vmul.f32 %v6450_v14, %v821_v37  ;;  %v824_v39 = vmul.f32 %v6456_v36, %v821_v37 }
 0x52d   : > { %904 = vrot.lane.b32.xlu1 %v824_v39, %s6824_s22  ;;  %902 = vrot.lane.b32.xlu0 %v823_v38, %s6824_s22 }
 0x59f   : > { %v905_v40 = vpop.permute.xlu1 %904  ;;  %v903_v41 = vpop.permute.xlu0 %902 }
 0x5a0   : > { %v906_v42 = vsel %vm717_vm3, %v903_v41, %v905_v40 }
 0x5a1   : > { %5793 = vmatmul.mubr.msk.f32.vlgmr.msra.gmra.mrb[4].mxu0 %vm518_vm4, %v906_v42 }
 0x5a2   : > { %5803 = vmatpush1.msk.msra.mxu0 %vm442_vm0, %v6920_v0  ;;  %1269 = vmatprep.mubr.f32.mxu0 %v6819_v4 }
 0x5a3   : > { %6026 = vmatprep.subr.bf16.mxu0 %v6933_v5 }
 0x674   : > { %v975_v43 = vpop.f32.mrb[4].mxu0 }
 0x675   : > { %v977_v44 = vpop.f32.mrb[5].mxu0  ;;  %v6336_v48 = vadd.f32 %v975_v43, %v7033_v32 }
 0x676   : > { %v6337_v46 = vadd.f32 %v977_v44, %v7026_v26 }
 0x677   : > { %v5794_v49 = vmul.f32 -1.442695, %v6336_v48 }
 0x678   : > { %6457 = vtanh.f32 %v6337_v46  ;;  %v5795_v60 = vmul.f32 -1.442695, %v6337_v46 }
 0x679   : > { %6459 = vpow2.f32 %v5794_v49 }
 0x682   : > { %v6458_v47 = vpop.eup %6457 }
 0x683   : > { %997 = vrot.lane.b32.xlu0 %v6458_v47, %s6820_s16  ;;  %v6460_v50 = vpop.eup %6459 }
 0x684   : > { %v988_v51 = vadd.f32 1.0, %v6460_v50 }
 0x686   : > { %6461 = vrcp.f32 %v988_v51 }
 0x690   : > { %v6462_v52 = vpop.eup %6461 }
 0x691   : > { %v995_v55 = vmul.f32 %v6462_v52, %v817_v28 }
 0x6f5   : > { %v998_v53 = vpop.permute.xlu0 %997 }
 0x6f6   : > { %v1000_v54 = vmul.f32 %v6462_v52, %v998_v53 }
 0x6f8   : > { %1002 = vrot.lane.b32.xlu1 %v1000_v54, %s6821_s19 }
 0x6fc   : > { %1013 = vrot.lane.b32.xlu1 %v6983_v16, %s6826_s25 }
 0x76a   : > { %v1003_v56 = vpop.permute.xlu1 %1002 }
 0x76b   : > { %v1005_v57 = vadd.f32 %v1003_v56, %v995_v55 }
 0x76d   : > { %6463 = vtanh.f32 %v1005_v57 }
 0x76e   : > { %v1014_v58 = vpop.permute.xlu1 %1013  ;;  %6465 = vpow2.f32 %v5795_v60 }
 0x76f   : > { %5798 = vmatmul.mubr.msk.f32.vlgmr.msra.gmra.mrb[2].mxu1 %vm438_vm1, %v1014_v58 }
 0x770   : > { %6016 = vmatpush1.bf16.msra.mxu1 %v6947_v9  ;;  %1161 = vmatprep.mubr.f32.mxu1 %v6819_v4 }
 0x771   : > { %6018 = vmatprep.subr.bf16.mxu1 %v6954_v11 }
 0x774   : > { %6020 = vmatpush1.bf16.msra.mxu1 %v6987_v17 }
 0x775   : > { %6022 = vmatprep.subr.bf16.mxu1 %v6990_v18 }
 0x777   : > { %v6464_v59 = vpop.eup %6463 }
 0x778   : > { %1008 = vrot.lane.b32.xlu0 %v6464_v59, %s6821_s19  ;;  %6024 = vmatpush1.bf16.msra.mxu1 %v7002_v21  ;;  %v6466_v61 = vpop.eup %6465 }
 0x779   : > { %5808 = vmatprep.subr.msk.mxu1 %vm442_vm0, %v6930_v3  ;;  %v989_v62 = vadd.f32 1.0, %v6466_v61 }
 0x77b   : > { %6467 = vrcp.f32 %v989_v62 }
 0x785   : > { %v6468_v63 = vpop.eup %6467 }
 0x7ea   : > { %v1009_v1 = vpop.permute.xlu0 %1008 }
 0x7eb   : > { %v1011_v2 = vmul.f32 %v6462_v52, %v1009_v1  ;;  %v1012_v6 = vmul.f32 %v6468_v63, %v1009_v1 }
 0x7ed   : > { %1090 = vrot.lane.b32.xlu0 %v1011_v2, %s6824_s22  ;;  %1092 = vrot.lane.b32.xlu1 %v1012_v6, %s6824_s22 }
 0x85f   : > { %v1091_v7 = vpop.permute.xlu0 %1090  ;;  %v1093_v8 = vpop.permute.xlu1 %1092 }
 0x860   : > { %v1094_v10 = vsel %vm717_vm3, %v1091_v7, %v1093_v8 }
 0x861   : > { %5799 = vmatmul.mubr.msk.f32.vlgmr.msra.gmra.mrb[2].mxu1 %vm518_vm4, %v1094_v10 }
 0x862   : > { %5809 = vmatpush1.msk.msra.mxu1 %vm442_vm0, %v6920_v0  ;;  %1457 = vmatprep.mubr.f32.mxu1 %v6819_v4 }
 0x863   : > { %6038 = vmatprep.subr.bf16.mxu1 %v6933_v5 }
 0x934   : > { %v1163_v12 = vpop.f32.mrb[2].mxu1 }
 0x935   : > { %v1165_v13 = vpop.f32.mrb[3].mxu1  ;;  %v6338_v19 = vadd.f32 %v1163_v12, %v7033_v32 }
 0x936   : > { %v6339_v14 = vadd.f32 %v1165_v13, %v7026_v26 }
 0x937   : > { %v5800_v20 = vmul.f32 -1.442695, %v6338_v19 }
 0x938   : > { %6469 = vtanh.f32 %v6339_v14  ;;  %v5801_v37 = vmul.f32 -1.442695, %v6339_v14 }
 0x939   : > { %6471 = vpow2.f32 %v5800_v20 }
 0x942   : > { %v6470_v15 = vpop.eup %6469 }
 0x943   : > { %1185 = vrot.lane.b32.xlu0 %v6470_v15, %s6820_s16  ;;  %v6472_v22 = vpop.eup %6471 }
 0x944   : > { %v1176_v25 = vadd.f32 1.0, %v6472_v22 }
 0x946   : > { %6473 = vrcp.f32 %v1176_v25 }
 0x950   : > { %v6474_v27 = vpop.eup %6473 }
 0x951   : > { %v1183_v30 = vmul.f32 %v6474_v27, %v1005_v57 }
 0x9b5   : > { %v1186_v28 = vpop.permute.xlu0 %1185 }
 0x9b6   : > { %v1188_v29 = vmul.f32 %v6474_v27, %v1186_v28 }
 0x9b8   : > { %1190 = vrot.lane.b32.xlu1 %v1188_v29, %s6821_s19 }
 0x9bc   : > { %1201 = vrot.lane.b32.xlu1 %v6983_v16, %s6820_s16 }
 0xa2a   : > { %v1191_v33 = vpop.permute.xlu1 %1190 }
 0xa2b   : > { %v1193_v34 = vadd.f32 %v1191_v33, %v1183_v30 }
 0xa2d   : > { %6475 = vtanh.f32 %v1193_v34 }
 0xa2e   : > { %v1202_v35 = vpop.permute.xlu1 %1201  ;;  %6477 = vpow2.f32 %v5801_v37 }
 0xa2f   : > { %5804 = vmatmul.mubr.msk.f32.vlgmr.msra.gmra.mrb[6].mxu0 %vm438_vm1, %v1202_v35 }
 0xa30   : > { %6028 = vmatpush1.bf16.msra.mxu0 %v6947_v9  ;;  %1349 = vmatprep.mubr.f32.mxu0 %v6819_v4 }
 0xa31   : > { %6030 = vmatprep.subr.bf16.mxu0 %v6954_v11 }
 0xa34   : > { %6032 = vmatpush1.bf16.msra.mxu0 %v6987_v17 }
 0xa35   : > { %6034 = vmatprep.subr.bf16.mxu0 %v6990_v18 }
 0xa37   : > { %v6476_v36 = vpop.eup %6475 }
 0xa38   : > { %1196 = vrot.lane.b32.xlu0 %v6476_v36, %s6821_s19  ;;  %6036 = vmatpush1.bf16.msra.mxu0 %v7002_v21  ;;  %v6478_v38 = vpop.eup %6477 }
 0xa39   : > { %5814 = vmatprep.subr.msk.mxu0 %vm442_vm0, %v6930_v3  ;;  %v1177_v39 = vadd.f32 1.0, %v6478_v38 }
 0xa3b   : > { %6479 = vrcp.f32 %v1177_v39 }
 0xa45   : > { %v6480_v40 = vpop.eup %6479 }
 0xaaa   : > { %v1197_v41 = vpop.permute.xlu0 %1196 }
 0xaab   : > { %v1199_v42 = vmul.f32 %v6474_v27, %v1197_v41  ;;  %v1200_v43 = vmul.f32 %v6480_v40, %v1197_v41 }
 0xaad   : > { %1278 = vrot.lane.b32.xlu0 %v1199_v42, %s6824_s22  ;;  %1280 = vrot.lane.b32.xlu1 %v1200_v43, %s6824_s22 }
 0xb1f   : > { %v1279_v44 = vpop.permute.xlu0 %1278  ;;  %v1281_v46 = vpop.permute.xlu1 %1280 }
 0xb20   : > { %v1282_v47 = vsel %vm717_vm3, %v1279_v44, %v1281_v46 }
 0xb21   : > { %5805 = vmatmul.mubr.msk.f32.vlgmr.msra.gmra.mrb[6].mxu0 %vm518_vm4, %v1282_v47 }
 0xb22   : > { %5815 = vmatpush1.msk.msra.mxu0 %vm442_vm0, %v6920_v0  ;;  %1645 = vmatprep.mubr.f32.mxu0 %v6819_v4 }
 0xb23   : > { %6050 = vmatprep.subr.bf16.mxu0 %v6933_v5 }
 0xbf4   : > { %v1351_v48 = vpop.f32.mrb[6].mxu0 }
 0xbf5   : > { %v1353_v49 = vpop.f32.mrb[7].mxu0  ;;  %v6340_v52 = vadd.f32 %v1351_v48, %v7033_v32 }
 0xbf6   : > { %v6341_v50 = vadd.f32 %v1353_v49, %v7026_v26 }
 0xbf7   : > { %v5806_v53 = vmul.f32 -1.442695, %v6340_v52 }
 0xbf8   : > { %6481 = vtanh.f32 %v6341_v50  ;;  %v5807_v1 = vmul.f32 -1.442695, %v6341_v50 }
 0xbf9   : > { %6483 = vpow2.f32 %v5806_v53 }
 0xc02   : > { %v6482_v51 = vpop.eup %6481 }
 0xc03   : > { %1373 = vrot.lane.b32.xlu0 %v6482_v51, %s6820_s16  ;;  %v6484_v54 = vpop.eup %6483 }
 0xc04   : > { %v1364_v55 = vadd.f32 1.0, %v6484_v54 }
 0xc06   : > { %6485 = vrcp.f32 %v1364_v55 }
 0xc10   : > { %v6486_v56 = vpop.eup %6485 }
 0xc11   : > { %v1371_v59 = vmul.f32 %v6486_v56, %v1193_v34 }
 0xc75   : > { %v1374_v57 = vpop.permute.xlu0 %1373 }
 0xc76   : > { %v1376_v58 = vmul.f32 %v6486_v56, %v1374_v57 }
 0xc78   : > { %1378 = vrot.lane.b32.xlu1 %v1376_v58, %s6821_s19 }
 0xc7c   : > { %1389 = vrot.lane.b32.xlu1 %v6983_v16, %s6827_s26 }
 0xcea   : > { %v1379_v60 = vpop.permute.xlu1 %1378 }
 0xceb   : > { %v1381_v61 = vadd.f32 %v1379_v60, %v1371_v59 }
 0xced   : > { %6487 = vtanh.f32 %v1381_v61 }
 0xcee   : > { %v1390_v62 = vpop.permute.xlu1 %1389  ;;  %6489 = vpow2.f32 %v5807_v1 }
 0xcef   : > { %5810 = vmatmul.mubr.msk.f32.vlgmr.msra.gmra.mrb[4].mxu1 %vm438_vm1, %v1390_v62 }
 0xcf0   : > { %6040 = vmatpush1.bf16.msra.mxu1 %v6947_v9  ;;  %1537 = vmatprep.mubr.f32.mxu1 %v6819_v4 }
 0xcf1   : > { %6042 = vmatprep.subr.bf16.mxu1 %v6954_v11 }
 0xcf4   : > { %6044 = vmatpush1.bf16.msra.mxu1 %v6987_v17 }
 0xcf5   : > { %6046 = vmatprep.subr.bf16.mxu1 %v6990_v18 }
 0xcf7   : > { %v6488_v63 = vpop.eup %6487 }
 0xcf8   : > { %1384 = vrot.lane.b32.xlu0 %v6488_v63, %s6821_s19  ;;  %6048 = vmatpush1.bf16.msra.mxu1 %v7002_v21  ;;  %v6490_v2 = vpop.eup %6489 }
 0xcf9   : > { %5820 = vmatprep.subr.msk.mxu1 %vm442_vm0, %v6930_v3  ;;  %v1365_v6 = vadd.f32 1.0, %v6490_v2 }
 0xcfb   : > { %6491 = vrcp.f32 %v1365_v6 }
 0xd05   : > { %v6492_v7 = vpop.eup %6491 }
 0xd6a   : > { %v1385_v8 = vpop.permute.xlu0 %1384 }
 0xd6b   : > { %v1387_v10 = vmul.f32 %v6486_v56, %v1385_v8  ;;  %v1388_v12 = vmul.f32 %v6492_v7, %v1385_v8 }
 0xd6d   : > { %1466 = vrot.lane.b32.xlu0 %v1387_v10, %s6824_s22  ;;  %1468 = vrot.lane.b32.xlu1 %v1388_v12, %s6824_s22 }
 0xddf   : > { %v1467_v13 = vpop.permute.xlu0 %1466  ;;  %v1469_v14 = vpop.permute.xlu1 %1468 }
 0xde0   : > { %v1470_v15 = vsel %vm717_vm3, %v1467_v13, %v1469_v14 }
 0xde1   : > { %5811 = vmatmul.mubr.msk.f32.vlgmr.msra.gmra.mrb[4].mxu1 %vm518_vm4, %v1470_v15 }
 0xde2   : > { %5821 = vmatpush1.msk.msra.mxu1 %vm442_vm0, %v6920_v0  ;;  %1833 = vmatprep.mubr.f32.mxu1 %v6819_v4 }
 0xde3   : > { %6062 = vmatprep.subr.bf16.mxu1 %v6933_v5 }
 0xeb4   : > { %v1539_v19 = vpop.f32.mrb[4].mxu1 }
 0xeb5   : > { %v1541_v20 = vpop.f32.mrb[5].mxu1  ;;  %v6342_v27 = vadd.f32 %v1539_v19, %v7033_v32 }
 0xeb6   : > { %v6343_v22 = vadd.f32 %v1541_v20, %v7026_v26 }
 0xeb7   : > { %v5812_v28 = vmul.f32 -1.442695, %v6342_v27 }
 0xeb8   : > { %6493 = vtanh.f32 %v6343_v22  ;;  %v5813_v41 = vmul.f32 -1.442695, %v6343_v22 }
 0xeb9   : > { %6495 = vpow2.f32 %v5812_v28 }
 0xec2   : > { %v6494_v25 = vpop.eup %6493 }
 0xec3   : > { %1561 = vrot.lane.b32.xlu0 %v6494_v25, %s6820_s16  ;;  %v6496_v29 = vpop.eup %6495 }
 0xec4   : > { %v1552_v30 = vadd.f32 1.0, %v6496_v29 }
 0xec6   : > { %6497 = vrcp.f32 %v1552_v30 }
 0xed0   : > { %v6498_v33 = vpop.eup %6497 }
 0xed1   : > { %v1559_v36 = vmul.f32 %v6498_v33, %v1381_v61 }
 0xf35   : > { %v1562_v34 = vpop.permute.xlu0 %1561 }
 0xf36   : > { %v1564_v35 = vmul.f32 %v6498_v33, %v1562_v34 }
 0xf38   : > { %1566 = vrot.lane.b32.xlu1 %v1564_v35, %s6821_s19 }
 0xf3c   : > { %1577 = vrot.lane.b32.xlu1 %v6983_v16, %s6828_s27 }
 0xfaa   : > { %v1567_v37 = vpop.permute.xlu1 %1566 }
 0xfab   : > { %v1569_v38 = vadd.f32 %v1567_v37, %v1559_v36 }
 0xfad   : > { %6499 = vtanh.f32 %v1569_v38 }
 0xfae   : > { %v1578_v39 = vpop.permute.xlu1 %1577  ;;  %6501 = vpow2.f32 %v5813_v41 }
 0xfaf   : > { %5816 = vmatmul.mubr.msk.f32.vlgmr.msra.gmra.mrb[8].mxu0 %vm438_vm1, %v1578_v39 }
 0xfb0   : > { %6052 = vmatpush1.bf16.msra.mxu0 %v6947_v9  ;;  %1725 = vmatprep.mubr.f32.mxu0 %v6819_v4 }
 0xfb1   : > { %6054 = vmatprep.subr.bf16.mxu0 %v6954_v11 }
 0xfb4   : > { %6056 = vmatpush1.bf16.msra.mxu0 %v6987_v17 }
 0xfb5   : > { %6058 = vmatprep.subr.bf16.mxu0 %v6990_v18 }
 0xfb7   : > { %v6500_v40 = vpop.eup %6499 }
 0xfb8   : > { %1572 = vrot.lane.b32.xlu0 %v6500_v40, %s6821_s19  ;;  %6060 = vmatpush1.bf16.msra.mxu0 %v7002_v21  ;;  %v6502_v42 = vpop.eup %6501 }
 0xfb9   : > { %5826 = vmatprep.subr.msk.mxu0 %vm442_vm0, %v6930_v3  ;;  %v1553_v43 = vadd.f32 1.0, %v6502_v42 }
 0xfbb   : > { %6503 = vrcp.f32 %v1553_v43 }
 0xfc5   : > { %v6504_v44 = vpop.eup %6503 }
0x102a   : > { %v1573_v46 = vpop.permute.xlu0 %1572 }
0x102b   : > { %v1575_v47 = vmul.f32 %v6498_v33, %v1573_v46  ;;  %v1576_v48 = vmul.f32 %v6504_v44, %v1573_v46 }
0x102d   : > { %1654 = vrot.lane.b32.xlu0 %v1575_v47, %s6824_s22  ;;  %1656 = vrot.lane.b32.xlu1 %v1576_v48, %s6824_s22 }
0x109f   : > { %v1655_v49 = vpop.permute.xlu0 %1654  ;;  %v1657_v50 = vpop.permute.xlu1 %1656 }
0x10a0   : > { %v1658_v51 = vsel %vm717_vm3, %v1655_v49, %v1657_v50 }
0x10a1   : > { %5817 = vmatmul.mubr.msk.f32.vlgmr.msra.gmra.mrb[8].mxu0 %vm518_vm4, %v1658_v51 }
0x10a2   : > { %5827 = vmatpush1.msk.msra.mxu0 %vm442_vm0, %v6920_v0  ;;  %2021 = vmatprep.mubr.f32.mxu0 %v6819_v4 }
0x10a3   : > { %6074 = vmatprep.subr.bf16.mxu0 %v6933_v5 }
0x1174   : > { %v1727_v52 = vpop.f32.mrb[8].mxu0 }
0x1175   : > { %v1729_v53 = vpop.f32.mrb[9].mxu0  ;;  %v6344_v56 = vadd.f32 %v1727_v52, %v7033_v32 }
0x1176   : > { %v6345_v54 = vadd.f32 %v1729_v53, %v7026_v26 }
0x1177   : > { %v5818_v57 = vmul.f32 -1.442695, %v6344_v56 }
0x1178   : > { %6505 = vtanh.f32 %v6345_v54  ;;  %v5819_v8 = vmul.f32 -1.442695, %v6345_v54 }
0x1179   : > { %6507 = vpow2.f32 %v5818_v57 }
0x1182   : > { %v6506_v55 = vpop.eup %6505 }
0x1183   : > { %1749 = vrot.lane.b32.xlu0 %v6506_v55, %s6820_s16  ;;  %v6508_v58 = vpop.eup %6507 }
0x1184   : > { %v1740_v59 = vadd.f32 1.0, %v6508_v58 }
0x1186   : > { %6509 = vrcp.f32 %v1740_v59 }
0x1190   : > { %v6510_v60 = vpop.eup %6509 }
0x1191   : > { %v1747_v63 = vmul.f32 %v6510_v60, %v1569_v38 }
0x11f5   : > { %v1750_v61 = vpop.permute.xlu0 %1749 }
0x11f6   : > { %v1752_v62 = vmul.f32 %v6510_v60, %v1750_v61 }
0x11f8   : > { %1754 = vrot.lane.b32.xlu1 %v1752_v62, %s6821_s19 }
0x11fc   : > { %1765 = vrot.lane.b32.xlu1 %v6983_v16, %s6829_s28 }
0x126a   : > { %v1755_v1 = vpop.permute.xlu1 %1754 }
0x126b   : > { %v1757_v2 = vadd.f32 %v1755_v1, %v1747_v63 }
0x126d   : > { %6511 = vtanh.f32 %v1757_v2 }
0x126e   : > { %v1766_v6 = vpop.permute.xlu1 %1765  ;;  %6513 = vpow2.f32 %v5819_v8 }
0x126f   : > { %5822 = vmatmul.mubr.msk.f32.vlgmr.msra.gmra.mrb[6].mxu1 %vm438_vm1, %v1766_v6 }
0x1270   : > { %6064 = vmatpush1.bf16.msra.mxu1 %v6947_v9  ;;  %1913 = vmatprep.mubr.f32.mxu1 %v6819_v4 }
0x1271   : > { %6066 = vmatprep.subr.bf16.mxu1 %v6954_v11 }
0x1274   : > { %6068 = vmatpush1.bf16.msra.mxu1 %v6987_v17 }
0x1275   : > { %6070 = vmatprep.subr.bf16.mxu1 %v6990_v18 }
0x1277   : > { %v6512_v7 = vpop.eup %6511 }
0x1278   : > { %1760 = vrot.lane.b32.xlu0 %v6512_v7, %s6821_s19  ;;  %6072 = vmatpush1.bf16.msra.mxu1 %v7002_v21  ;;  %v6514_v10 = vpop.eup %6513 }
0x1279   : > { %5832 = vmatprep.subr.msk.mxu1 %vm442_vm0, %v6930_v3  ;;  %v1741_v12 = vadd.f32 1.0, %v6514_v10 }
0x127b   : > { %6515 = vrcp.f32 %v1741_v12 }
0x1285   : > { %v6516_v13 = vpop.eup %6515 }
0x12ea   : > { %v1761_v14 = vpop.permute.xlu0 %1760 }
0x12eb   : > { %v1763_v15 = vmul.f32 %v6510_v60, %v1761_v14  ;;  %v1764_v19 = vmul.f32 %v6516_v13, %v1761_v14 }
0x12ed   : > { %1842 = vrot.lane.b32.xlu0 %v1763_v15, %s6824_s22  ;;  %1844 = vrot.lane.b32.xlu1 %v1764_v19, %s6824_s22 }
0x135f   : > { %v1843_v20 = vpop.permute.xlu0 %1842  ;;  %v1845_v22 = vpop.permute.xlu1 %1844 }
0x1360   : > { %v1846_v25 = vsel %vm717_vm3, %v1843_v20, %v1845_v22 }
0x1361   : > { %5823 = vmatmul.mubr.msk.f32.vlgmr.msra.gmra.mrb[6].mxu1 %vm518_vm4, %v1846_v25 }
0x1362   : > { %5833 = vmatpush1.msk.msra.mxu1 %vm442_vm0, %v6920_v0  ;;  %2209 = vmatprep.mubr.f32.mxu1 %v6819_v4 }
0x1363   : > { %6086 = vmatprep.subr.bf16.mxu1 %v6933_v5 }
0x1434   : > { %v1915_v27 = vpop.f32.mrb[6].mxu1 }
0x1435   : > { %v1917_v28 = vpop.f32.mrb[7].mxu1  ;;  %v6346_v33 = vadd.f32 %v1915_v27, %v7033_v32 }
0x1436   : > { %v6347_v29 = vadd.f32 %v1917_v28, %v7026_v26 }
0x1437   : > { %v5824_v34 = vmul.f32 -1.442695, %v6346_v33 }
0x1438   : > { %6517 = vtanh.f32 %v6347_v29  ;;  %v5825_v46 = vmul.f32 -1.442695, %v6347_v29  ;;  %v7248_v29 = vld [vmem:[%s7896_s1] sm:$0xff] }
0x1439   : > { %6519 = vpow2.f32 %v5824_v34 }
0x1442   : > { %v6518_v30 = vpop.eup %6517 }
0x1443   : > { %1937 = vrot.lane.b32.xlu0 %v6518_v30, %s6820_s16  ;;  %v6520_v35 = vpop.eup %6519 }
0x1444   : > { %v1928_v36 = vadd.f32 1.0, %v6520_v35 }
0x1446   : > { %6521 = vrcp.f32 %v1928_v36 }
0x1450   : > { %v6522_v37 = vpop.eup %6521 }
0x1451   : > { %v1935_v40 = vmul.f32 %v6522_v37, %v1757_v2 }
0x14b5   : > { %v1938_v38 = vpop.permute.xlu0 %1937 }
0x14b6   : > { %v1940_v39 = vmul.f32 %v6522_v37, %v1938_v38 }
0x14b8   : > { %1942 = vrot.lane.b32.xlu1 %v1940_v39, %s6821_s19 }
0x14bc   : > { %1953 = vrot.lane.b32.xlu1 %v6983_v16, %s6823_s21  ;;  %s6835_s21 = smov 72  }
0x152a   : > { %v1943_v41 = vpop.permute.xlu1 %1942 }
0x152b   : > { %v1945_v42 = vadd.f32 %v1943_v41, %v1935_v40 }
0x152d   : > { %6523 = vtanh.f32 %v1945_v42 }
0x152e   : > { %v1954_v43 = vpop.permute.xlu1 %1953  ;;  %6525 = vpow2.f32 %v5825_v46 }
0x152f   : > { %5828 = vmatmul.mubr.msk.f32.vlgmr.msra.gmra.mrb[10].mxu0 %vm438_vm1, %v1954_v43  ;;  %v7259_v43 = vld [vmem:[%s6973_s23] sm:$0xff]  ;;  %s6832_s23 = smov 84  }
0x1530   : > { %6076 = vmatpush1.bf16.msra.mxu0 %v6947_v9  ;;  %2101 = vmatprep.mubr.f32.mxu0 %v6819_v4 }
0x1531   : > { %6078 = vmatprep.subr.bf16.mxu0 %v6954_v11 }
0x1534   : > { %6080 = vmatpush1.bf16.msra.mxu0 %v6987_v17 }
0x1535   : > { %6082 = vmatprep.subr.bf16.mxu0 %v6990_v18 }
0x1537   : > { %v6524_v44 = vpop.eup %6523 }
0x1538   : > { %1948 = vrot.lane.b32.xlu0 %v6524_v44, %s6821_s19  ;;  %6084 = vmatpush1.bf16.msra.mxu0 %v7002_v21  ;;  %v6526_v47 = vpop.eup %6525 }
0x1539   : > { %5838 = vmatprep.subr.msk.mxu0 %vm442_vm0, %v6930_v3  ;;  %v1929_v48 = vadd.f32 1.0, %v6526_v47 }
0x153b   : > { %6527 = vrcp.f32 %v1929_v48 }
0x1545   : > { %v6528_v49 = vpop.eup %6527 }
0x15aa   : > { %v1949_v50 = vpop.permute.xlu0 %1948 }
0x15ab   : > { %v1951_v51 = vmul.f32 %v6522_v37, %v1949_v50  ;;  %v1952_v52 = vmul.f32 %v6528_v49, %v1949_v50 }
0x15ad   : > { %2030 = vrot.lane.b32.xlu0 %v1951_v51, %s6824_s22  ;;  %2032 = vrot.lane.b32.xlu1 %v1952_v52, %s6824_s22 }
0x161f   : > { %v2031_v53 = vpop.permute.xlu0 %2030  ;;  %v2033_v54 = vpop.permute.xlu1 %2032 }
0x1620   : > { %v2034_v55 = vsel %vm717_vm3, %v2031_v53, %v2033_v54 }
0x1621   : > { %5829 = vmatmul.mubr.msk.f32.vlgmr.msra.gmra.mrb[10].mxu0 %vm518_vm4, %v2034_v55 }
0x1622   : > { %5839 = vmatpush1.msk.msra.mxu0 %vm442_vm0, %v6920_v0  ;;  %2397 = vmatprep.mubr.f32.mxu0 %v6819_v4 }
0x1623   : > { %6098 = vmatprep.subr.bf16.mxu0 %v6933_v5 }
0x16f4   : > { %v2103_v56 = vpop.f32.mrb[10].mxu0 }
0x16f5   : > { %v2105_v57 = vpop.f32.mrb[11].mxu0  ;;  %v6348_v60 = vadd.f32 %v2103_v56, %v7033_v32 }
0x16f6   : > { %v6349_v58 = vadd.f32 %v2105_v57, %v7026_v26 }
0x16f7   : > { %v5830_v61 = vmul.f32 -1.442695, %v6348_v60 }
0x16f8   : > { %6529 = vtanh.f32 %v6349_v58 }
0x16f9   : > { %6531 = vpow2.f32 %v5830_v61 }
0x1702   : > { %v6530_v59 = vpop.eup %6529 }
0x1703   : > { %2125 = vrot.lane.b32.xlu0 %v6530_v59, %s6820_s16  ;;  %v6532_v62 = vpop.eup %6531 }
0x1704   : > { %v2116_v63 = vadd.f32 1.0, %v6532_v62 }
0x1706   : > { %6533 = vrcp.f32 %v2116_v63 }
0x1710   : > { %v6534_v0 = vpop.eup %6533 }
0x1711   : > { %v2123_v6 = vmul.f32 %v6534_v0, %v1945_v42 }
0x1775   : > { %v2126_v1 = vpop.permute.xlu0 %2125 }
0x1776   : > { %v2128_v2 = vmul.f32 %v6534_v0, %v2126_v1 }
0x1778   : > { %2130 = vrot.lane.b32.xlu1 %v2128_v2, %s6821_s19 }
0x177c   : > { %2141 = vrot.lane.b32.xlu1 %v6983_v16, %s6830_s29  ;;  %v5831_v16 = vmul.f32 -1.442695, %v6349_v58  ;;  %s6844_s29 = smov 60  }
0x17ea   : > { %v2131_v7 = vpop.permute.xlu1 %2130 }
0x17eb   : > { %v2133_v8 = vadd.f32 %v2131_v7, %v2123_v6 }
0x17ed   : > { %6535 = vtanh.f32 %v2133_v8 }
0x17ee   : > { %v2142_v10 = vpop.permute.xlu1 %2141  ;;  %6537 = vpow2.f32 %v5831_v16 }
0x17ef   : > { %5834 = vmatmul.mubr.msk.f32.vlgmr.msra.gmra.mrb[8].mxu1 %vm438_vm1, %v2142_v10 }
0x17f0   : > { %6088 = vmatpush1.bf16.msra.mxu1 %v6947_v9  ;;  %2289 = vmatprep.mubr.f32.mxu1 %v6819_v4 }
0x17f1   : > { %6090 = vmatprep.subr.bf16.mxu1 %v6954_v11 }
0x17f4   : > { %6092 = vmatpush1.bf16.msra.mxu1 %v6987_v17 }
0x17f5   : > { %6094 = vmatprep.subr.bf16.mxu1 %v6990_v18 }
0x17f7   : > { %v6536_v12 = vpop.eup %6535 }
0x17f8   : > { %2136 = vrot.lane.b32.xlu0 %v6536_v12, %s6821_s19  ;;  %6096 = vmatpush1.bf16.msra.mxu1 %v7002_v21  ;;  %v6538_v13 = vpop.eup %6537 }
0x17f9   : > { %5844 = vmatprep.subr.msk.mxu1 %vm442_vm0, %v6930_v3  ;;  %v2117_v14 = vadd.f32 1.0, %v6538_v13 }
0x17fb   : > { %6539 = vrcp.f32 %v2117_v14 }
0x1805   : > { %v6540_v15 = vpop.eup %6539 }
0x186a   : > { %v2137_v19 = vpop.permute.xlu0 %2136 }
0x186b   : > { %v2139_v20 = vmul.f32 %v6534_v0, %v2137_v19  ;;  %v2140_v22 = vmul.f32 %v6540_v15, %v2137_v19 }
0x186d   : > { %2218 = vrot.lane.b32.xlu0 %v2139_v20, %s6824_s22  ;;  %2220 = vrot.lane.b32.xlu1 %v2140_v22, %s6824_s22 }
0x18df   : > { %v2219_v25 = vpop.permute.xlu0 %2218  ;;  %v2221_v27 = vpop.permute.xlu1 %2220 }
0x18e0   : > { %v2222_v28 = vsel %vm717_vm3, %v2219_v25, %v2221_v27 }
0x18e1   : > { %5835 = vmatmul.mubr.msk.f32.vlgmr.msra.gmra.mrb[8].mxu1 %vm518_vm4, %v2222_v28 }
0x18e2   : > { %5845 = vmatpush1.msk.msra.mxu1 %vm442_vm0, %v7248_v29  ;;  %2585 = vmatprep.mubr.f32.mxu1 %v6819_v4 }
0x18e3   : > { %6110 = vmatprep.subr.bf16.mxu1 %v6933_v5 }
0x19b4   : > { %v2291_v30 = vpop.f32.mrb[8].mxu1 }
0x19b5   : > { %v2293_v33 = vpop.f32.mrb[9].mxu1  ;;  %v6350_v36 = vadd.f32 %v2291_v30, %v7033_v32 }
0x19b6   : > { %v6351_v34 = vadd.f32 %v2293_v33, %v7026_v26 }
0x19b7   : > { %v5836_v37 = vmul.f32 -1.442695, %v6350_v36 }
0x19b8   : > { %6541 = vtanh.f32 %v6351_v34  ;;  %v5837_v50 = vmul.f32 -1.442695, %v6351_v34 }
0x19b9   : > { %6543 = vpow2.f32 %v5836_v37 }
0x19c2   : > { %v6542_v35 = vpop.eup %6541 }
0x19c3   : > { %2313 = vrot.lane.b32.xlu0 %v6542_v35, %s6820_s16  ;;  %v6544_v38 = vpop.eup %6543 }
0x19c4   : > { %v2304_v39 = vadd.f32 1.0, %v6544_v38 }
0x19c6   : > { %6545 = vrcp.f32 %v2304_v39 }
0x19d0   : > { %v6546_v40 = vpop.eup %6545 }
0x19d1   : > { %v2311_v44 = vmul.f32 %v6546_v40, %v2133_v8 }
0x1a35   : > { %v2314_v41 = vpop.permute.xlu0 %2313 }
0x1a36   : > { %v2316_v42 = vmul.f32 %v6546_v40, %v2314_v41 }
0x1a38   : > { %2318 = vrot.lane.b32.xlu1 %v2316_v42, %s6821_s19 }
0x1a3c   : > { %2329 = vrot.lane.b32.xlu1 %v7259_v43, %s6831_s13  ;;  %s6841_s13 = smov 56  }
0x1aaa   : > { %v2319_v46 = vpop.permute.xlu1 %2318 }
0x1aab   : > { %v2321_v47 = vadd.f32 %v2319_v46, %v2311_v44 }
0x1aad   : > { %6547 = vtanh.f32 %v2321_v47 }
0x1aae   : > { %v2330_v48 = vpop.permute.xlu1 %2329  ;;  %6549 = vpow2.f32 %v5837_v50 }
0x1aaf   : > { %5840 = vmatmul.mubr.msk.f32.vlgmr.msra.gmra.mrb[12].mxu0 %vm438_vm1, %v2330_v48 }
0x1ab0   : > { %6100 = vmatpush1.bf16.msra.mxu0 %v6947_v9  ;;  %2477 = vmatprep.mubr.f32.mxu0 %v6819_v4 }
0x1ab1   : > { %6102 = vmatprep.subr.bf16.mxu0 %v6954_v11 }
0x1ab4   : > { %6104 = vmatpush1.bf16.msra.mxu0 %v6987_v17 }
0x1ab5   : > { %6106 = vmatprep.subr.bf16.mxu0 %v6990_v18 }
0x1ab7   : > { %v6548_v49 = vpop.eup %6547 }
0x1ab8   : > { %2324 = vrot.lane.b32.xlu0 %v6548_v49, %s6821_s19  ;;  %6108 = vmatpush1.bf16.msra.mxu0 %v7002_v21  ;;  %v6550_v51 = vpop.eup %6549 }
0x1ab9   : > { %5850 = vmatprep.subr.msk.mxu0 %vm442_vm0, %v6930_v3  ;;  %v2305_v52 = vadd.f32 1.0, %v6550_v51 }
0x1abb   : > { %6551 = vrcp.f32 %v2305_v52 }
0x1ac5   : > { %v6552_v53 = vpop.eup %6551 }
0x1b2a   : > { %v2325_v54 = vpop.permute.xlu0 %2324 }
0x1b2b   : > { %v2327_v55 = vmul.f32 %v6546_v40, %v2325_v54  ;;  %v2328_v56 = vmul.f32 %v6552_v53, %v2325_v54 }
0x1b2d   : > { %2406 = vrot.lane.b32.xlu0 %v2327_v55, %s6824_s22  ;;  %2408 = vrot.lane.b32.xlu1 %v2328_v56, %s6824_s22 }
0x1b9f   : > { %v2407_v57 = vpop.permute.xlu0 %2406  ;;  %v2409_v58 = vpop.permute.xlu1 %2408 }
0x1ba0   : > { %v2410_v59 = vsel %vm717_vm3, %v2407_v57, %v2409_v58 }
0x1ba1   : > { %5841 = vmatmul.mubr.msk.f32.vlgmr.msra.gmra.mrb[12].mxu0 %vm518_vm4, %v2410_v59 }
0x1ba2   : > { %5851 = vmatpush1.msk.msra.mxu0 %vm442_vm0, %v7248_v29  ;;  %2773 = vmatprep.mubr.f32.mxu0 %v6819_v4 }
0x1ba3   : > { %6122 = vmatprep.subr.bf16.mxu0 %v6933_v5 }
0x1c74   : > { %v2479_v60 = vpop.f32.mrb[12].mxu0 }
0x1c75   : > { %v2481_v61 = vpop.f32.mrb[13].mxu0  ;;  %v6352_v0 = vadd.f32 %v2479_v60, %v7033_v32 }
0x1c76   : > { %v6353_v62 = vadd.f32 %v2481_v61, %v7026_v26 }
0x1c77   : > { %v5842_v1 = vmul.f32 -1.442695, %v6352_v0 }
0x1c78   : > { %6553 = vtanh.f32 %v6353_v62  ;;  %v5843_v19 = vmul.f32 -1.442695, %v6353_v62 }
0x1c79   : > { %6555 = vpow2.f32 %v5842_v1 }
0x1c82   : > { %v6554_v63 = vpop.eup %6553 }
0x1c83   : > { %2501 = vrot.lane.b32.xlu0 %v6554_v63, %s6820_s16  ;;  %v6556_v2 = vpop.eup %6555 }
0x1c84   : > { %v2492_v6 = vadd.f32 1.0, %v6556_v2 }
0x1c86   : > { %6557 = vrcp.f32 %v2492_v6 }
0x1c90   : > { %v6558_v7 = vpop.eup %6557 }
0x1c91   : > { %v2499_v12 = vmul.f32 %v6558_v7, %v2321_v47 }
0x1cf5   : > { %v2502_v8 = vpop.permute.xlu0 %2501 }
0x1cf6   : > { %v2504_v10 = vmul.f32 %v6558_v7, %v2502_v8 }
0x1cf8   : > { %2506 = vrot.lane.b32.xlu1 %v2504_v10, %s6821_s19 }
0x1cfc   : > { %2517 = vrot.lane.b32.xlu1 %v7259_v43, %s6832_s23 }
0x1d6a   : > { %v2507_v16 = vpop.permute.xlu1 %2506 }
0x1d6b   : > { %v2509_v13 = vadd.f32 %v2507_v16, %v2499_v12 }
0x1d6d   : > { %6559 = vtanh.f32 %v2509_v13 }
0x1d6e   : > { %v2518_v14 = vpop.permute.xlu1 %2517  ;;  %6561 = vpow2.f32 %v5843_v19 }
0x1d6f   : > { %5846 = vmatmul.mubr.msk.f32.vlgmr.msra.gmra.mrb[10].mxu1 %vm438_vm1, %v2518_v14 }
0x1d70   : > { %6112 = vmatpush1.bf16.msra.mxu1 %v6947_v9  ;;  %2665 = vmatprep.mubr.f32.mxu1 %v6819_v4 }
0x1d71   : > { %6114 = vmatprep.subr.bf16.mxu1 %v6954_v11 }
0x1d74   : > { %6116 = vmatpush1.bf16.msra.mxu1 %v6987_v17 }
0x1d75   : > { %6118 = vmatprep.subr.bf16.mxu1 %v6990_v18 }
0x1d77   : > { %v6560_v15 = vpop.eup %6559 }
0x1d78   : > { %2512 = vrot.lane.b32.xlu0 %v6560_v15, %s6821_s19  ;;  %6120 = vmatpush1.bf16.msra.mxu1 %v7002_v21  ;;  %v6562_v20 = vpop.eup %6561 }
0x1d79   : > { %5856 = vmatprep.subr.msk.mxu1 %vm442_vm0, %v6930_v3  ;;  %v2493_v22 = vadd.f32 1.0, %v6562_v20 }
0x1d7b   : > { %6563 = vrcp.f32 %v2493_v22 }
0x1d85   : > { %v6564_v25 = vpop.eup %6563 }
0x1dea   : > { %v2513_v27 = vpop.permute.xlu0 %2512 }
0x1deb   : > { %v2515_v28 = vmul.f32 %v6558_v7, %v2513_v27  ;;  %v2516_v30 = vmul.f32 %v6564_v25, %v2513_v27 }
0x1ded   : > { %2594 = vrot.lane.b32.xlu0 %v2515_v28, %s6824_s22  ;;  %2596 = vrot.lane.b32.xlu1 %v2516_v30, %s6824_s22 }
0x1e5f   : > { %v2595_v33 = vpop.permute.xlu0 %2594  ;;  %v2597_v34 = vpop.permute.xlu1 %2596 }
0x1e60   : > { %v2598_v35 = vsel %vm717_vm3, %v2595_v33, %v2597_v34 }
0x1e61   : > { %5847 = vmatmul.mubr.msk.f32.vlgmr.msra.gmra.mrb[10].mxu1 %vm518_vm4, %v2598_v35 }
0x1e62   : > { %5857 = vmatpush1.msk.msra.mxu1 %vm442_vm0, %v7248_v29  ;;  %2961 = vmatprep.mubr.f32.mxu1 %v6819_v4 }
0x1e63   : > { %6134 = vmatprep.subr.bf16.mxu1 %v6933_v5 }
0x1f34   : > { %v2667_v36 = vpop.f32.mrb[10].mxu1 }
0x1f35   : > { %v2669_v37 = vpop.f32.mrb[11].mxu1  ;;  %v6354_v40 = vadd.f32 %v2667_v36, %v7033_v32 }
0x1f36   : > { %v6355_v38 = vadd.f32 %v2669_v37, %v7026_v26 }
0x1f37   : > { %v5848_v41 = vmul.f32 -1.442695, %v6354_v40 }
0x1f38   : > { %6565 = vtanh.f32 %v6355_v38  ;;  %v5849_v54 = vmul.f32 -1.442695, %v6355_v38 }
0x1f39   : > { %6567 = vpow2.f32 %v5848_v41 }
0x1f42   : > { %v6566_v39 = vpop.eup %6565 }
0x1f43   : > { %2689 = vrot.lane.b32.xlu0 %v6566_v39, %s6820_s16  ;;  %v6568_v42 = vpop.eup %6567 }
0x1f44   : > { %v2680_v44 = vadd.f32 1.0, %v6568_v42 }
0x1f46   : > { %6569 = vrcp.f32 %v2680_v44 }
0x1f50   : > { %v6570_v46 = vpop.eup %6569 }
0x1f51   : > { %v2687_v49 = vmul.f32 %v6570_v46, %v2509_v13 }
0x1fb5   : > { %v2690_v47 = vpop.permute.xlu0 %2689 }
0x1fb6   : > { %v2692_v48 = vmul.f32 %v6570_v46, %v2690_v47 }
0x1fb8   : > { %2694 = vrot.lane.b32.xlu1 %v2692_v48, %s6821_s19 }
0x1fbc   : > { %2705 = vrot.lane.b32.xlu1 %v7259_v43, %s6833_s15 }
0x202a   : > { %v2695_v50 = vpop.permute.xlu1 %2694 }
0x202b   : > { %v2697_v51 = vadd.f32 %v2695_v50, %v2687_v49 }
0x202d   : > { %6571 = vtanh.f32 %v2697_v51 }
0x202e   : > { %v2706_v52 = vpop.permute.xlu1 %2705  ;;  %6573 = vpow2.f32 %v5849_v54 }
0x202f   : > { %5852 = vmatmul.mubr.msk.f32.vlgmr.msra.gmra.mrb[14].mxu0 %vm438_vm1, %v2706_v52 }
0x2030   : > { %6124 = vmatpush1.bf16.msra.mxu0 %v6947_v9  ;;  %2853 = vmatprep.mubr.f32.mxu0 %v6819_v4 }
0x2031   : > { %6126 = vmatprep.subr.bf16.mxu0 %v6954_v11 }
0x2034   : > { %6128 = vmatpush1.bf16.msra.mxu0 %v6987_v17 }
0x2035   : > { %6130 = vmatprep.subr.bf16.mxu0 %v6990_v18 }
0x2037   : > { %v6572_v53 = vpop.eup %6571 }
0x2038   : > { %2700 = vrot.lane.b32.xlu0 %v6572_v53, %s6821_s19  ;;  %6132 = vmatpush1.bf16.msra.mxu0 %v7002_v21  ;;  %v6574_v55 = vpop.eup %6573 }
0x2039   : > { %5862 = vmatprep.subr.msk.mxu0 %vm442_vm0, %v6930_v3  ;;  %v2681_v56 = vadd.f32 1.0, %v6574_v55 }
0x203b   : > { %6575 = vrcp.f32 %v2681_v56 }
0x2045   : > { %v6576_v57 = vpop.eup %6575 }
0x20aa   : > { %v2701_v58 = vpop.permute.xlu0 %2700 }
0x20ab   : > { %v2703_v59 = vmul.f32 %v6570_v46, %v2701_v58  ;;  %v2704_v60 = vmul.f32 %v6576_v57, %v2701_v58 }
0x20ad   : > { %2782 = vrot.lane.b32.xlu0 %v2703_v59, %s6824_s22  ;;  %2784 = vrot.lane.b32.xlu1 %v2704_v60, %s6824_s22 }
0x211f   : > { %v2783_v61 = vpop.permute.xlu0 %2782  ;;  %v2785_v62 = vpop.permute.xlu1 %2784 }
0x2120   : > { %v2786_v63 = vsel %vm717_vm3, %v2783_v61, %v2785_v62 }
0x2121   : > { %5853 = vmatmul.mubr.msk.f32.vlgmr.msra.gmra.mrb[14].mxu0 %vm518_vm4, %v2786_v63 }
0x2122   : > { %5863 = vmatpush1.msk.msra.mxu0 %vm442_vm0, %v7248_v29  ;;  %3149 = vmatprep.mubr.f32.mxu0 %v6819_v4 }
0x2123   : > { %6146 = vmatprep.subr.bf16.mxu0 %v6933_v5 }
0x21f4   : > { %v2855_v0 = vpop.f32.mrb[14].mxu0 }
0x21f5   : > { %v2857_v1 = vpop.f32.mrb[15].mxu0  ;;  %v6356_v7 = vadd.f32 %v2855_v0, %v7033_v32 }
0x21f6   : > { %v6357_v2 = vadd.f32 %v2857_v1, %v7026_v26 }
0x21f7   : > { %v5854_v8 = vmul.f32 -1.442695, %v6356_v7 }
0x21f8   : > { %6577 = vtanh.f32 %v6357_v2  ;;  %v5855_v27 = vmul.f32 -1.442695, %v6357_v2 }
0x21f9   : > { %6579 = vpow2.f32 %v5854_v8 }
0x2202   : > { %v6578_v6 = vpop.eup %6577 }
0x2203   : > { %2877 = vrot.lane.b32.xlu0 %v6578_v6, %s6820_s16  ;;  %v6580_v10 = vpop.eup %6579 }
0x2204   : > { %v2868_v12 = vadd.f32 1.0, %v6580_v10 }
0x2206   : > { %6581 = vrcp.f32 %v2868_v12 }
0x2210   : > { %v6582_v16 = vpop.eup %6581 }
0x2211   : > { %v2875_v15 = vmul.f32 %v6582_v16, %v2697_v51 }
0x2275   : > { %v2878_v13 = vpop.permute.xlu0 %2877 }
0x2276   : > { %v2880_v14 = vmul.f32 %v6582_v16, %v2878_v13 }
0x2278   : > { %2882 = vrot.lane.b32.xlu1 %v2880_v14, %s6821_s19 }
0x227c   : > { %2893 = vrot.lane.b32.xlu1 %v7259_v43, %s6834_s20 }
0x22ea   : > { %v2883_v19 = vpop.permute.xlu1 %2882 }
0x22eb   : > { %v2885_v20 = vadd.f32 %v2883_v19, %v2875_v15 }
0x22ed   : > { %6583 = vtanh.f32 %v2885_v20 }
0x22ee   : > { %v2894_v22 = vpop.permute.xlu1 %2893  ;;  %6585 = vpow2.f32 %v5855_v27 }
0x22ef   : > { %5858 = vmatmul.mubr.msk.f32.vlgmr.msra.gmra.mrb[12].mxu1 %vm438_vm1, %v2894_v22 }
0x22f0   : > { %6136 = vmatpush1.bf16.msra.mxu1 %v6947_v9  ;;  %3041 = vmatprep.mubr.f32.mxu1 %v6819_v4 }
0x22f1   : > { %6138 = vmatprep.subr.bf16.mxu1 %v6954_v11 }
0x22f4   : > { %6140 = vmatpush1.bf16.msra.mxu1 %v6987_v17 }
0x22f5   : > { %6142 = vmatprep.subr.bf16.mxu1 %v6990_v18 }
0x22f7   : > { %v6584_v25 = vpop.eup %6583 }
0x22f8   : > { %2888 = vrot.lane.b32.xlu0 %v6584_v25, %s6821_s19  ;;  %6144 = vmatpush1.bf16.msra.mxu1 %v7002_v21  ;;  %v6586_v28 = vpop.eup %6585 }
0x22f9   : > { %5868 = vmatprep.subr.msk.mxu1 %vm442_vm0, %v6930_v3  ;;  %v2869_v30 = vadd.f32 1.0, %v6586_v28 }
0x22fb   : > { %6587 = vrcp.f32 %v2869_v30 }
0x2305   : > { %v6588_v33 = vpop.eup %6587 }
0x236a   : > { %v2889_v34 = vpop.permute.xlu0 %2888 }
0x236b   : > { %v2891_v35 = vmul.f32 %v6582_v16, %v2889_v34  ;;  %v2892_v36 = vmul.f32 %v6588_v33, %v2889_v34 }
0x236d   : > { %2970 = vrot.lane.b32.xlu0 %v2891_v35, %s6824_s22  ;;  %2972 = vrot.lane.b32.xlu1 %v2892_v36, %s6824_s22 }
0x23df   : > { %v2971_v37 = vpop.permute.xlu0 %2970  ;;  %v2973_v38 = vpop.permute.xlu1 %2972 }
0x23e0   : > { %v2974_v39 = vsel %vm717_vm3, %v2971_v37, %v2973_v38 }
0x23e1   : > { %5859 = vmatmul.mubr.msk.f32.vlgmr.msra.gmra.mrb[12].mxu1 %vm518_vm4, %v2974_v39 }
0x23e2   : > { %5869 = vmatpush1.msk.msra.mxu1 %vm442_vm0, %v7248_v29  ;;  %3337 = vmatprep.mubr.f32.mxu1 %v6819_v4 }
0x23e3   : > { %6158 = vmatprep.subr.bf16.mxu1 %v6933_v5 }
0x24b4   : > { %v3043_v3 = vpop.f32.mrb[12].mxu1 }
0x24b5   : > { %v3045_v40 = vpop.f32.mrb[13].mxu1  ;;  %v6358_v44 = vadd.f32 %v3043_v3, %v7033_v32 }
0x24b6   : > { %v6359_v41 = vadd.f32 %v3045_v40, %v7026_v26 }
0x24b7   : > { %v5860_v46 = vmul.f32 -1.442695, %v6358_v44 }
0x24b8   : > { %6589 = vtanh.f32 %v6359_v41  ;;  %v5861_v56 = vmul.f32 -1.442695, %v6359_v41 }
0x24b9   : > { %6591 = vpow2.f32 %v5860_v46 }
0x24c2   : > { %v6590_v42 = vpop.eup %6589 }
0x24c3   : > { %3065 = vrot.lane.b32.xlu0 %v6590_v42, %s6820_s16  ;;  %v6592_v47 = vpop.eup %6591 }
0x24c4   : > { %v3056_v48 = vadd.f32 1.0, %v6592_v47 }
0x24c6   : > { %6593 = vrcp.f32 %v3056_v48 }
0x24d0   : > { %v6594_v29 = vpop.eup %6593 }
0x24d1   : > { %v3063_v51 = vmul.f32 %v6594_v29, %v2885_v20 }
0x2535   : > { %v3066_v49 = vpop.permute.xlu0 %3065 }
0x2536   : > { %v3068_v50 = vmul.f32 %v6594_v29, %v3066_v49 }
0x2538   : > { %3070 = vrot.lane.b32.xlu1 %v3068_v50, %s6821_s19 }
0x253c   : > { %3081 = vrot.lane.b32.xlu1 %v7259_v43, %s6835_s21 }
0x25aa   : > { %v3071_v52 = vpop.permute.xlu1 %3070 }
0x25ab   : > { %v3073_v53 = vadd.f32 %v3071_v52, %v3063_v51 }
0x25ad   : > { %6595 = vtanh.f32 %v3073_v53 }
0x25ae   : > { %v3082_v54 = vpop.permute.xlu1 %3081  ;;  %6597 = vpow2.f32 %v5861_v56 }
0x25af   : > { %5864 = vmatmul.mubr.msk.f32.vlgmr.msra.gmra.mrb[16].mxu0 %vm438_vm1, %v3082_v54 }
0x25b0   : > { %6148 = vmatpush1.bf16.msra.mxu0 %v6947_v9  ;;  %3229 = vmatprep.mubr.f32.mxu0 %v6819_v4 }
0x25b1   : > { %6150 = vmatprep.subr.bf16.mxu0 %v6954_v11 }
0x25b4   : > { %6152 = vmatpush1.bf16.msra.mxu0 %v6987_v17 }
0x25b5   : > { %6154 = vmatprep.subr.bf16.mxu0 %v6990_v18 }
0x25b7   : > { %v6596_v55 = vpop.eup %6595 }
0x25b8   : > { %3076 = vrot.lane.b32.xlu0 %v6596_v55, %s6821_s19  ;;  %6156 = vmatpush1.bf16.msra.mxu0 %v7002_v21  ;;  %v6598_v57 = vpop.eup %6597 }
0x25b9   : > { %6170 = vmatprep.subr.bf16.mxu0 %v6933_v5  ;;  %v3057_v58 = vadd.f32 1.0, %v6598_v57 }
0x25bb   : > { %6599 = vrcp.f32 %v3057_v58 }
0x25c5   : > { %v6600_v59 = vpop.eup %6599 }
0x262a   : > { %v3077_v60 = vpop.permute.xlu0 %3076 }
0x262b   : > { %v3079_v61 = vmul.f32 %v6594_v29, %v3077_v60  ;;  %v3080_v62 = vmul.f32 %v6600_v59, %v3077_v60 }
0x262d   : > { %3158 = vrot.lane.b32.xlu0 %v3079_v61, %s6824_s22  ;;  %3160 = vrot.lane.b32.xlu1 %v3080_v62, %s6824_s22 }
0x269f   : > { %v3159_v63 = vpop.permute.xlu0 %3158  ;;  %v3161_v0 = vpop.permute.xlu1 %3160 }
0x26a0   : > { %v3162_v1 = vsel %vm717_vm3, %v3159_v63, %v3161_v0 }
0x26a1   : > { %5865 = vmatmul.mubr.msk.f32.vlgmr.msra.gmra.mrb[16].mxu0 %vm518_vm4, %v3162_v1 }
0x26a2   : > { %6172 = vmatpush1.bf16.msra.mxu0 %v6947_v9  ;;  %3530 = vmatprep.mubr.f32.mxu0 %v6819_v4 }
0x26a3   : > { %6174 = vmatprep.subr.bf16.mxu0 %v6954_v11 }
0x26a6   : > { %6176 = vmatpush1.bf16.msra.mxu0 %v6987_v17 }
0x26a7   : > { %6178 = vmatprep.subr.bf16.mxu0 %v6990_v18 }
0x26aa   : > { %6180 = vmatpush1.bf16.msra.mxu0 %v7002_v21 }
0x2774   : > { %v3231_v5 = vpop.f32.mrb[16].mxu0 }
0x2775   : > { %v3233_v2 = vpop.f32.mrb[17].mxu0  ;;  %v6360_v8 = vadd.f32 %v3231_v5, %v7033_v32 }
0x2776   : > { %v6361_v6 = vadd.f32 %v3233_v2, %v7026_v26 }
0x2777   : > { %v5866_v10 = vmul.f32 -1.442695, %v6360_v8 }
0x2778   : > { %6601 = vtanh.f32 %v6361_v6 }
0x2779   : > { %6603 = vpow2.f32 %v5866_v10  ;;  %v398_v10 = vld [vmem:[%s7899_s4 + $0x8] sm:$0xff] }
0x2782   : > { %v6602_v7 = vpop.eup %6601 }
0x2783   : > { %3253 = vrot.lane.b32.xlu0 %v6602_v7, %s6820_s16  ;;  %v6604_v12 = vpop.eup %6603 }
0x2784   : > { %v3244_v16 = vadd.f32 1.0, %v6604_v12  ;;  %v6837_v12 = vmov 0.0|0.0  }
0x2786   : > { %6605 = vrcp.f32 %v3244_v16 }
0x2790   : > { %v6606_v13 = vpop.eup %6605 }
0x2791   : > { %v3251_v19 = vmul.f32 %v6606_v13, %v3073_v53 }
0x27f5   : > { %v3254_v14 = vpop.permute.xlu0 %3253 }
0x27f6   : > { %v3256_v15 = vmul.f32 %v6606_v13, %v3254_v14 }
0x27f8   : > { %3258 = vrot.lane.b32.xlu1 %v3256_v15, %s6821_s19 }
0x27fc   : > { %3269 = vrot.lane.b32.xlu1 %v7259_v43, %s6836_s24  ;;  %v5867_v43 = vmul.f32 -1.442695, %v6361_v6 }
0x286a   : > { %v3259_v20 = vpop.permute.xlu1 %3258 }
0x286b   : > { %v3261_v22 = vadd.f32 %v3259_v20, %v3251_v19 }
0x286d   : > { %6607 = vtanh.f32 %v3261_v22 }
0x286e   : > { %v3270_v25 = vpop.permute.xlu1 %3269  ;;  %6609 = vpow2.f32 %v5867_v43 }
0x286f   : > { %5870 = vmatmul.mubr.msk.f32.vlgmr.msra.gmra.mrb[14].mxu1 %vm438_vm1, %v3270_v25  ;;  %v400_v25 = vld [vmem:[%s7901_s6] sm:$0xff] }
0x2870   : > { %6160 = vmatpush1.bf16.msra.mxu1 %v6947_v9  ;;  %3417 = vmatprep.mubr.f32.mxu1 %v6819_v4 }
0x2871   : > { %6162 = vmatprep.subr.bf16.mxu1 %v6954_v11 }
0x2874   : > { %6164 = vmatpush1.bf16.msra.mxu1 %v6987_v17 }
0x2875   : > { %6166 = vmatprep.subr.bf16.mxu1 %v6990_v18 }
0x2877   : > { %v6608_v27 = vpop.eup %6607 }
0x2878   : > { %3264 = vrot.lane.b32.xlu0 %v6608_v27, %s6821_s19  ;;  %6168 = vmatpush1.bf16.msra.mxu1 %v7002_v21  ;;  %v6610_v28 = vpop.eup %6609  ;;  %v401_v27 = vld [vmem:[%s7901_s6 + $0x8] sm:$0xff] }
0x2879   : > { %v3245_v30 = vadd.f32 1.0, %v6610_v28  ;;  %6181 = vmatprep.subr.bf16.mxu1 %v6837_v12 }
0x287b   : > { %6611 = vrcp.f32 %v3245_v30  ;;  %v6185_v30 = vpack.c.bf16 %v401_v27, %v400_v25 }
0x2885   : > { %v6612_v33 = vpop.eup %6611 }
0x28ea   : > { %v3265_v9 = vpop.permute.xlu0 %3264 }
0x28eb   : > { %v3267_v34 = vmul.f32 %v6606_v13, %v3265_v9  ;;  %v3268_v35 = vmul.f32 %v6612_v33, %v3265_v9  ;;  %v402_v9 = vld [vmem:[%s7901_s6 + $0x10] sm:$0xff] }
0x28ed   : > { %3346 = vrot.lane.b32.xlu0 %v3267_v34, %s6824_s22  ;;  %3348 = vrot.lane.b32.xlu1 %v3268_v35, %s6824_s22  ;;  %v403_v34 = vld [vmem:[%s7901_s6 + $0x18] sm:$0xff] }
0x28ee   : > { %v6188_v35 = vpack.c.bf16 %v403_v34, %v402_v9 }
0x295f   : > { %v3347_v11 = vpop.permute.xlu0 %3346  ;;  %v3349_v17 = vpop.permute.xlu1 %3348 }
0x2960   : > { %v3350_v18 = vsel %vm717_vm3, %v3347_v11, %v3349_v17  ;;  %v410_v11 = vld [vmem:[%s7904_s9 + $0x8] sm:$0xff]  ;;  %v412_v17 = vld [vmem:[%s7904_s9 + $0x18] sm:$0xff] }
0x2961   : > { %5871 = vmatmul.mubr.msk.f32.vlgmr.msra.gmra.mrb[14].mxu1 %vm518_vm4, %v3350_v18  ;;  %v7439_v18 = vpack.c.bf16 %v412_v17, %v410_v11 }
0x2962   : > { %5963 = vmatprep.mubr.msk.f32.mxu1 %vm6838_vm5, %v6819_v4 }
0x2a34   : > { %v3419_v21 = vpop.f32.mrb[14].mxu1 }
0x2a35   : > { %v3421_v36 = vpop.f32.mrb[15].mxu1  ;;  %v6362_v39 = vadd.f32 %v3419_v21, %v7033_v32  ;;  %v406_v21 = vld [vmem:[%s7903_s8 + $0x8] sm:$0xff] }
0x2a36   : > { %v6363_v37 = vadd.f32 %v3421_v36, %v7026_v26  ;;  %v408_v36 = vld [vmem:[%s7903_s8 + $0x18] sm:$0xff] }
0x2a37   : > { %v5872_v3 = vmul.f32 -1.442695, %v6362_v39  ;;  %v407_v39 = vld [vmem:[%s7903_s8 + $0x10] sm:$0xff] }
0x2a38   : > { %6613 = vtanh.f32 %v6363_v37  ;;  %v5873_v50 = vmul.f32 -1.442695, %v6363_v37  ;;  %v6190_v37 = vpack.c.bf16 %v408_v36, %v406_v21 }
0x2a39   : > { %6615 = vpow2.f32 %v5872_v3 }
0x2a3a   : > { %6191 = vmatprep.subr.bf16.mxu0 %v6190_v37 }
0x2a42   : > { %v6614_v38 = vpop.eup %6613 }
0x2a43   : > { %3441 = vrot.lane.b32.xlu0 %v6614_v38, %s6820_s16  ;;  %v6616_v40 = vpop.eup %6615  ;;  %v405_v38 = vld [vmem:[%s7903_s8] sm:$0xff] }
0x2a44   : > { %v3432_v41 = vadd.f32 1.0, %v6616_v40  ;;  %v6192_v3 = vpack.c.bf16 %v407_v39, %v405_v38  ;;  %v409_v40 = vld [vmem:[%s7904_s9] sm:$0xff] }
0x2a46   : > { %6617 = vrcp.f32 %v3432_v41  ;;  %v411_v41 = vld [vmem:[%s7904_s9 + $0x10] sm:$0xff] }
0x2a50   : > { %v6618_v42 = vpop.eup %6617 }
0x2a51   : > { %v3439_v47 = vmul.f32 %v6618_v42, %v3261_v22 }
0x2ab5   : > { %v3442_v44 = vpop.permute.xlu0 %3441 }
0x2ab6   : > { %v3444_v46 = vmul.f32 %v6618_v42, %v3442_v44  ;;  %v414_v44 = vld [vmem:[%s7904_s9 + $0x28] sm:$0xff] }
0x2ab8   : > { %3446 = vrot.lane.b32.xlu1 %v3444_v46, %s6821_s19  ;;  %v416_v46 = vld [vmem:[%s7904_s9 + $0x38] sm:$0xff] }
0x2b2a   : > { %v3447_v48 = vpop.permute.xlu1 %3446 }
0x2b2b   : > { %v3449_v29 = vadd.f32 %v3447_v48, %v3439_v47  ;;  %v7470_v48 = vpack.c.bf16 %v411_v41, %v409_v40 }
0x2b2d   : > { %6619 = vtanh.f32 %v3449_v29 }
0x2b2e   : > { %6621 = vpow2.f32 %v5873_v50  ;;  %v7472_v50 = vpack.c.bf16 %v416_v46, %v414_v44 }
0x2b37   : > { %v6620_v49 = vpop.eup %6619 }
0x2b38   : > { %3452 = vrot.lane.b32.xlu0 %v6620_v49, %s6821_s19  ;;  %v6622_v51 = vpop.eup %6621 }
0x2b39   : > { %v3433_v52 = vadd.f32 1.0, %v6622_v51  ;;  %v413_v51 = vld [vmem:[%s7904_s9 + $0x20] sm:$0xff] }
0x2b3b   : > { %6623 = vrcp.f32 %v3433_v52  ;;  %v415_v52 = vld [vmem:[%s7904_s9 + $0x30] sm:$0xff] }
0x2b45   : > { %v6624_v53 = vpop.eup %6623 }
0x2baa   : > { %v3453_v54 = vpop.permute.xlu0 %3452 }
0x2bab   : > { %v3455_v55 = vmul.f32 %v6618_v42, %v3453_v54  ;;  %v3456_v56 = vmul.f32 %v6624_v53, %v3453_v54  ;;  %v5877_v42 = vld [vmem:[%s7900_s5] ss:$0 sm:$0xff]  ;;  %v7482_v53 = vpack.c.bf16 %v415_v52, %v413_v51  ;;  %v7490_v54 = vld [vmem:[%s7904_s9 + $0x48] sm:$0xf] }
0x2bad   : > { %3459 = vrot.lane.b32.xlu1 %v3455_v55, %s6824_s22  ;;  %3461 = vrot.lane.b32.xlu0 %v3456_v56, %s6824_s22  ;;  %v7497_v55 = vld [vmem:[%s7904_s9 + $0x40] sm:$0xf] }
0x2bae   : > { %v5879_v56 = vld [vmem:[%s7902_s7] ss:$0 sm:$0xff] }
0x2c1f   : > { %v3460_v57 = vpop.permute.xlu1 %3459  ;;  %v3462_v58 = vpop.permute.xlu0 %3461 }
0x2c20   : > { %v3463_v59 = vsel %vm717_vm3, %v3460_v57, %v3462_v58 }
0x2c21   : > { %5874 = vmatmul.mubr.msk.f32.vlgmr.msra.gmra.mrb[18].mxu0 %vm518_vm4, %v3463_v59 }
0x2c22   : > { %3806 = vmatprep.mubr.f32.mxu0 %v6819_v4  ;;  %6193 = vmatpush1.bf16.msra.mxu0 %v6192_v3 }
0x2c23   : > { %6203 = vmatprep.subr.bf16.mxu0 %v7439_v18 }
0x2cf4   : > { %v3532_v60 = vpop.f32.mrb[18].mxu0 }
0x2cf5   : > { %v3534_v61 = vpop.f32.mrb[19].mxu0  ;;  %v3537_v0 = vadd.f32 %v3532_v60, %v7033_v32 }
0x2cf6   : > { %v3538_v62 = vadd.f32 %v3534_v61, %v7026_v26  ;;  %v397_v26 = vld [vmem:[%s7899_s4] sm:$0xff] }
0x2cf7   : > { %v5875_v1 = vmul.f32 -1.442695, %v3537_v0  ;;  %v6182_v32 = vpack.c.bf16 %v398_v10, %v397_v26 }
0x2cf8   : > { %6625 = vtanh.f32 %v3538_v62  ;;  %v5876_v19 = vmul.f32 -1.442695, %v3538_v62  ;;  %v419_v62 = vld [vmem:[%s7905_s10] sm:$0x3] }
0x2cf9   : > { %6627 = vpow2.f32 %v5875_v1  ;;  %6183 = vmatpush3.bf16.msra.mxu1 %v6182_v32  ;;  %v3736_v0 = vrot.slane %v419_v62, %v432_v24 }
0x2cfa   : > { %6184 = vmatprep.subr.bf16.mxu1 %v6837_v12 }
0x2d02   : > { %v6626_v63 = vpop.eup %6625 }
0x2d03   : > { %3554 = vrot.lane.b32.xlu1 %v6626_v63, %s6820_s16  ;;  %v6628_v5 = vpop.eup %6627  ;;  %v3732_v63 = vrot.slane %v419_v62, %v428_v31  ;;  %s6842_s16 = smov 24  }
0x2d04   : > { %v3545_v2 = vadd.f32 1.0, %v6628_v5 }
0x2d06   : > { %6629 = vrcp.f32 %v3545_v2 }
0x2d10   : > { %v6630_v6 = vpop.eup %6629 }
0x2d11   : > { %v3552_v16 = vmul.f32 %v6630_v6, %v3449_v29 }
0x2d75   : > { %v3555_v7 = vpop.permute.xlu1 %3554 }
0x2d76   : > { %v3557_v8 = vmul.f32 %v6630_v6, %v3555_v7 }
0x2d78   : > { %3559 = vrot.lane.b32.xlu0 %v3557_v8, %s6821_s19 }
0x2dea   : > { %v3560_v13 = vpop.permute.xlu0 %3559 }
0x2deb   : > { %v3562_v14 = vadd.f32 %v3560_v13, %v3552_v16 }
0x2ded   : > { %6631 = vtanh.f32 %v3562_v14 }
0x2dee   : > { %6633 = vpow2.f32 %v5876_v19 }
0x2df7   : > { %v6632_v15 = vpop.eup %6631 }
0x2df8   : > { %3565 = vrot.lane.b32.xlu1 %v6632_v15, %s6821_s19  ;;  %v6634_v20 = vpop.eup %6633 }
0x2df9   : > { %v3546_v22 = vadd.f32 1.0, %v6634_v20 }
0x2dfb   : > { %6635 = vrcp.f32 %v3546_v22 }
0x2e05   : > { %v6636_v43 = vpop.eup %6635 }
0x2e6a   : > { %v3566_v28 = vpop.permute.xlu1 %3565 }
0x2e6b   : > { %v3568_v33 = vmul.f32 %v6636_v43, %v3566_v28 }
0x2e6d   : > { %5964 = vmatmul.mubr.msk.f32.vlgmr.msra.gmra.mrb[16].mxu1 %vm3575_vm6, %v3568_v33 }
0x2e6e   : > { %6186 = vmatpush3.bf16.msra.mxu1 %v6185_v30  ;;  %5974 = vmatprep.mubr.msk.f32.mxu1 %vm6838_vm5, %v6819_v4 }
0x2e6f   : > { %6187 = vmatprep.subr.bf16.mxu1 %v6837_v12 }
0x2e72   : > { %6189 = vmatpush3.bf16.msra.mxu1 %v6188_v35 }
0x2e73   : > { %6195 = vmatprep.subr.bf16.mxu1 %v7439_v18 }
0x2f40   : > { %v3645_v47 = vpop.f32.mrb[16].mxu1 }
0x2f41   : > { %v3646_v29 = vadd.f32 %v5877_v42, %v3645_v47  ;;  %v5965_v49 = vpop.f32.mrb[17].mxu1 }
0x2f43   : > { %5975 = vmatmul.mubr.msk.f32.vlgmr.msra.gmra.mrb[18].mxu1 %vm717_vm3, %v3646_v29 }
0x2f44   : > { %6197 = vmatpush1.bf16.msra.mxu1 %v7470_v48  ;;  %3886 = vmatprep.mubr.f32.mxu1 %v6819_v4 }
0x2f45   : > { %6199 = vmatprep.subr.bf16.mxu1 %v7472_v50 }
0x2f48   : > { %6201 = vmatpush1.bf16.msra.mxu1 %v7482_v53 }
0x2f49   : > { %5882 = vmatprep.subr.msk.mxu1 %vm442_vm0, %v7490_v54 }
0x2f4c   : > { %5883 = vmatpush1.msk.msra.mxu1 %vm442_vm0, %v7497_v55 }
0x2f4d   : > { %3887 = vmatmul.mubr.f32.vlgmr.msra.gmra.mrb[20].mxu1 %v6819_v4  ;;  %6211 = vmatprep.subr.bf16.mxu1 %v7439_v18 }
0x2f4e   : > { %6213 = vmatpush1.bf16.msra.mxu1 %v7470_v48  ;;  %4109 = vmatprep.mubr.f32.mxu1 %v6819_v4 }
0x2f4f   : > { %6215 = vmatprep.subr.bf16.mxu1 %v7472_v50 }
0x2f52   : > { %6217 = vmatpush1.bf16.msra.mxu1 %v7482_v53 }
0x2f53   : > { %5889 = vmatprep.subr.msk.mxu1 %vm442_vm0, %v7490_v54 }
0x2f56   : > { %5890 = vmatpush1.msk.msra.mxu1 %vm442_vm0, %v7497_v55 }
0x2f57   : > { %6227 = vmatprep.subr.bf16.mxu1 %v7439_v18 }
0x3016   : > { %v3724_v57 = vpop.f32.mrb[18].mxu1 }
0x3017   : > { %v3725_v58 = vadd.f32 %v5879_v56, %v3724_v57  ;;  %v5976_v59 = vpop.f32.mrb[19].mxu1 }
0x3019   : > { %5881 = vmatmul.mubr.msk.f32.vlgmr.msra.gmra.mrb[20].mxu0 %vm3575_vm6, %v3725_v58 }
0x301a   : > { %6205 = vmatpush1.bf16.msra.mxu0 %v7470_v48  ;;  %4002 = vmatprep.mubr.f32.mxu0 %v6819_v4 }
0x301b   : > { %6207 = vmatprep.subr.bf16.mxu0 %v7472_v50 }
0x301e   : > { %6209 = vmatpush1.bf16.msra.mxu0 %v7482_v53 }
0x301f   : > { %5885 = vmatprep.subr.msk.mxu0 %vm442_vm0, %v7490_v54 }
0x3020   : > { %v3888_v60 = vpop.f32.mrb[20].mxu1 }
0x3021   : > { %v3890_v61 = vpop.f32.mrb[21].mxu1 }
0x3022   : > { %5886 = vmatpush1.msk.msra.mxu0 %vm442_vm0, %v7497_v55 }
0x3023   : > { %6219 = vmatprep.subr.bf16.mxu0 %v7439_v18 }
0x30ec   : > { %v3808_v1 = vpop.f32.mrb[20].mxu0 }
0x30ed   : > { %v7532_v5 = vadd.f32 %v3808_v1, %v3732_v63  ;;  %v3810_v2 = vpop.f32.mrb[21].mxu0 }
0x30ee   : > { %v7534_v6 = vadd.f32 %v3810_v2, %v3736_v0 }
0x30ef   : > { %v3893_v7 = vadd.f32 %v3888_v60, %v7532_v5 }
0x30f0   : > { %v3894_v8 = vadd.f32 %v3890_v61, %v7534_v6 }
0x30f1   : > { %6637 = vtanh.f32 %v3893_v7  ;;  %v5884_v23 = vmul.f32 -1.442695, %v3893_v7 }
0x30f2   : > { %6639 = vtanh.f32 %v3894_v8 }
0x30f3   : > { %6641 = vpow2.f32 %v5884_v23 }
0x30fb   : > { %v6638_v26 = vpop.eup %6637 }
0x30fc   : > { %v6640_v10 = vpop.eup %6639  ;;  %3906 = vrot.lane.b32.xlu0 %v6638_v26, %s6839_s30 }
0x30fd   : > { %3908 = vrot.lane.b32.xlu1 %v6640_v10, %s6839_s30  ;;  %v6642_v24 = vpop.eup %6641 }
0x30fe   : > { %v3898_v31 = vadd.f32 1.0, %v6642_v24 }
0x3100   : > { %6643 = vrcp.f32 %v3898_v31 }
0x310a   : > { %v6644_v16 = vpop.eup %6643 }
0x310b   : > { %v3903_v15 = vmul.f32 0.0, %v6644_v16 }
0x316e   : > { %v3907_v12 = vpop.permute.xlu0 %3906 }
0x316f   : > { %v3909_v32 = vpop.permute.xlu1 %3908 }
0x3170   : > { %v3911_v13 = vsel %vm3910_vm7, %v3907_v12, %v3909_v32 }
0x3171   : > { %v3913_v14 = vmul.f32 %v6644_v16, %v3911_v13 }
0x3173   : > { %3915 = vrot.lane.b32.xlu0 %v3913_v14, %s6840_s12 }
0x3177   : > { %3929 = vrot.lane.b32.xlu0 %v7043_v45, %s6835_s21 }
0x31e5   : > { %v3916_v19 = vpop.permute.xlu0 %3915 }
0x31e6   : > { %v3918_v20 = vadd.f32 %v3916_v19, %v3903_v15 }
0x31e8   : > { %6645 = vtanh.f32 %v3918_v20 }
0x31e9   : > { %v3930_v27 = vpop.permute.xlu0 %3929 }
0x31f2   : > { %v6646_v22 = vpop.eup %6645 }
0x31f3   : > { %3921 = vrot.lane.b32.xlu1 %v6646_v22, %s6840_s12 }
0x3265   : > { %v3922_v25 = vpop.permute.xlu1 %3921 }
0x3266   : > { %v3924_v43 = vmul.f32 %v6644_v16, %v3922_v25 }
0x3268   : > { %v3932_v28 = vmul.f32 %v3930_v27, %v3924_v43 }
0x326a   : > { %3934 = vrot.lane.b32.xlu1 %v3932_v28, %s6841_s13 }
0x32dc   : > { %v3935_v30 = vpop.permute.xlu1 %3934 }
0x32dd   : > { %5887 = vmatmul.mubr.msk.f32.vlgmr.msra.gmra.mrb[22].mxu0 %vm3813_vm8, %v3935_v30 }
0x32de   : > { %6221 = vmatpush1.bf16.msra.mxu0 %v7470_v48  ;;  %4216 = vmatprep.mubr.f32.mxu0 %v6819_v4 }
0x32df   : > { %6223 = vmatprep.subr.bf16.mxu0 %v7472_v50 }
0x32e2   : > { %6225 = vmatpush1.bf16.msra.mxu0 %v7482_v53 }
0x32e3   : > { %5893 = vmatprep.subr.msk.mxu0 %vm442_vm0, %v7490_v54 }
0x32e6   : > { %5894 = vmatpush1.msk.msra.mxu0 %vm442_vm0, %v7497_v55 }
0x32e7   : > { %6235 = vmatprep.subr.bf16.mxu0 %v7439_v18 }
0x33b0   : > { %v4004_v33 = vpop.f32.mrb[22].mxu0 }
0x33b1   : > { %v4009_v9 = vadd.f32 %v4004_v33, %v7532_v5  ;;  %v4006_v34 = vpop.f32.mrb[23].mxu0 }
0x33b2   : > { %v4010_v35 = vadd.f32 %v4006_v34, %v7534_v6 }
0x33b3   : > { %6647 = vtanh.f32 %v4009_v9  ;;  %v5888_v21 = vmul.f32 -1.442695, %v4009_v9 }
0x33b4   : > { %6649 = vtanh.f32 %v4010_v35 }
0x33b5   : > { %6651 = vpow2.f32 %v5888_v21 }
0x33bd   : > { %v6648_v11 = vpop.eup %6647 }
0x33be   : > { %v6650_v17 = vpop.eup %6649  ;;  %4022 = vrot.lane.b32.xlu0 %v6648_v11, %s6839_s30 }
0x33bf   : > { %4024 = vrot.lane.b32.xlu1 %v6650_v17, %s6839_s30  ;;  %v6652_v36 = vpop.eup %6651 }
0x33c0   : > { %v4014_v37 = vadd.f32 1.0, %v6652_v36 }
0x33c2   : > { %3925 = vrot.lane.b32.xlu0 %v7043_v45, %s6840_s12  ;;  %6653 = vrcp.f32 %v4014_v37 }
0x33cc   : > { %v6654_v3 = vpop.eup %6653 }
0x3430   : > { %v4023_v38 = vpop.permute.xlu0 %4022 }
0x3431   : > { %v4025_v39 = vpop.permute.xlu1 %4024 }
0x3432   : > { %v4026_v40 = vsel %vm3910_vm7, %v4023_v38, %v4025_v39 }
0x3433   : > { %v4028_v41 = vmul.f32 %v6654_v3, %v4026_v40 }
0x3434   : > { %v3926_v42 = vpop.permute.xlu0 %3925 }
0x3435   : > { %4030 = vrot.lane.b32.xlu1 %v4028_v41, %s6840_s12  ;;  %v3928_v44 = vmul.f32 %v3926_v42, %v3918_v20 }
0x3437   : > { %v4019_v46 = vmul.f32 %v6654_v3, %v3928_v44 }
0x34a7   : > { %v4031_v47 = vpop.permute.xlu1 %4030 }
0x34a8   : > { %v4033_v29 = vadd.f32 %v4031_v47, %v4019_v46 }
0x34aa   : > { %6655 = vtanh.f32 %v4033_v29 }
0x34b4   : > { %v6656_v45 = vpop.eup %6655 }
0x34b5   : > { %4036 = vrot.lane.b32.xlu0 %v6656_v45, %s6840_s12 }
0x3527   : > { %v4037_v49 = vpop.permute.xlu0 %4036 }
0x3528   : > { %v7565_v51 = vmul.f32 %v6654_v3, %v4037_v49 }
0x352a   : > { %4041 = vrot.lane.b32.xlu1 %v7565_v51, %s6841_s13 }
0x359c   : > { %v4042_v52 = vpop.permute.xlu1 %4041 }
0x359d   : > { %5891 = vmatmul.mubr.msk.f32.vlgmr.msra.gmra.mrb[22].mxu1 %vm3813_vm8, %v4042_v52 }
0x359e   : > { %6229 = vmatpush1.bf16.msra.mxu1 %v7470_v48  ;;  %4323 = vmatprep.mubr.f32.mxu1 %v6819_v4 }
0x359f   : > { %6231 = vmatprep.subr.bf16.mxu1 %v7472_v50 }
0x35a2   : > { %6233 = vmatpush1.bf16.msra.mxu1 %v7482_v53 }
0x35a3   : > { %5897 = vmatprep.subr.msk.mxu1 %vm442_vm0, %v7490_v54 }
0x35a6   : > { %5898 = vmatpush1.msk.msra.mxu1 %vm442_vm0, %v7497_v55 }
0x35a7   : > { %6243 = vmatprep.subr.bf16.mxu1 %v7439_v18 }
0x3670   : > { %v4111_v56 = vpop.f32.mrb[22].mxu1 }
0x3671   : > { %v4116_v57 = vadd.f32 %v4111_v56, %v7532_v5  ;;  %v4113_v58 = vpop.f32.mrb[23].mxu1 }
0x3672   : > { %v4117_v59 = vadd.f32 %v4113_v58, %v7534_v6 }
0x3673   : > { %6657 = vtanh.f32 %v4116_v57  ;;  %v5892_v62 = vmul.f32 -1.442695, %v4116_v57 }
0x3674   : > { %6659 = vtanh.f32 %v4117_v59 }
0x3675   : > { %6661 = vpow2.f32 %v5892_v62 }
0x367d   : > { %v6658_v60 = vpop.eup %6657 }
0x367e   : > { %v6660_v61 = vpop.eup %6659  ;;  %4129 = vrot.lane.b32.xlu0 %v6658_v60, %s6839_s30 }
0x367f   : > { %4131 = vrot.lane.b32.xlu1 %v6660_v61, %s6839_s30  ;;  %v6662_v63 = vpop.eup %6661 }
0x3680   : > { %v4121_v0 = vadd.f32 1.0, %v6662_v63 }
0x3682   : > { %6663 = vrcp.f32 %v4121_v0 }
0x368c   : > { %v6664_v7 = vpop.eup %6663 }
0x368d   : > { %v4126_v10 = vmul.f32 %v6664_v7, %v4033_v29 }
0x36f0   : > { %v4130_v1 = vpop.permute.xlu0 %4129 }
0x36f1   : > { %v4132_v2 = vpop.permute.xlu1 %4131 }
0x36f2   : > { %v4133_v8 = vsel %vm3910_vm7, %v4130_v1, %v4132_v2 }
0x36f3   : > { %v4135_v26 = vmul.f32 %v6664_v7, %v4133_v8 }
0x36f5   : > { %4137 = vrot.lane.b32.xlu0 %v4135_v26, %s6840_s12 }
0x3767   : > { %v4138_v23 = vpop.permute.xlu0 %4137 }
0x3768   : > { %v4140_v24 = vadd.f32 %v4138_v23, %v4126_v10 }
0x376a   : > { %6665 = vtanh.f32 %v4140_v24 }
0x3774   : > { %v6666_v31 = vpop.eup %6665 }
0x3775   : > { %4143 = vrot.lane.b32.xlu1 %v6666_v31, %s6840_s12 }
0x37e7   : > { %v4144_v12 = vpop.permute.xlu1 %4143 }
0x37e8   : > { %v7586_v32 = vmul.f32 %v6664_v7, %v4144_v12 }
0x37ea   : > { %4148 = vrot.lane.b32.xlu0 %v7586_v32, %s6841_s13 }
0x385c   : > { %v4149_v16 = vpop.permute.xlu0 %4148 }
0x385d   : > { %5895 = vmatmul.mubr.msk.f32.vlgmr.msra.gmra.mrb[24].mxu0 %vm3813_vm8, %v4149_v16 }
0x385e   : > { %6237 = vmatpush1.bf16.msra.mxu0 %v7470_v48  ;;  %4430 = vmatprep.mubr.f32.mxu0 %v6819_v4 }
0x385f   : > { %6239 = vmatprep.subr.bf16.mxu0 %v7472_v50 }
0x3862   : > { %6241 = vmatpush1.bf16.msra.mxu0 %v7482_v53 }
0x3863   : > { %5901 = vmatprep.subr.msk.mxu0 %vm442_vm0, %v7490_v54 }
0x3866   : > { %5902 = vmatpush1.msk.msra.mxu0 %vm442_vm0, %v7497_v55 }
0x3867   : > { %6251 = vmatprep.subr.bf16.mxu0 %v7439_v18 }
0x3930   : > { %v4218_v13 = vpop.f32.mrb[24].mxu0 }
0x3931   : > { %v4223_v14 = vadd.f32 %v4218_v13, %v7532_v5  ;;  %v4220_v15 = vpop.f32.mrb[25].mxu0 }
0x3932   : > { %v4224_v19 = vadd.f32 %v4220_v15, %v7534_v6 }
0x3933   : > { %6667 = vtanh.f32 %v4223_v14  ;;  %v5896_v25 = vmul.f32 -1.442695, %v4223_v14 }
0x3934   : > { %6669 = vtanh.f32 %v4224_v19 }
0x3935   : > { %6671 = vpow2.f32 %v5896_v25 }
0x393d   : > { %v6668_v20 = vpop.eup %6667 }
0x393e   : > { %v6670_v22 = vpop.eup %6669  ;;  %4236 = vrot.lane.b32.xlu1 %v6668_v20, %s6839_s30 }
0x393f   : > { %4238 = vrot.lane.b32.xlu0 %v6670_v22, %s6839_s30  ;;  %v6672_v27 = vpop.eup %6671 }
0x3940   : > { %v4228_v43 = vadd.f32 1.0, %v6672_v27 }
0x3942   : > { %6673 = vrcp.f32 %v4228_v43 }
0x394c   : > { %v6674_v33 = vpop.eup %6673 }
0x394d   : > { %v4233_v35 = vmul.f32 %v6674_v33, %v4140_v24 }
0x39b0   : > { %v4237_v28 = vpop.permute.xlu1 %4236 }
0x39b1   : > { %v4239_v30 = vpop.permute.xlu0 %4238 }
0x39b2   : > { %v4240_v9 = vsel %vm3910_vm7, %v4237_v28, %v4239_v30 }
0x39b3   : > { %v4242_v34 = vmul.f32 %v6674_v33, %v4240_v9 }
0x39b5   : > { %4244 = vrot.lane.b32.xlu1 %v4242_v34, %s6840_s12 }
0x3a27   : > { %v4245_v11 = vpop.permute.xlu1 %4244 }
0x3a28   : > { %v4247_v17 = vadd.f32 %v4245_v11, %v4233_v35 }
0x3a2a   : > { %6675 = vtanh.f32 %v4247_v17 }
0x3a34   : > { %v6676_v21 = vpop.eup %6675 }
0x3a35   : > { %4250 = vrot.lane.b32.xlu0 %v6676_v21, %s6840_s12 }
0x3aa7   : > { %v4251_v36 = vpop.permute.xlu0 %4250 }
0x3aa8   : > { %v7607_v37 = vmul.f32 %v6674_v33, %v4251_v36 }
0x3aaa   : > { %4255 = vrot.lane.b32.xlu1 %v7607_v37, %s6841_s13 }
0x3b1c   : > { %v4256_v38 = vpop.permute.xlu1 %4255 }
0x3b1d   : > { %5899 = vmatmul.mubr.msk.f32.vlgmr.msra.gmra.mrb[24].mxu1 %vm3813_vm8, %v4256_v38 }
0x3b1e   : > { %6245 = vmatpush1.bf16.msra.mxu1 %v7470_v48  ;;  %4537 = vmatprep.mubr.f32.mxu1 %v6819_v4 }
0x3b1f   : > { %6247 = vmatprep.subr.bf16.mxu1 %v7472_v50 }
0x3b22   : > { %6249 = vmatpush1.bf16.msra.mxu1 %v7482_v53 }
0x3b23   : > { %5905 = vmatprep.subr.msk.mxu1 %vm442_vm0, %v7490_v54 }
0x3b26   : > { %5906 = vmatpush1.msk.msra.mxu1 %vm442_vm0, %v7497_v55 }
0x3b27   : > { %6259 = vmatprep.subr.bf16.mxu1 %v7439_v18 }
0x3bf0   : > { %v4325_v39 = vpop.f32.mrb[24].mxu1 }
0x3bf1   : > { %v4330_v3 = vadd.f32 %v4325_v39, %v7532_v5  ;;  %v4327_v40 = vpop.f32.mrb[25].mxu1 }
0x3bf2   : > { %v4331_v41 = vadd.f32 %v4327_v40, %v7534_v6 }
0x3bf3   : > { %6677 = vtanh.f32 %v4330_v3  ;;  %v5900_v46 = vmul.f32 -1.442695, %v4330_v3 }
0x3bf4   : > { %6679 = vtanh.f32 %v4331_v41 }
0x3bf5   : > { %6681 = vpow2.f32 %v5900_v46 }
0x3bfd   : > { %v6678_v42 = vpop.eup %6677 }
0x3bfe   : > { %v6680_v44 = vpop.eup %6679  ;;  %4343 = vrot.lane.b32.xlu0 %v6678_v42, %s6839_s30 }
0x3bff   : > { %4345 = vrot.lane.b32.xlu1 %v6680_v44, %s6839_s30  ;;  %v6682_v47 = vpop.eup %6681 }
0x3c00   : > { %v4335_v29 = vadd.f32 1.0, %v6682_v47 }
0x3c02   : > { %6683 = vrcp.f32 %v4335_v29 }
0x3c0c   : > { %v6684_v52 = vpop.eup %6683 }
0x3c0d   : > { %v4340_v58 = vmul.f32 %v6684_v52, %v4247_v17 }
0x3c70   : > { %v4344_v45 = vpop.permute.xlu0 %4343 }
0x3c71   : > { %v4346_v49 = vpop.permute.xlu1 %4345 }
0x3c72   : > { %v4347_v56 = vsel %vm3910_vm7, %v4344_v45, %v4346_v49 }
0x3c73   : > { %v4349_v57 = vmul.f32 %v6684_v52, %v4347_v56 }
0x3c75   : > { %4351 = vrot.lane.b32.xlu0 %v4349_v57, %s6840_s12 }
0x3ce7   : > { %v4352_v59 = vpop.permute.xlu0 %4351 }
0x3ce8   : > { %v4354_v60 = vadd.f32 %v4352_v59, %v4340_v58 }
0x3cea   : > { %6685 = vtanh.f32 %v4354_v60 }
0x3cf4   : > { %v6686_v61 = vpop.eup %6685 }
0x3cf5   : > { %4357 = vrot.lane.b32.xlu1 %v6686_v61, %s6840_s12 }
0x3d67   : > { %v4358_v62 = vpop.permute.xlu1 %4357 }
0x3d68   : > { %v7628_v63 = vmul.f32 %v6684_v52, %v4358_v62 }
0x3d6a   : > { %4362 = vrot.lane.b32.xlu0 %v7628_v63, %s6841_s13 }
0x3ddc   : > { %v4363_v0 = vpop.permute.xlu0 %4362 }
0x3ddd   : > { %5903 = vmatmul.mubr.msk.f32.vlgmr.msra.gmra.mrb[26].mxu0 %vm3813_vm8, %v4363_v0 }
0x3dde   : > { %6253 = vmatpush1.bf16.msra.mxu0 %v7470_v48  ;;  %4644 = vmatprep.mubr.f32.mxu0 %v6819_v4 }
0x3ddf   : > { %6255 = vmatprep.subr.bf16.mxu0 %v7472_v50 }
0x3de2   : > { %6257 = vmatpush1.bf16.msra.mxu0 %v7482_v53 }
0x3de3   : > { %5909 = vmatprep.subr.msk.mxu0 %vm442_vm0, %v7490_v54 }
0x3de6   : > { %5910 = vmatpush1.msk.msra.mxu0 %vm442_vm0, %v7497_v55 }
0x3de7   : > { %6267 = vmatprep.subr.bf16.mxu0 %v7439_v18 }
0x3eb0   : > { %v4432_v1 = vpop.f32.mrb[26].mxu0 }
0x3eb1   : > { %v4437_v2 = vadd.f32 %v4432_v1, %v7532_v5  ;;  %v4434_v7 = vpop.f32.mrb[27].mxu0 }
0x3eb2   : > { %v4438_v8 = vadd.f32 %v4434_v7, %v7534_v6 }
0x3eb3   : > { %6687 = vtanh.f32 %v4437_v2  ;;  %v5904_v23 = vmul.f32 -1.442695, %v4437_v2 }
0x3eb4   : > { %6689 = vtanh.f32 %v4438_v8 }
0x3eb5   : > { %6691 = vpow2.f32 %v5904_v23 }
0x3ebd   : > { %v6688_v26 = vpop.eup %6687 }
0x3ebe   : > { %v6690_v10 = vpop.eup %6689  ;;  %4450 = vrot.lane.b32.xlu1 %v6688_v26, %s6839_s30 }
0x3ebf   : > { %4452 = vrot.lane.b32.xlu0 %v6690_v10, %s6839_s30  ;;  %v6692_v24 = vpop.eup %6691 }
0x3ec0   : > { %v4442_v31 = vadd.f32 1.0, %v6692_v24 }
0x3ec2   : > { %6693 = vrcp.f32 %v4442_v31 }
0x3ecc   : > { %v6694_v13 = vpop.eup %6693 }
0x3ecd   : > { %v4447_v19 = vmul.f32 %v6694_v13, %v4354_v60 }
0x3f30   : > { %v4451_v12 = vpop.permute.xlu1 %4450 }
0x3f31   : > { %v4453_v16 = vpop.permute.xlu0 %4452 }
0x3f32   : > { %v4454_v14 = vsel %vm3910_vm7, %v4451_v12, %v4453_v16 }
0x3f33   : > { %v4456_v15 = vmul.f32 %v6694_v13, %v4454_v14 }
0x3f35   : > { %4458 = vrot.lane.b32.xlu1 %v4456_v15, %s6840_s12 }
0x3fa7   : > { %v4459_v20 = vpop.permute.xlu1 %4458 }
0x3fa8   : > { %v4461_v22 = vadd.f32 %v4459_v20, %v4447_v19 }
0x3faa   : > { %6695 = vtanh.f32 %v4461_v22 }
0x3fb4   : > { %v6696_v25 = vpop.eup %6695 }
0x3fb5   : > { %4464 = vrot.lane.b32.xlu0 %v6696_v25, %s6840_s12 }
0x4027   : > { %v4465_v27 = vpop.permute.xlu0 %4464 }
0x4028   : > { %v7649_v43 = vmul.f32 %v6694_v13, %v4465_v27 }
0x402a   : > { %4469 = vrot.lane.b32.xlu1 %v7649_v43, %s6841_s13 }
0x409c   : > { %v4470_v28 = vpop.permute.xlu1 %4469 }
0x409d   : > { %5907 = vmatmul.mubr.msk.f32.vlgmr.msra.gmra.mrb[26].mxu1 %vm3813_vm8, %v4470_v28 }
0x409e   : > { %6261 = vmatpush1.bf16.msra.mxu1 %v7470_v48  ;;  %4751 = vmatprep.mubr.f32.mxu1 %v6819_v4 }
0x409f   : > { %6263 = vmatprep.subr.bf16.mxu1 %v7472_v50 }
0x40a2   : > { %6265 = vmatpush1.bf16.msra.mxu1 %v7482_v53 }
0x40a3   : > { %5913 = vmatprep.subr.msk.mxu1 %vm442_vm0, %v7490_v54 }
0x40a6   : > { %5914 = vmatpush1.msk.msra.mxu1 %vm442_vm0, %v7497_v55 }
0x40a7   : > { %6275 = vmatprep.subr.bf16.mxu1 %v7439_v18 }
0x4170   : > { %v4539_v30 = vpop.f32.mrb[26].mxu1 }
0x4171   : > { %v4544_v33 = vadd.f32 %v4539_v30, %v7532_v5  ;;  %v4541_v9 = vpop.f32.mrb[27].mxu1 }
0x4172   : > { %v4545_v34 = vadd.f32 %v4541_v9, %v7534_v6 }
0x4173   : > { %6697 = vtanh.f32 %v4544_v33  ;;  %v5908_v17 = vmul.f32 -1.442695, %v4544_v33 }
0x4174   : > { %6699 = vtanh.f32 %v4545_v34 }
0x4175   : > { %6701 = vpow2.f32 %v5908_v17 }
0x417d   : > { %v6698_v35 = vpop.eup %6697 }
0x417e   : > { %v6700_v11 = vpop.eup %6699  ;;  %4557 = vrot.lane.b32.xlu0 %v6698_v35, %s6839_s30 }
0x417f   : > { %4559 = vrot.lane.b32.xlu1 %v6700_v11, %s6839_s30  ;;  %v6702_v21 = vpop.eup %6701 }
0x4180   : > { %v4549_v36 = vadd.f32 1.0, %v6702_v21 }
0x4182   : > { %6703 = vrcp.f32 %v4549_v36 }
0x418c   : > { %v6704_v3 = vpop.eup %6703 }
0x418d   : > { %v4554_v42 = vmul.f32 %v6704_v3, %v4461_v22 }
0x41f0   : > { %v4558_v38 = vpop.permute.xlu0 %4557 }
0x41f1   : > { %v4560_v39 = vpop.permute.xlu1 %4559 }
0x41f2   : > { %v4561_v40 = vsel %vm3910_vm7, %v4558_v38, %v4560_v39 }
0x41f3   : > { %v4563_v41 = vmul.f32 %v6704_v3, %v4561_v40 }
0x41f5   : > { %4565 = vrot.lane.b32.xlu0 %v4563_v41, %s6840_s12 }
0x4267   : > { %v4566_v44 = vpop.permute.xlu0 %4565 }
0x4268   : > { %v4568_v46 = vadd.f32 %v4566_v44, %v4554_v42 }
0x426a   : > { %6705 = vtanh.f32 %v4568_v46 }
0x4274   : > { %v6706_v47 = vpop.eup %6705 }
0x4275   : > { %4571 = vrot.lane.b32.xlu1 %v6706_v47, %s6840_s12 }
0x42e7   : > { %v4572_v29 = vpop.permute.xlu1 %4571 }
0x42e8   : > { %v7670_v45 = vmul.f32 %v6704_v3, %v4572_v29 }
0x42ea   : > { %4576 = vrot.lane.b32.xlu0 %v7670_v45, %s6841_s13 }
0x435c   : > { %v4577_v49 = vpop.permute.xlu0 %4576 }
0x435d   : > { %5911 = vmatmul.mubr.msk.f32.vlgmr.msra.gmra.mrb[28].mxu0 %vm3813_vm8, %v4577_v49 }
0x435e   : > { %6269 = vmatpush1.bf16.msra.mxu0 %v7470_v48  ;;  %4858 = vmatprep.mubr.f32.mxu0 %v6819_v4 }
0x435f   : > { %6271 = vmatprep.subr.bf16.mxu0 %v7472_v50 }
0x4362   : > { %6273 = vmatpush1.bf16.msra.mxu0 %v7482_v53 }
0x4363   : > { %5917 = vmatprep.subr.msk.mxu0 %vm442_vm0, %v7490_v54 }
0x4366   : > { %5918 = vmatpush1.msk.msra.mxu0 %vm442_vm0, %v7497_v55 }
0x4367   : > { %6283 = vmatprep.subr.bf16.mxu0 %v7439_v18 }
0x4430   : > { %v4646_v52 = vpop.f32.mrb[28].mxu0 }
0x4431   : > { %v4651_v56 = vadd.f32 %v4646_v52, %v7532_v5  ;;  %v4648_v57 = vpop.f32.mrb[29].mxu0 }
0x4432   : > { %v4652_v58 = vadd.f32 %v4648_v57, %v7534_v6 }
0x4433   : > { %6707 = vtanh.f32 %v4651_v56  ;;  %v5912_v61 = vmul.f32 -1.442695, %v4651_v56 }
0x4434   : > { %6709 = vtanh.f32 %v4652_v58 }
0x4435   : > { %6711 = vpow2.f32 %v5912_v61 }
0x443d   : > { %v6708_v59 = vpop.eup %6707 }
0x443e   : > { %v6710_v60 = vpop.eup %6709  ;;  %4664 = vrot.lane.b32.xlu1 %v6708_v59, %s6839_s30 }
0x443f   : > { %4666 = vrot.lane.b32.xlu0 %v6710_v60, %s6839_s30  ;;  %v6712_v62 = vpop.eup %6711 }
0x4440   : > { %v4656_v0 = vadd.f32 1.0, %v6712_v62 }
0x4442   : > { %6713 = vrcp.f32 %v4656_v0 }
0x444c   : > { %v6714_v7 = vpop.eup %6713 }
0x444d   : > { %v4661_v10 = vmul.f32 %v6714_v7, %v4568_v46 }
0x44b0   : > { %v4665_v1 = vpop.permute.xlu1 %4664 }
0x44b1   : > { %v4667_v2 = vpop.permute.xlu0 %4666 }
0x44b2   : > { %v4668_v8 = vsel %vm3910_vm7, %v4665_v1, %v4667_v2 }
0x44b3   : > { %v4670_v26 = vmul.f32 %v6714_v7, %v4668_v8 }
0x44b5   : > { %4672 = vrot.lane.b32.xlu1 %v4670_v26, %s6840_s12 }
0x4527   : > { %v4673_v23 = vpop.permute.xlu1 %4672 }
0x4528   : > { %v4675_v24 = vadd.f32 %v4673_v23, %v4661_v10 }
0x452a   : > { %6715 = vtanh.f32 %v4675_v24 }
0x4534   : > { %v6716_v31 = vpop.eup %6715 }
0x4535   : > { %4678 = vrot.lane.b32.xlu0 %v6716_v31, %s6840_s12 }
0x45a7   : > { %v4679_v12 = vpop.permute.xlu0 %4678 }
0x45a8   : > { %v7691_v16 = vmul.f32 %v6714_v7, %v4679_v12 }
0x45aa   : > { %4683 = vrot.lane.b32.xlu1 %v7691_v16, %s6841_s13 }
0x461c   : > { %v4684_v13 = vpop.permute.xlu1 %4683 }
0x461d   : > { %5915 = vmatmul.mubr.msk.f32.vlgmr.msra.gmra.mrb[28].mxu1 %vm3813_vm8, %v4684_v13 }
0x461e   : > { %6277 = vmatpush1.bf16.msra.mxu1 %v7470_v48  ;;  %4965 = vmatprep.mubr.f32.mxu1 %v6819_v4 }
0x461f   : > { %6279 = vmatprep.subr.bf16.mxu1 %v7472_v50 }
0x4622   : > { %6281 = vmatpush1.bf16.msra.mxu1 %v7482_v53 }
0x4623   : > { %5921 = vmatprep.subr.msk.mxu1 %vm442_vm0, %v7490_v54 }
0x4626   : > { %5922 = vmatpush1.msk.msra.mxu1 %vm442_vm0, %v7497_v55 }
0x4627   : > { %6291 = vmatprep.subr.bf16.mxu1 %v7439_v18 }
0x46f0   : > { %v4753_v14 = vpop.f32.mrb[28].mxu1 }
0x46f1   : > { %v4758_v15 = vadd.f32 %v4753_v14, %v7532_v5  ;;  %v4755_v19 = vpop.f32.mrb[29].mxu1 }
0x46f2   : > { %v4759_v20 = vadd.f32 %v4755_v19, %v7534_v6 }
0x46f3   : > { %6717 = vtanh.f32 %v4758_v15  ;;  %v5916_v27 = vmul.f32 -1.442695, %v4758_v15 }
0x46f4   : > { %6719 = vtanh.f32 %v4759_v20 }
0x46f5   : > { %6721 = vpow2.f32 %v5916_v27 }
0x46fd   : > { %v6718_v22 = vpop.eup %6717 }
0x46fe   : > { %v6720_v25 = vpop.eup %6719  ;;  %4771 = vrot.lane.b32.xlu0 %v6718_v22, %s6839_s30 }
0x46ff   : > { %4773 = vrot.lane.b32.xlu1 %v6720_v25, %s6839_s30  ;;  %v6722_v28 = vpop.eup %6721 }
0x4700   : > { %v4763_v30 = vadd.f32 1.0, %v6722_v28 }
0x4702   : > { %6723 = vrcp.f32 %v4763_v30 }
0x470c   : > { %v6724_v34 = vpop.eup %6723 }
0x470d   : > { %v4768_v17 = vmul.f32 %v6724_v34, %v4675_v24 }
0x4770   : > { %v4772_v33 = vpop.permute.xlu0 %4771 }
0x4771   : > { %v4774_v9 = vpop.permute.xlu1 %4773 }
0x4772   : > { %v4775_v35 = vsel %vm3910_vm7, %v4772_v33, %v4774_v9 }
0x4773   : > { %v4777_v11 = vmul.f32 %v6724_v34, %v4775_v35 }
0x4775   : > { %4779 = vrot.lane.b32.xlu0 %v4777_v11, %s6840_s12 }
0x47e7   : > { %v4780_v21 = vpop.permute.xlu0 %4779 }
0x47e8   : > { %v4782_v36 = vadd.f32 %v4780_v21, %v4768_v17 }
0x47ea   : > { %6725 = vtanh.f32 %v4782_v36 }
0x47f4   : > { %v6726_v38 = vpop.eup %6725 }
0x47f5   : > { %4785 = vrot.lane.b32.xlu1 %v6726_v38, %s6840_s12 }
0x4867   : > { %v4786_v39 = vpop.permute.xlu1 %4785 }
0x4868   : > { %v7712_v3 = vmul.f32 %v6724_v34, %v4786_v39 }
0x486a   : > { %4790 = vrot.lane.b32.xlu0 %v7712_v3, %s6841_s13 }
0x48dc   : > { %v4791_v40 = vpop.permute.xlu0 %4790 }
0x48dd   : > { %5919 = vmatmul.mubr.msk.f32.vlgmr.msra.gmra.mrb[30].mxu0 %vm3813_vm8, %v4791_v40 }
0x48de   : > { %6285 = vmatpush1.bf16.msra.mxu0 %v7470_v48  ;;  %5072 = vmatprep.mubr.f32.mxu0 %v6819_v4 }
0x48df   : > { %6287 = vmatprep.subr.bf16.mxu0 %v7472_v50 }
0x48e2   : > { %6289 = vmatpush1.bf16.msra.mxu0 %v7482_v53 }
0x48e3   : > { %5925 = vmatprep.subr.msk.mxu0 %vm442_vm0, %v7490_v54 }
0x48e6   : > { %5926 = vmatpush1.msk.msra.mxu0 %vm442_vm0, %v7497_v55 }
0x48e7   : > { %6299 = vmatprep.subr.bf16.mxu0 %v7439_v18 }
0x49b0   : > { %v4860_v41 = vpop.f32.mrb[30].mxu0 }
0x49b1   : > { %v4865_v42 = vadd.f32 %v4860_v41, %v7532_v5  ;;  %v4862_v44 = vpop.f32.mrb[31].mxu0 }
0x49b2   : > { %v4866_v46 = vadd.f32 %v4862_v44, %v7534_v6 }
0x49b3   : > { %6727 = vtanh.f32 %v4865_v42  ;;  %v5920_v49 = vmul.f32 -1.442695, %v4865_v42 }
0x49b4   : > { %6729 = vtanh.f32 %v4866_v46 }
0x49b5   : > { %6731 = vpow2.f32 %v5920_v49 }
0x49bd   : > { %v6728_v47 = vpop.eup %6727 }
0x49be   : > { %v6730_v29 = vpop.eup %6729  ;;  %4878 = vrot.lane.b32.xlu1 %v6728_v47, %s6839_s30 }
0x49bf   : > { %4880 = vrot.lane.b32.xlu0 %v6730_v29, %s6839_s30  ;;  %v6732_v52 = vpop.eup %6731 }
0x49c0   : > { %v4870_v56 = vadd.f32 1.0, %v6732_v52 }
0x49c2   : > { %6733 = vrcp.f32 %v4870_v56 }
0x49cc   : > { %v6734_v59 = vpop.eup %6733 }
0x49cd   : > { %v4875_v62 = vmul.f32 %v6734_v59, %v4782_v36 }
0x4a30   : > { %v4879_v57 = vpop.permute.xlu1 %4878 }
0x4a31   : > { %v4881_v58 = vpop.permute.xlu0 %4880 }
0x4a32   : > { %v4882_v60 = vsel %vm3910_vm7, %v4879_v57, %v4881_v58 }
0x4a33   : > { %v4884_v61 = vmul.f32 %v6734_v59, %v4882_v60 }
0x4a35   : > { %4886 = vrot.lane.b32.xlu1 %v4884_v61, %s6840_s12 }
0x4aa7   : > { %v4887_v0 = vpop.permute.xlu1 %4886 }
0x4aa8   : > { %v4889_v1 = vadd.f32 %v4887_v0, %v4875_v62 }
0x4aaa   : > { %6735 = vtanh.f32 %v4889_v1 }
0x4ab4   : > { %v6736_v2 = vpop.eup %6735 }
0x4ab5   : > { %4892 = vrot.lane.b32.xlu0 %v6736_v2, %s6840_s12 }
0x4b27   : > { %v4893_v7 = vpop.permute.xlu0 %4892 }
0x4b28   : > { %v4895_v8 = vmul.f32 %v6734_v59, %v4893_v7 }
0x4b2a   : > { %4897 = vrot.lane.b32.xlu1 %v4895_v8, %s6841_s13 }
0x4b9c   : > { %v7734_v26 = vpop.permute.xlu1 %4897 }
0x4b9d   : > { %5923 = vmatmul.mubr.msk.f32.vlgmr.msra.gmra.mrb[30].mxu1 %vm3813_vm8, %v7734_v26 }
0x4b9e   : > { %6293 = vmatpush1.bf16.msra.mxu1 %v7470_v48  ;;  %5179 = vmatprep.mubr.f32.mxu1 %v6819_v4 }
0x4b9f   : > { %6295 = vmatprep.subr.bf16.mxu1 %v7472_v50 }
0x4ba2   : > { %6297 = vmatpush1.bf16.msra.mxu1 %v7482_v53 }
0x4ba3   : > { %5929 = vmatprep.subr.msk.mxu1 %vm442_vm0, %v7490_v54 }
0x4ba6   : > { %5930 = vmatpush1.msk.msra.mxu1 %vm442_vm0, %v7497_v55 }
0x4ba7   : > { %6307 = vmatprep.subr.bf16.mxu1 %v7439_v18 }
0x4c70   : > { %v4967_v10 = vpop.f32.mrb[30].mxu1 }
0x4c71   : > { %v4972_v23 = vadd.f32 %v4967_v10, %v7532_v5  ;;  %v4969_v24 = vpop.f32.mrb[31].mxu1 }
0x4c72   : > { %v4973_v31 = vadd.f32 %v4969_v24, %v7534_v6 }
0x4c73   : > { %6737 = vtanh.f32 %v4972_v23  ;;  %v5924_v14 = vmul.f32 -1.442695, %v4972_v23 }
0x4c74   : > { %6739 = vtanh.f32 %v4973_v31 }
0x4c75   : > { %6741 = vpow2.f32 %v5924_v14 }
0x4c7d   : > { %v6738_v12 = vpop.eup %6737 }
0x4c7e   : > { %v6740_v13 = vpop.eup %6739  ;;  %4985 = vrot.lane.b32.xlu0 %v6738_v12, %s6839_s30 }
0x4c7f   : > { %4987 = vrot.lane.b32.xlu1 %v6740_v13, %s6839_s30  ;;  %v6742_v15 = vpop.eup %6741 }
0x4c80   : > { %v4977_v19 = vadd.f32 1.0, %v6742_v15 }
0x4c82   : > { %6743 = vrcp.f32 %v4977_v19 }
0x4c8c   : > { %v6744_v25 = vpop.eup %6743 }
0x4c8d   : > { %v4982_v30 = vmul.f32 %v6744_v25, %v4889_v1 }
0x4cf0   : > { %v4986_v20 = vpop.permute.xlu0 %4985 }
0x4cf1   : > { %v4988_v22 = vpop.permute.xlu1 %4987 }
0x4cf2   : > { %v4989_v27 = vsel %vm3910_vm7, %v4986_v20, %v4988_v22 }
0x4cf3   : > { %v4991_v28 = vmul.f32 %v6744_v25, %v4989_v27 }
0x4cf5   : > { %4993 = vrot.lane.b32.xlu0 %v4991_v28, %s6840_s12 }
0x4d67   : > { %v4994_v33 = vpop.permute.xlu0 %4993 }
0x4d68   : > { %v4996_v9 = vadd.f32 %v4994_v33, %v4982_v30  ;;  %v6809_v30 = vld [vmem:[%s7904_s9 + $0x48] sm:$0xf]  ;;  %v6810_v33 = vld [vmem:[%s7904_s9 + $0x40] sm:$0xf] }
0x4d6a   : > { %6745 = vtanh.f32 %v4996_v9 }
0x4d74   : > { %v6746_v34 = vpop.eup %6745 }
0x4d75   : > { %4999 = vrot.lane.b32.xlu1 %v6746_v34, %s6840_s12 }
0x4de7   : > { %v5000_v35 = vpop.permute.xlu1 %4999 }
0x4de8   : > { %v7754_v11 = vmul.f32 %v6744_v25, %v5000_v35 }
0x4dea   : > { %5004 = vrot.lane.b32.xlu0 %v7754_v11, %s6841_s13 }
0x4e5c   : > { %v5005_v17 = vpop.permute.xlu0 %5004 }
0x4e5d   : > { %5927 = vmatmul.mubr.msk.f32.vlgmr.msra.gmra.mrb[32].mxu0 %vm3813_vm8, %v5005_v17 }
0x4e5e   : > { %6301 = vmatpush1.bf16.msra.mxu0 %v7470_v48  ;;  %5286 = vmatprep.mubr.f32.mxu0 %v6819_v4 }
0x4e5f   : > { %6303 = vmatprep.subr.bf16.mxu0 %v7472_v50 }
0x4e62   : > { %6305 = vmatpush1.bf16.msra.mxu0 %v7482_v53 }
0x4e63   : > { %5933 = vmatprep.subr.msk.mxu0 %vm442_vm0, %v7490_v54 }
0x4e66   : > { %5934 = vmatpush1.msk.msra.mxu0 %vm442_vm0, %v7497_v55 }
0x4e67   : > { %6315 = vmatprep.subr.bf16.mxu0 %v7439_v18 }
0x4f30   : > { %v5074_v21 = vpop.f32.mrb[32].mxu0 }
0x4f31   : > { %v5079_v36 = vadd.f32 %v5074_v21, %v7532_v5  ;;  %v5076_v38 = vpop.f32.mrb[33].mxu0 }
0x4f32   : > { %v5080_v39 = vadd.f32 %v5076_v38, %v7534_v6 }
0x4f33   : > { %6747 = vtanh.f32 %v5079_v36  ;;  %v5928_v42 = vmul.f32 -1.442695, %v5079_v36 }
0x4f34   : > { %6749 = vtanh.f32 %v5080_v39 }
0x4f35   : > { %6751 = vpow2.f32 %v5928_v42 }
0x4f3d   : > { %v6748_v40 = vpop.eup %6747 }
0x4f3e   : > { %v6750_v41 = vpop.eup %6749  ;;  %5092 = vrot.lane.b32.xlu1 %v6748_v40, %s6839_s30 }
0x4f3f   : > { %5094 = vrot.lane.b32.xlu0 %v6750_v41, %s6839_s30  ;;  %v6752_v44 = vpop.eup %6751 }
0x4f40   : > { %v5084_v46 = vadd.f32 1.0, %v6752_v44 }
0x4f42   : > { %6753 = vrcp.f32 %v5084_v46 }
0x4f4c   : > { %v6754_v49 = vpop.eup %6753 }
0x4f4d   : > { %v5089_v57 = vmul.f32 %v6754_v49, %v4996_v9 }
0x4fb0   : > { %v5093_v47 = vpop.permute.xlu1 %5092 }
0x4fb1   : > { %v5095_v29 = vpop.permute.xlu0 %5094 }
0x4fb2   : > { %v5096_v52 = vsel %vm3910_vm7, %v5093_v47, %v5095_v29 }
0x4fb3   : > { %v5098_v56 = vmul.f32 %v6754_v49, %v5096_v52 }
0x4fb5   : > { %5100 = vrot.lane.b32.xlu1 %v5098_v56, %s6840_s12 }
0x5027   : > { %v5101_v58 = vpop.permute.xlu1 %5100 }
0x5028   : > { %v5103_v59 = vadd.f32 %v5101_v58, %v5089_v57 }
0x502a   : > { %6755 = vtanh.f32 %v5103_v59 }
0x5034   : > { %v6756_v60 = vpop.eup %6755 }
0x5035   : > { %5106 = vrot.lane.b32.xlu0 %v6756_v60, %s6840_s12 }
0x50a7   : > { %v5107_v61 = vpop.permute.xlu0 %5106 }
0x50a8   : > { %v7775_v62 = vmul.f32 %v6754_v49, %v5107_v61 }
0x50aa   : > { %5111 = vrot.lane.b32.xlu1 %v7775_v62, %s6841_s13 }
0x511c   : > { %v5112_v0 = vpop.permute.xlu1 %5111 }
0x511d   : > { %5931 = vmatmul.mubr.msk.f32.vlgmr.msra.gmra.mrb[32].mxu1 %vm3813_vm8, %v5112_v0 }
0x511e   : > { %6309 = vmatpush1.bf16.msra.mxu1 %v7470_v48  ;;  %5393 = vmatprep.mubr.f32.mxu1 %v6819_v4 }
0x511f   : > { %6311 = vmatprep.subr.bf16.mxu1 %v7472_v50 }
0x5122   : > { %6313 = vmatpush1.bf16.msra.mxu1 %v7482_v53 }
0x5123   : > { %5937 = vmatprep.subr.msk.mxu1 %vm442_vm0, %v7490_v54 }
0x5126   : > { %5938 = vmatpush1.msk.msra.mxu1 %vm442_vm0, %v7497_v55 }
0x5127   : > { %6323 = vmatprep.subr.bf16.mxu1 %v7439_v18 }
0x51f0   : > { %v5181_v1 = vpop.f32.mrb[32].mxu1 }
0x51f1   : > { %v5186_v2 = vadd.f32 %v5181_v1, %v7532_v5  ;;  %v5183_v7 = vpop.f32.mrb[33].mxu1 }
0x51f2   : > { %v5187_v8 = vadd.f32 %v5183_v7, %v7534_v6 }
0x51f3   : > { %6757 = vtanh.f32 %v5186_v2  ;;  %v5932_v54 = vmul.f32 -1.442695, %v5186_v2 }
0x51f4   : > { %6759 = vtanh.f32 %v5187_v8 }
0x51f5   : > { %6761 = vpow2.f32 %v5932_v54 }
0x51fd   : > { %v6758_v10 = vpop.eup %6757 }
0x51fe   : > { %v6760_v23 = vpop.eup %6759  ;;  %5199 = vrot.lane.b32.xlu0 %v6758_v10, %s6839_s30 }
0x51ff   : > { %5201 = vrot.lane.b32.xlu1 %v6760_v23, %s6839_s30  ;;  %v6762_v24 = vpop.eup %6761 }
0x5200   : > { %v5191_v55 = vadd.f32 1.0, %v6762_v24 }
0x5202   : > { %6763 = vrcp.f32 %v5191_v55 }
0x520c   : > { %v6764_v12 = vpop.eup %6763 }
0x520d   : > { %v5196_v15 = vmul.f32 %v6764_v12, %v5103_v59 }
0x5270   : > { %v5200_v18 = vpop.permute.xlu0 %5199 }
0x5271   : > { %v5202_v31 = vpop.permute.xlu1 %5201 }
0x5272   : > { %v5203_v13 = vsel %vm3910_vm7, %v5200_v18, %v5202_v31 }
0x5273   : > { %v5205_v14 = vmul.f32 %v6764_v12, %v5203_v13 }
0x5275   : > { %5207 = vrot.lane.b32.xlu0 %v5205_v14, %s6840_s12 }
0x52e7   : > { %v5208_v19 = vpop.permute.xlu0 %5207 }
0x52e8   : > { %v5210_v20 = vadd.f32 %v5208_v19, %v5196_v15 }
0x52ea   : > { %6765 = vtanh.f32 %v5210_v20 }
0x52f4   : > { %v6766_v22 = vpop.eup %6765 }
0x52f5   : > { %5213 = vrot.lane.b32.xlu1 %v6766_v22, %s6840_s12 }
0x5367   : > { %v5214_v25 = vpop.permute.xlu1 %5213 }
0x5368   : > { %v7796_v27 = vmul.f32 %v6764_v12, %v5214_v25 }
0x536a   : > { %5218 = vrot.lane.b32.xlu0 %v7796_v27, %s6841_s13 }
0x53dc   : > { %v5219_v28 = vpop.permute.xlu0 %5218 }
0x53dd   : > { %5935 = vmatmul.mubr.msk.f32.vlgmr.msra.gmra.mrb[34].mxu0 %vm3813_vm8, %v5219_v28 }
0x53de   : > { %6317 = vmatpush1.bf16.msra.mxu0 %v7470_v48  ;;  %5500 = vmatprep.mubr.f32.mxu0 %v6819_v4 }
0x53df   : > { %6319 = vmatprep.subr.bf16.mxu0 %v7472_v50 }
0x53e2   : > { %6321 = vmatpush1.bf16.msra.mxu0 %v7482_v53 }
0x53e3   : > { %5941 = vmatprep.subr.msk.mxu0 %vm442_vm0, %v6809_v30 }
0x53e6   : > { %5942 = vmatpush1.msk.msra.mxu0 %vm442_vm0, %v6810_v33 }
0x54b0   : > { %v5288_v9 = vpop.f32.mrb[34].mxu0 }
0x54b1   : > { %v5293_v34 = vadd.f32 %v5288_v9, %v7532_v5  ;;  %v5290_v35 = vpop.f32.mrb[35].mxu0 }
0x54b2   : > { %v5294_v17 = vadd.f32 %v5290_v35, %v7534_v6 }
0x54b3   : > { %6767 = vtanh.f32 %v5293_v34  ;;  %v5936_v38 = vmul.f32 -1.442695, %v5293_v34 }
0x54b4   : > { %6769 = vtanh.f32 %v5294_v17 }
0x54b5   : > { %6771 = vpow2.f32 %v5936_v38 }
0x54bd   : > { %v6768_v21 = vpop.eup %6767 }
0x54be   : > { %v6770_v36 = vpop.eup %6769  ;;  %5306 = vrot.lane.b32.xlu1 %v6768_v21, %s6839_s30 }
0x54bf   : > { %5308 = vrot.lane.b32.xlu0 %v6770_v36, %s6839_s30  ;;  %v6772_v39 = vpop.eup %6771 }
0x54c0   : > { %v5298_v40 = vadd.f32 1.0, %v6772_v39 }
0x54c2   : > { %6773 = vrcp.f32 %v5298_v40 }
0x54cc   : > { %v6774_v44 = vpop.eup %6773 }
0x54cd   : > { %v5303_v29 = vmul.f32 %v6774_v44, %v5210_v20 }
0x5530   : > { %v5307_v41 = vpop.permute.xlu1 %5306 }
0x5531   : > { %v5309_v42 = vpop.permute.xlu0 %5308 }
0x5532   : > { %v5310_v46 = vsel %vm3910_vm7, %v5307_v41, %v5309_v42 }
0x5533   : > { %v5312_v47 = vmul.f32 %v6774_v44, %v5310_v46 }
0x5535   : > { %5314 = vrot.lane.b32.xlu1 %v5312_v47, %s6840_s12 }
0x55a7   : > { %v5315_v49 = vpop.permute.xlu1 %5314 }
0x55a8   : > { %v5317_v52 = vadd.f32 %v5315_v49, %v5303_v29 }
0x55aa   : > { %6775 = vtanh.f32 %v5317_v52 }
0x55b4   : > { %v6776_v56 = vpop.eup %6775 }
0x55b5   : > { %5320 = vrot.lane.b32.xlu0 %v6776_v56, %s6840_s12 }
0x5627   : > { %v5321_v57 = vpop.permute.xlu0 %5320 }
0x5628   : > { %v7820_v58 = vmul.f32 %v6774_v44, %v5321_v57 }
0x562a   : > { %5325 = vrot.lane.b32.xlu1 %v7820_v58, %s6841_s13 }
0x569c   : > { %v5326_v59 = vpop.permute.xlu1 %5325 }
0x569d   : > { %5939 = vmatmul.mubr.msk.f32.vlgmr.msra.gmra.mrb[34].mxu1 %vm3813_vm8, %v5326_v59 }
0x569e   : > { %6325 = vmatpush1.bf16.msra.mxu1 %v7470_v48  ;;  %5607 = vmatprep.mubr.f32.mxu1 %v6819_v4 }
0x569f   : > { %6327 = vmatprep.subr.bf16.mxu1 %v7472_v50 }
0x56a2   : > { %6329 = vmatpush1.bf16.msra.mxu1 %v7482_v53 }
0x56a3   : > { %5945 = vmatprep.subr.msk.mxu1 %vm442_vm0, %v6809_v30 }
0x56a6   : > { %5946 = vmatpush1.msk.msra.mxu1 %vm442_vm0, %v6810_v33  ;;  %vm5712_vm0 = vcmask 457728  }
0x5770   : > { %v5395_v60 = vpop.f32.mrb[34].mxu1 }
0x5771   : > { %v5400_v61 = vadd.f32 %v5395_v60, %v7532_v5  ;;  %v5397_v0 = vpop.f32.mrb[35].mxu1 }
0x5772   : > { %v5401_v1 = vadd.f32 %v5397_v0, %v7534_v6 }
0x5773   : > { %6777 = vtanh.f32 %v5400_v61  ;;  %v5940_v4 = vmul.f32 -1.442695, %v5400_v61 }
0x5774   : > { %6779 = vtanh.f32 %v5401_v1 }
0x5775   : > { %6781 = vpow2.f32 %v5940_v4 }
0x577d   : > { %v6778_v2 = vpop.eup %6777 }
0x577e   : > { %v6780_v48 = vpop.eup %6779  ;;  %5413 = vrot.lane.b32.xlu0 %v6778_v2, %s6839_s30 }
0x577f   : > { %5415 = vrot.lane.b32.xlu1 %v6780_v48, %s6839_s30  ;;  %v6782_v50 = vpop.eup %6781 }
0x5780   : > { %v5405_v53 = vadd.f32 1.0, %v6782_v50 }
0x5782   : > { %6783 = vrcp.f32 %v5405_v53 }
0x578c   : > { %v6784_v10 = vpop.eup %6783 }
0x578d   : > { %v5410_v24 = vmul.f32 %v6784_v10, %v5317_v52 }
0x57f0   : > { %v5414_v7 = vpop.permute.xlu0 %5413 }
0x57f1   : > { %v5416_v8 = vpop.permute.xlu1 %5415 }
0x57f2   : > { %v5417_v23 = vsel %vm3910_vm7, %v5414_v7, %v5416_v8 }
0x57f3   : > { %v5419_v54 = vmul.f32 %v6784_v10, %v5417_v23 }
0x57f5   : > { %5421 = vrot.lane.b32.xlu0 %v5419_v54, %s6840_s12 }
0x5867   : > { %v5422_v55 = vpop.permute.xlu0 %5421 }
0x5868   : > { %v5424_v18 = vadd.f32 %v5422_v55, %v5410_v24 }
0x586a   : > { %6785 = vtanh.f32 %v5424_v18 }
0x5874   : > { %v6786_v31 = vpop.eup %6785 }
0x5875   : > { %5427 = vrot.lane.b32.xlu1 %v6786_v31, %s6840_s12 }
0x58e7   : > { %v5428_v12 = vpop.permute.xlu1 %5427 }
0x58e8   : > { %v7838_v13 = vmul.f32 %v6784_v10, %v5428_v12 }
0x58ea   : > { %5432 = vrot.lane.b32.xlu0 %v7838_v13, %s6841_s13 }
0x595c   : > { %v5433_v14 = vpop.permute.xlu0 %5432 }
0x595d   : > { %5943 = vmatmul.mubr.msk.f32.vlgmr.msra.gmra.mrb[36].mxu0 %vm3813_vm8, %v5433_v14 }
0x5a30   : > { %v5502_v15 = vpop.f32.mrb[36].mxu0 }
0x5a31   : > { %v5507_v19 = vadd.f32 %v5502_v15, %v7532_v5  ;;  %v5504_v20 = vpop.f32.mrb[37].mxu0 }
0x5a32   : > { %v5508_v22 = vadd.f32 %v5504_v20, %v7534_v6 }
0x5a33   : > { %6787 = vtanh.f32 %v5507_v19  ;;  %v5944_v30 = vmul.f32 -1.442695, %v5507_v19 }
0x5a34   : > { %6789 = vtanh.f32 %v5508_v22 }
0x5a35   : > { %6791 = vpow2.f32 %v5944_v30 }
0x5a3d   : > { %v6788_v25 = vpop.eup %6787 }
0x5a3e   : > { %v6790_v28 = vpop.eup %6789  ;;  %5520 = vrot.lane.b32.xlu1 %v6788_v25, %s6839_s30 }
0x5a3f   : > { %5522 = vrot.lane.b32.xlu0 %v6790_v28, %s6839_s30  ;;  %v6792_v33 = vpop.eup %6791 }
0x5a40   : > { %v5512_v9 = vadd.f32 1.0, %v6792_v33 }
0x5a42   : > { %6793 = vrcp.f32 %v5512_v9 }
0x5a4c   : > { %v6794_v17 = vpop.eup %6793 }
0x5a4d   : > { %v5517_v38 = vmul.f32 %v6794_v17, %v5424_v18 }
0x5ab0   : > { %v5521_v34 = vpop.permute.xlu1 %5520 }
0x5ab1   : > { %v5523_v35 = vpop.permute.xlu0 %5522 }
0x5ab2   : > { %v5524_v21 = vsel %vm3910_vm7, %v5521_v34, %v5523_v35 }
0x5ab3   : > { %v5526_v36 = vmul.f32 %v6794_v17, %v5524_v21 }
0x5ab5   : > { %5528 = vrot.lane.b32.xlu1 %v5526_v36, %s6840_s12 }
0x5b27   : > { %v5529_v39 = vpop.permute.xlu1 %5528 }
0x5b28   : > { %v5531_v40 = vadd.f32 %v5529_v39, %v5517_v38 }
0x5b2a   : > { %6795 = vtanh.f32 %v5531_v40 }
0x5b34   : > { %v6796_v41 = vpop.eup %6795 }
0x5b35   : > { %5534 = vrot.lane.b32.xlu0 %v6796_v41, %s6840_s12 }
0x5ba7   : > { %v5535_v42 = vpop.permute.xlu0 %5534 }
0x5ba8   : > { %v5537_v44 = vmul.f32 %v6794_v17, %v5535_v42 }
0x5baa   : > { %5539 = vrot.lane.b32.xlu1 %v5537_v44, %s6841_s13 }
0x5c1c   : > { %v5540_v46 = vpop.permute.xlu1 %5539 }
0x5c1d   : > { %5947 = vmatmul.mubr.msk.f32.vlgmr.msra.gmra.mrb[36].mxu1 %vm3813_vm8, %v5540_v46 }
0x5cf0   : > { %v5609_v47 = vpop.f32.mrb[36].mxu1 }
0x5cf1   : > { %v5614_v29 = vadd.f32 %v5609_v47, %v7532_v5  ;;  %v5611_v49 = vpop.f32.mrb[37].mxu1 }
0x5cf2   : > { %v5615_v52 = vadd.f32 %v5611_v49, %v7534_v6 }
0x5cf3   : > { %6797 = vtanh.f32 %v5614_v29  ;;  %v5948_v59 = vmul.f32 -1.442695, %v5614_v29 }
0x5cf4   : > { %6799 = vtanh.f32 %v5615_v52 }
0x5cf5   : > { %6801 = vpow2.f32 %v5948_v59 }
0x5cfd   : > { %v6798_v56 = vpop.eup %6797 }
0x5cfe   : > { %v6800_v57 = vpop.eup %6799  ;;  %5627 = vrot.lane.b32.xlu0 %v6798_v56, %s6839_s30 }
0x5cff   : > { %5629 = vrot.lane.b32.xlu1 %v6800_v57, %s6839_s30  ;;  %v6802_v60 = vpop.eup %6801 }
0x5d00   : > { %v5619_v61 = vadd.f32 1.0, %v6802_v60 }
0x5d02   : > { %6803 = vrcp.f32 %v5619_v61 }
0x5d0c   : > { %v6804_v2 = vpop.eup %6803 }
0x5d0d   : > { %v5624_v6 = vmul.f32 %v6804_v2, %v5531_v40 }
0x5d70   : > { %v5628_v0 = vpop.permute.xlu0 %5627 }
0x5d71   : > { %v5630_v1 = vpop.permute.xlu1 %5629 }
0x5d72   : > { %v5631_v5 = vsel %vm3910_vm7, %v5628_v0, %v5630_v1 }
0x5d73   : > { %v5633_v48 = vmul.f32 %v6804_v2, %v5631_v5 }
0x5d75   : > { %5635 = vrot.lane.b32.xlu0 %v5633_v48, %s6840_s12 }
0x5d79   : > { %5645 = vrot.lane.b32.xlu0 %v7565_v51, %s6842_s16 }
0x5d7d   : > { %5651 = vrot.lane.b32.xlu0 %v7607_v37, %s6824_s22  ;;  %s6845_s22 = smov 28  }
0x5d81   : > { %5657 = vrot.lane.b32.xlu0 %v7649_v43, %s6843_s14 }
0x5d85   : > { %5663 = vrot.lane.b32.xlu0 %v7691_v16, %s6821_s19  ;;  %s6846_s19 = smov 44  }
0x5d89   : > { %5670 = vrot.lane.b32.xlu0 %v7754_v11, %s6844_s29 }
0x5d8d   : > { %5676 = vrot.lane.b32.xlu0 %v7796_v27, %s6836_s24  ;;  %s6847_s24 = smov 52  }
0x5d91   : > { %5682 = vrot.lane.b32.xlu0 %v7838_v13, %s6834_s20  ;;  %s6848_s20 = smov 64  }
0x5de7   : > { %v5636_v51 = vpop.permute.xlu0 %5635 }
0x5de8   : > { %v5638_v4 = vadd.f32 %v5636_v51, %v5624_v6 }
0x5dea   : > { %6805 = vtanh.f32 %v5638_v4 }
0x5df4   : > { %v6806_v37 = vpop.eup %6805 }
0x5df5   : > { %5641 = vrot.lane.b32.xlu1 %v6806_v37, %s6840_s12 }
0x5df9   : > { %5648 = vrot.lane.b32.xlu1 %v7586_v32, %s6845_s22  ;;  %v5646_v32 = vpop.permute.xlu0 %5645 }
0x5dfd   : > { %5654 = vrot.lane.b32.xlu1 %v7628_v63, %s6840_s12  ;;  %v5652_v11 = vpop.permute.xlu0 %5651 }
0x5e01   : > { %5660 = vrot.lane.b32.xlu1 %v7670_v45, %s6846_s19 }
0x5e05   : > { %5666 = vrot.lane.b32.xlu1 %v7712_v3, %s6847_s24  ;;  %v5658_v3 = vpop.permute.xlu0 %5657 }
0x5e09   : > { %5673 = vrot.lane.b32.xlu1 %v7775_v62, %s6848_s20  ;;  %v5664_v7 = vpop.permute.xlu0 %5663 }
0x5e0d   : > { %5679 = vrot.lane.b32.xlu1 %v7820_v58, %s6835_s21  ;;  %v5671_v24 = vpop.permute.xlu0 %5670 }
0x5e11   : > { %5685 = vrot.lane.b32.xlu1 %v5537_v44, %s6833_s15  ;;  %v5677_v12 = vpop.permute.xlu0 %5676 }
0x5e15   : > { %v5683_v19 = vpop.permute.xlu0 %5682 }
0x5e67   : > { %v5642_v43 = vpop.permute.xlu1 %5641 }
0x5e68   : > { %v5644_v16 = vmul.f32 %v6804_v2, %v5642_v43 }
0x5e6a   : > { %5689 = vrot.lane.b32.xlu0 %v5644_v16, %s6832_s23  ;;  %s7908_s23 = sshll.u32 %s7910_s18, 3 }
0x5e6b   : > { %v5649_v63 = vpop.permute.xlu1 %5648  ;;  %s381_s30 = scalar_lea.vmem %s7906_s11, %s7908_s23 }
0x5e6c   : > { %v5692_v45 = vsel %vm438_vm1, %v5646_v32, %v5649_v63  ;;  %vm5714_vm1 = vcmask 490496  }
0x5e6d   : > { %v5694_v62 = vsel %vm5693_vm9, %v5692_v45, %v5652_v11 }
0x5e6f   : > { %v5655_v27 = vpop.permute.xlu1 %5654 }
0x5e70   : > { %v5696_v53 = vsel %vm5695_vm10, %v5694_v62, %v5655_v27 }
0x5e71   : > { %v5697_v58 = vsel %vm3575_vm6, %v5696_v53, %v5658_v3 }
0x5e73   : > { %v5661_v50 = vpop.permute.xlu1 %5660 }
0x5e74   : > { %v5698_v8 = vsel %vm3910_vm7, %v5697_v58, %v5661_v50 }
0x5e75   : > { %v5700_v23 = vsel %vm5699_vm11, %v5698_v8, %v5664_v7 }
0x5e77   : > { %v5667_v10 = vpop.permute.xlu1 %5666 }
0x5e78   : > { %v5702_v54 = vsel %vm5701_vm12, %v5700_v23, %v5667_v10 }
0x5e79   : > { %v5703_v18 = vsel %vm717_vm3, %v5702_v54, %v7734_v26 }
0x5e7a   : > { %v5704_v31 = vsel %vm3813_vm8, %v5703_v18, %v5671_v24 }
0x5e7b   : > { %v5674_v55 = vpop.permute.xlu1 %5673 }
0x5e7c   : > { %v5706_v14 = vsel %vm5705_vm13, %v5704_v31, %v5674_v55 }
0x5e7d   : > { %v5708_v15 = vsel %vm5707_vm14, %v5706_v14, %v5677_v12 }
0x5e7f   : > { %v5680_v13 = vpop.permute.xlu1 %5679 }
0x5e80   : > { %v5709_v20 = vsel %vm518_vm4, %v5708_v15, %v5680_v13 }
0x5e81   : > { %v5711_v25 = vsel %vm5710_vm15, %v5709_v20, %v5683_v19 }
0x5e83   : > { %v5686_v22 = vpop.permute.xlu1 %5685 }
0x5e84   : > { %v5713_v26 = vsel %vm5712_vm0, %v5711_v25, %v5686_v22 }
0x5edc   : > { %v5690_v28 = vpop.permute.xlu0 %5689 }
0x5edd   : > { %v5715_v30 = vsel %vm5714_vm1, %v5713_v26, %v5690_v28 }
0x5ede   : > { %5717 = vst.msk [vmem:[%s381_s30] sm:$0xff] %vm5716_vm2, %v5715_v30 }
0x5edf PF: > { %s21_s17 = sadd.s32 1, %s6817_s17  }
0x5ee0   : > { %p18_p4 = scmp.ge.s32.totalorder %s21_s17, 4  }
0x5ee2   :  { %20 = sbr.rel (!%p18_p4) target bundleno = 1 (0x1), region = 94 }

</bundles_post_ra>
